<compile_context>
chip_gen: v7x
topology: tpu7x:2x2x1
jax: 0.10.0
libtpu: 0.0.40
codegen_flags: <defaults>
</compile_context>

<pallas_src>
import functools

import jax
import jax.numpy as jnp
from jax.experimental import pallas as pl
from jax.experimental.pallas import tpu as pltpu

EPS = 1e-5
LANE = 128


def _rup(x, m):
    return ((x + m - 1) // m) * m


def _pad2(a, rows, cols):
    return jnp.pad(a, ((0, rows - a.shape[0]), (0, cols - a.shape[1])))


# ----------------------------------------------------------------------------
# Pallas kernel 1: tiled matmul (+ optional bias / activation) and optional
# per-tile BatchNorm partial statistics.  grid = (M tiles, K tiles).
# ----------------------------------------------------------------------------
def _matmul_kernel(a_ref, w_ref, *rest, has_bias, has_stats, act):
    idx = 0
    if has_bias:
        b_ref = rest[idx]; idx += 1
    y_ref = rest[idx]; idx += 1
    if has_stats:
        stats_ref = rest[idx]; idx += 1
    acc_ref = rest[idx]

    kk = pl.program_id(1)

    @pl.when(kk == 0)
    def _():
        acc_ref[...] = jnp.zeros_like(acc_ref)

    acc_ref[...] += jnp.dot(a_ref[...], w_ref[...],
                            preferred_element_type=jnp.float32)

    @pl.when(kk == pl.num_programs(1) - 1)
    def _():
        y = acc_ref[...]
        if has_bias:
            y = y + b_ref[...]
        if act == "relu":
            y = jnp.maximum(y, 0.0)
        elif act == "tanh":
            y = jnp.tanh(y)
        y_ref[...] = y
        if has_stats:
            s = jnp.sum(y, axis=0, keepdims=True)        # (1, N) column sums
            ss = jnp.sum(y * y, axis=0, keepdims=True)   # (1, N) column sumsq
            row = jax.lax.broadcasted_iota(jnp.int32, stats_ref.shape, 0)
            s8 = jnp.broadcast_to(s, stats_ref.shape)
            ss8 = jnp.broadcast_to(ss, stats_ref.shape)
            stats_ref[...] = jnp.where(row == 0, s8,
                                       jnp.where(row == 1, ss8, 0.0))


def _pick_tiles(m, k):
    tm = min(256, _rup(m, 32))          # multiple of 32 -> bf16 sublane aligned
    m_pad = _rup(m, tm)                 # pad M to a whole number of tiles
    k_pad = _rup(k, LANE)
    if k_pad <= 512:
        tk = k_pad
    else:
        tk = next(t for t in (512, 384, 256, 128) if k_pad % t == 0)
    return tm, m_pad, tk, k_pad


def _matmul_pass(a, wm, bias=None, *, act="none", collect_stats=False):
    """a:(M,K) f32, wm:(K,N) f32 -> (y_pad (M_pad,N_pad) f32, col_sum, col_sumsq, tm).

    Operands are cast to bf16 for the MXU; accumulation stays f32.
    """
    m, k = a.shape
    n = wm.shape[1]
    n_pad = _rup(n, LANE)
    tm, m_pad, tk, k_pad = _pick_tiles(m, k)
    grid_m = m_pad // tm
    grid_k = k_pad // tk

    a_p = _pad2(a, m_pad, k_pad).astype(jnp.bfloat16)
    w_p = _pad2(wm, k_pad, n_pad).astype(jnp.bfloat16)

    inputs = [a_p, w_p]
    in_specs = [
        pl.BlockSpec((tm, tk), lambda i, kk: (i, kk)),
        pl.BlockSpec((tk, n_pad), lambda i, kk: (kk, 0)),
    ]
    has_bias = bias is not None
    if has_bias:
        bias_p = jnp.pad(bias.astype(jnp.float32), (0, n_pad - n)).reshape(1, n_pad)
        inputs.append(bias_p)
        in_specs.append(pl.BlockSpec((1, n_pad), lambda i, kk: (0, 0)))

    out_shape = [jax.ShapeDtypeStruct((m_pad, n_pad), jnp.float32)]
    out_specs = [pl.BlockSpec((tm, n_pad), lambda i, kk: (i, 0))]
    if collect_stats:
        out_shape.append(jax.ShapeDtypeStruct((grid_m * 8, n_pad), jnp.float32))
        out_specs.append(pl.BlockSpec((8, n_pad), lambda i, kk: (i, 0)))

    kernel = functools.partial(_matmul_kernel, has_bias=has_bias,
                               has_stats=collect_stats, act=act)

    cost = pl.CostEstimate(
        flops=2 * m_pad * k_pad * n_pad,
        transcendentals=m_pad * n_pad if act == "tanh" else 0,
        bytes_accessed=a_p.size * 2 + w_p.size * 2 * grid_m + m_pad * n_pad * 4,
    )

    outs = pl.pallas_call(
        kernel,
        grid=(grid_m, grid_k),
        in_specs=in_specs,
        out_specs=out_specs,
        out_shape=out_shape,
        scratch_shapes=[pltpu.VMEM((tm, n_pad), jnp.float32)],
        compiler_params=pltpu.CompilerParams(
            dimension_semantics=("parallel", "arbitrary")),
        cost_estimate=cost,
    )(*inputs)

    if collect_stats:
        y_pad, stats = outs
        stats = stats.reshape(grid_m, 8, n_pad)
        col_sum = jnp.sum(stats[:, 0, :n], axis=0)
        col_sumsq = jnp.sum(stats[:, 1, :n], axis=0)
        return y_pad, col_sum, col_sumsq, tm
    (y_pad,) = outs
    return y_pad, None, None, tm


# ----------------------------------------------------------------------------
# Pallas kernel 2: lane-dense elementwise  y*scale + shift (+res) + activation
# ----------------------------------------------------------------------------
def _scale_shift_kernel(y_ref, sc_ref, sh_ref, *rest, has_res, act):
    idx = 0
    if has_res:
        r_ref = rest[idx]; idx += 1
    o_ref = rest[idx]
    y = y_ref[...] * sc_ref[...] + sh_ref[...]
    if has_res:
        y = y + r_ref[...]
    if act == "relu":
        y = jnp.maximum(y, 0.0)
    elif act == "tanh":
        y = jnp.tanh(y)
    o_ref[...] = y


def _scale_shift_act(y_pad, scale, shift, *, residual=None, act="none", tm, m, n):
    m_pad, n_pad = y_pad.shape
    grid_m = m_pad // tm
    scale_p = jnp.pad(scale.astype(jnp.float32), (0, n_pad - n)).reshape(1, n_pad)
    shift_p = jnp.pad(shift.astype(jnp.float32), (0, n_pad - n)).reshape(1, n_pad)

    inputs = [y_pad, scale_p, shift_p]
    in_specs = [
        pl.BlockSpec((tm, n_pad), lambda i: (i, 0)),
        pl.BlockSpec((1, n_pad), lambda i: (0, 0)),
        pl.BlockSpec((1, n_pad), lambda i: (0, 0)),
    ]
    has_res = residual is not None
    if has_res:
        inputs.append(_pad2(residual.astype(jnp.float32), m_pad, n_pad))
        in_specs.append(pl.BlockSpec((tm, n_pad), lambda i: (i, 0)))

    kernel = functools.partial(_scale_shift_kernel, has_res=has_res, act=act)
    out = pl.pallas_call(
        kernel,
        grid=(grid_m,),
        in_specs=in_specs,
        out_specs=pl.BlockSpec((tm, n_pad), lambda i: (i, 0)),
        out_shape=jax.ShapeDtypeStruct((m_pad, n_pad), jnp.float32),
        compiler_params=pltpu.CompilerParams(dimension_semantics=("parallel",)),
    )(*inputs)
    return out[:m, :n]


def _bn_affine(col_sum, col_sumsq, count, gamma, beta):
    """Train-mode BN (biased variance) folded into per-channel scale/shift."""
    cnt = jnp.float32(count)
    mean = col_sum / cnt
    var = jnp.maximum(col_sumsq / cnt - mean * mean, 0.0)
    inv = jax.lax.rsqrt(var + EPS)
    scale = gamma * inv
    shift = beta - mean * scale
    return scale, shift


# ----------------------------------------------------------------------------
# JAX glue: padding / im2col / layer wrappers
# ----------------------------------------------------------------------------
def _im2col(x, kh, kw, stride):
    n, h, w, c = x.shape
    ho = (h - kh) // stride + 1
    wo = (w - kw) // stride + 1
    cols = []
    for i in range(kh):
        for j in range(kw):
            cols.append(x[:, i:i + ho * stride:stride, j:j + wo * stride:stride, :])
    p = jnp.stack(cols, axis=3)                       # (N, Ho, Wo, kh*kw, C)
    return p.reshape(n, ho, wo, kh * kw * c), ho, wo


def _conv_patches(x, w_oihw, *, stride=1, pad=0, pad_mode="zero"):
    cout, cin, kh, kw = w_oihw.shape
    if pad > 0:
        mode = "reflect" if pad_mode == "reflect" else "constant"
        x = jnp.pad(x, ((0, 0), (pad, pad), (pad, pad), (0, 0)), mode=mode)
    patches, ho, wo = _im2col(x, kh, kw, stride)
    n = x.shape[0]
    m = n * ho * wo
    k = kh * kw * cin
    a = patches.reshape(m, k)
    wm = jnp.transpose(w_oihw, (2, 3, 1, 0)).reshape(k, cout)
    return a, wm, ho, wo, m, cout


def conv2d_bn(x, w, gamma, beta, *, stride=1, pad=0, pad_mode="zero",
              act="relu", residual=None):
    """Conv2d (OIHW weight; any bias cancels under train-mode BN and is skipped)
    -> BatchNorm (batch statistics) -> [+residual] -> activation."""
    n = x.shape[0]
    a, wm, ho, wo, m, cout = _conv_patches(x, w, stride=stride, pad=pad,
                                           pad_mode=pad_mode)
    y_pad, s, ss, tm = _matmul_pass(a, wm, collect_stats=True)
    scale, shift = _bn_affine(s, ss, m, gamma, beta)
    res_flat = residual.reshape(m, cout) if residual is not None else None
    out = _scale_shift_act(y_pad, scale, shift, residual=res_flat, act=act,
                           tm=tm, m=m, n=cout)
    return out.reshape(n, ho, wo, cout)


def conv2d_plain(x, w, b, *, stride=1, pad=0, pad_mode="zero", act="none"):
    """Conv2d with bias, no normalization."""
    n = x.shape[0]
    a, wm, ho, wo, m, cout = _conv_patches(x, w, stride=stride, pad=pad,
                                           pad_mode=pad_mode)
    y_pad, _, _, _ = _matmul_pass(a, wm, bias=b, act=act, collect_stats=False)
    return y_pad[:m, :cout].reshape(n, ho, wo, cout)


def conv_transpose2d_bn(x, w_t, gamma, beta, *, act="relu"):
    """nn.ConvTranspose2d(Cin,Cout,3,stride=2,padding=1,output_padding=1,bias=False)
    -> train-mode BN -> act, via sub-pixel (output parity) decomposition.
    w_t: (Cin, Cout, 3, 3) PyTorch layout."""
    n, h, w, cin = x.shape
    cout = w_t.shape[1]
    wk = jnp.transpose(w_t, (1, 0, 2, 3))            # (Cout, Cin, 3, 3)
    taps = {0: (1,), 1: (2, 0)}                      # output parity -> kernel taps

    parts = []
    tot_sum = jnp.zeros((cout,), jnp.float32)
    tot_ss = jnp.zeros((cout,), jnp.float32)
    for py in (0, 1):
        for px in (0, 1):
            th, tw = taps[py], taps[px]
            kern = jnp.stack(
                [jnp.stack([wk[:, :, a_, b_] for b_ in tw], axis=-1) for a_ in th],
                axis=-2)                             # (Cout, Cin, len(th), len(tw))
            xp = jnp.pad(x, ((0, 0), (0, len(th) - 1), (0, len(tw) - 1), (0, 0)))
            a_mat, wm, _, _, m, _ = _conv_patches(xp, kern, stride=1, pad=0)
            y_pad, s, ss, tm = _matmul_pass(a_mat, wm, collect_stats=True)
            parts.append((py, px, y_pad, tm, m))
            tot_sum = tot_sum + s
            tot_ss = tot_ss + ss

    count = n * (2 * h) * (2 * w)                    # BN stats over full output
    scale, shift = _bn_affine(tot_sum, tot_ss, count, gamma, beta)

    out = jnp.zeros((n, 2 * h, 2 * w, cout), jnp.float32)
    for py, px, y_pad, tm, m in parts:
        sub = _scale_shift_act(y_pad, scale, shift, residual=None, act=act,
                               tm=tm, m=m, n=cout)
        out = out.at[:, py::2, px::2, :].set(sub.reshape(n, h, w, cout))
    return out


def resnet_block(x, p):
    """out = (input_conv(x) if in_dim else x) + BN(conv3(ReLU(BN(conv3(x)))))."""
    skip = x
    if "input_conv_w" in p:
        skip = conv2d_plain(x, p["input_conv_w"], p["input_conv_b"], act="none")
    # conv biases before train-mode BN cancel exactly -> not applied.
    h = conv2d_bn(x, p["conv1_w"], p["bn1_g"], p["bn1_b"],
                  pad=1, pad_mode="reflect", act="relu")
    return conv2d_bn(h, p["conv2_w"], p["bn2_g"], p["bn2_b"],
                     pad=1, pad_mode="reflect", act="none", residual=skip)


# ----------------------------------------------------------------------------
# Parameter construction (deterministic, mirrors the PyTorch __init__)
# ----------------------------------------------------------------------------
def convert_super_channels(super_channels, n_downsampling=2):
    assert n_downsampling == 2, "only n_downsampling == 2 supported here"
    n1 = 10
    result, cnt = [], 0
    for i in range(n1):
        if i in [1, 4, 7, 10]:
            result.append(super_channels[cnt] * 2 ** cnt)
            cnt += 1
    for i in range(3):
        if len(super_channels) == 6:
            result.append(super_channels[3] * 4)
        else:
            result.append(super_channels[i + 3] * 4)
    cnt = 2
    for i in range(n1 + 9, n1 + 21):
        if i in [22, 25, 28]:
            cnt -= 1
            if len(super_channels) == 6:
                channel = super_channels[5 - cnt] * 2 ** cnt
            else:
                channel = super_channels[7 - cnt] * 2 ** cnt
            result.append(int(channel))
    return result


def _init_conv(key, cout, cin, kh, kw, bias=True):
    k1, k2 = jax.random.split(key)
    fan_in = cin * kh * kw
    w = jax.random.normal(k1, (cout, cin, kh, kw), jnp.float32) / jnp.sqrt(fan_in)
    b = 0.01 * jax.random.normal(k2, (cout,), jnp.float32) if bias else None
    return w, b


def _init_bn(key, c):
    k1, k2 = jax.random.split(key)
    return (1.0 + 0.1 * jax.random.normal(k1, (c,), jnp.float32),
            0.1 * jax.random.normal(k2, (c,), jnp.float32))


def init_params(key, input_nc, output_nc, n_downsampling, n_blocks, super_channels):
    channels = convert_super_channels(super_channels, n_downsampling)
    keys = iter(jax.random.split(key, 128))
    params = {}

    w, _ = _init_conv(next(keys), channels[0], input_nc, 7, 7, bias=False)
    g, b = _init_bn(next(keys), channels[0])
    params["head"] = {"w": w, "g": g, "b": b}

    downs = []
    for i in range(n_downsampling):
        w, _ = _init_conv(next(keys), channels[i + 1], channels[i], 3, 3, bias=False)
        g, b = _init_bn(next(keys), channels[i + 1])
        downs.append({"w": w, "g": g, "b": b})
    params["down"] = downs

    def make_block(dim, in_dim):
        p = {}
        eff_in = in_dim if in_dim is not None else dim
        if in_dim is not None:
            w, bb = _init_conv(next(keys), dim, in_dim, 1, 1, bias=True)
            p["input_conv_w"], p["input_conv_b"] = w, bb
        w, _ = _init_conv(next(keys), dim, eff_in, 3, 3, bias=True)
        p["conv1_w"] = w
        p["bn1_g"], p["bn1_b"] = _init_bn(next(keys), dim)
        w, _ = _init_conv(next(keys), dim, dim, 3, 3, bias=True)
        p["conv2_w"] = w
        p["bn2_g"], p["bn2_b"] = _init_bn(next(keys), dim)
        return p

    n_blocks1 = n_blocks // 3
    n_blocks2 = n_blocks1
    n_blocks3 = n_blocks - n_blocks1 - n_blocks2
    blocks = []
    for i in range(n_blocks1):
        blocks.append(make_block(channels[n_downsampling], None))
    for i in range(n_blocks2):
        blocks.append(make_block(channels[n_downsampling + 1],
                                 channels[n_downsampling] if i == 0 else None))
    for i in range(n_blocks3):
        blocks.append(make_block(channels[n_downsampling + 2],
                                 channels[n_downsampling + 1] if i == 0 else None))
    params["blocks"] = blocks

    ups = []
    for i in range(n_downsampling):
        cin = channels[n_downsampling + 3 + i]
        cout = channels[n_downsampling + 3 + i + 1]
        w = jax.random.normal(next(keys), (cin, cout, 3, 3), jnp.float32) / jnp.sqrt(cin * 9)
        g, b = _init_bn(next(keys), cout)
        ups.append({"w": w, "g": g, "b": b})
    params["up"] = ups

    w, bb = _init_conv(next(keys), output_nc, channels[2 * n_downsampling + 3], 7, 7, bias=True)
    params["tail"] = {"w": w, "b": bb}
    return params


# ----------------------------------------------------------------------------
# Forward pass (equivalent to GlobalGeneratorFromSuperChannels.forward)
# ----------------------------------------------------------------------------
def global_generator_forward(params, x_nchw):
    x = jnp.transpose(x_nchw, (0, 2, 3, 1)).astype(jnp.float32)  # NCHW -> NHWC

    p = params["head"]
    x = conv2d_bn(x, p["w"], p["g"], p["b"], pad=3, pad_mode="reflect", act="relu")

    for p in params["down"]:
        x = conv2d_bn(x, p["w"], p["g"], p["b"], stride=2, pad=1,
                      pad_mode="zero", act="relu")

    for bp in params["blocks"]:
        x = resnet_block(x, bp)

    for p in params["up"]:
        x = conv_transpose2d_bn(x, p["w"], p["g"], p["b"], act="relu")

    p = params["tail"]
    x = conv2d_plain(x, p["w"], p["b"], pad=3, pad_mode="reflect", act="tanh")

    return jnp.transpose(x, (0, 3, 1, 2))  # NHWC -> NCHW


if __name__ == "__main__":
    key = jax.random.PRNGKey(0)
    kp, kx = jax.random.split(key)

    input_nc, output_nc = 4, 3
    n_downsampling, n_blocks = 2, 3
    # len != 6 branch of convert_super_channels; values chosen so the network
    # is shape-consistent (channels[4] == channels[5]).
    super_channels = [8, 8, 8, 8, 8, 8, 8, 8, 16]

    params = init_params(kp, input_nc, output_nc, n_downsampling, n_blocks, super_channels)
    x = jax.random.normal(kx, (2, input_nc, 16, 16), jnp.float32)

    fwd = jax.jit(global_generator_forward)
    out = jax.block_until_ready(fwd(params, x))

    assert out.shape == (2, output_nc, 16, 16), out.shape
    assert bool(jnp.all(jnp.isfinite(out)))
    print("KERNEL_OK")
</pallas_src>

<mosaic_0001>
module attributes {stable_mosaic.version = 11 : i64} {
  func.func @_matmul_kernel(%arg0: i32, %arg1: i32, %arg2: memref<256x256xbf16, #tpu.memory_space<vmem>>, %arg3: memref<256x128xbf16, #tpu.memory_space<vmem>>, %arg4: memref<256x128xf32, #tpu.memory_space<vmem>>, %arg5: memref<8x128xf32, #tpu.memory_space<vmem>>, %arg6: memref<256x128xf32, #tpu.memory_space<vmem>>) attributes {dimension_semantics = [#tpu.dimension_semantics<parallel>, #tpu.dimension_semantics<arbitrary>], iteration_bounds = array<i64: 2, 1>, scalar_prefetch = 0 : i64, scratch_operands = 1 : i64, tpu.core_type = #tpu.core_type<tc>, window_params = [{transform_indices = @transform_0, window_bounds = array<i64: 256, 256>}, {transform_indices = @transform_1, window_bounds = array<i64: 256, 128>}, {transform_indices = @transform_2, window_bounds = array<i64: 256, 128>}, {transform_indices = @transform_3, window_bounds = array<i64: 8, 128>}]} {
    %c0_i32 = arith.constant 0 : i32
    %0 = arith.cmpi eq, %arg1, %c0_i32 : i32
    %1 = arith.extui %0 : i1 to i32
    %c0_i32_0 = arith.constant 0 : i32
    %2 = arith.cmpi ne, %1, %c0_i32_0 : i32
    scf.if %2 {
      %cst_10 = arith.constant 0.000000e+00 : f32
      %12 = vector.broadcast %cst_10 : f32 to vector<256x128xf32>
      %c0_11 = arith.constant 0 : index
      %c0_12 = arith.constant 0 : index
      %13 = vector.load %arg6[%c0_11, %c0_12] : memref<256x128xf32, #tpu.memory_space<vmem>>, vector<256x128xf32>
      tpu.vector_store %arg6[%c0_11, %c0_12], %12 {strides = array<i32>} : memref<256x128xf32, #tpu.memory_space<vmem>>, vector<256x128xf32>,
    } else {
    }
    %c0 = arith.constant 0 : index
    %c0_1 = arith.constant 0 : index
    %3 = vector.load %arg6[%c0, %c0_1] : memref<256x128xf32, #tpu.memory_space<vmem>>, vector<256x128xf32>
    %c0_2 = arith.constant 0 : index
    %c0_3 = arith.constant 0 : index
    %4 = vector.load %arg2[%c0_2, %c0_3] : memref<256x256xbf16, #tpu.memory_space<vmem>>, vector<256x256xbf16>
    %c0_4 = arith.constant 0 : index
    %c0_5 = arith.constant 0 : index
    %5 = vector.load %arg3[%c0_4, %c0_5] : memref<256x128xbf16, #tpu.memory_space<vmem>>, vector<256x128xbf16>
    %cst = arith.constant dense<0.000000e+00> : vector<256x128xf32>
    %6 = tpu.matmul %4, %5, %cst {dimension_numbers = #tpu.dot_dimension_numbers<[1], [0], [0], [1], [0, 0, 1, 1], [], []>} : vector<256x256xbf16>, vector<256x128xbf16>, vector<256x128xf32> -> vector<256x128xf32>
    %7 = arith.addf %3, %6 : vector<256x128xf32>
    %c0_6 = arith.constant 0 : index
    %c0_7 = arith.constant 0 : index
    %8 = vector.load %arg6[%c0_6, %c0_7] : memref<256x128xf32, #tpu.memory_space<vmem>>, vector<256x128xf32>
    tpu.vector_store %arg6[%c0_6, %c0_7], %7 {strides = array<i32>} : memref<256x128xf32, #tpu.memory_space<vmem>>, vector<256x128xf32>,
    %c0_i32_8 = arith.constant 0 : i32
    %9 = arith.cmpi eq, %arg1, %c0_i32_8 : i32
    %10 = arith.extui %9 : i1 to i32
    %c0_i32_9 = arith.constant 0 : i32
    %11 = arith.cmpi ne, %10, %c0_i32_9 : i32
    scf.if %11 {
      %c0_10 = arith.constant 0 : index
      %c0_11 = arith.constant 0 : index
      %12 = vector.load %arg6[%c0_10, %c0_11] : memref<256x128xf32, #tpu.memory_space<vmem>>, vector<256x128xf32>
      %c0_12 = arith.constant 0 : index
      %c0_13 = arith.constant 0 : index
      %13 = vector.load %arg4[%c0_12, %c0_13] : memref<256x128xf32, #tpu.memory_space<vmem>>, vector<256x128xf32>
      tpu.vector_store %arg4[%c0_12, %c0_13], %12 {strides = array<i32>} : memref<256x128xf32, #tpu.memory_space<vmem>>, vector<256x128xf32>,
      %cst_14 = arith.constant dense<0.000000e+00> : vector<128xf32>
      %14 = vector.multi_reduction <add>, %12, %cst_14 [0] : vector<256x128xf32> to vector<128xf32>
      %15 = vector.shape_cast %14 : vector<128xf32> to vector<1x128xf32>
      %16 = arith.mulf %12, %12 : vector<256x128xf32>
      %cst_15 = arith.constant dense<0.000000e+00> : vector<128xf32>
      %17 = vector.multi_reduction <add>, %16, %cst_15 [0] : vector<256x128xf32> to vector<128xf32>
      %18 = vector.shape_cast %17 : vector<128xf32> to vector<1x128xf32>
      %19 = tpu.iota {dimensions = array<i32: 0>} : vector<8x128xi32>
      %20 = vector.shape_cast %15 : vector<1x128xf32> to vector<1x128xf32>
      %21 = vector.broadcast %20 : vector<1x128xf32> to vector<8x128xf32>
      %22 = vector.shape_cast %18 : vector<1x128xf32> to vector<1x128xf32>
      %23 = vector.broadcast %22 : vector<1x128xf32> to vector<8x128xf32>
      %c0_i32_16 = arith.constant 0 : i32
      %24 = vector.broadcast %c0_i32_16 : i32 to vector<8x128xi32>
      %25 = arith.cmpi eq, %19, %24 : vector<8x128xi32>
      %c1_i32 = arith.constant 1 : i32
      %26 = vector.broadcast %c1_i32 : i32 to vector<8x128xi32>
      %27 = arith.cmpi eq, %19, %26 : vector<8x128xi32>
      %cst_17 = arith.constant 0.000000e+00 : f32
      %28 = vector.broadcast %cst_17 : f32 to vector<8x128xf32>
      %29 = arith.select %27, %23, %28 : vector<8x128xi1>, vector<8x128xf32>
      %30 = arith.select %25, %21, %29 : vector<8x128xi1>, vector<8x128xf32>
      %c0_18 = arith.constant 0 : index
      %c0_19 = arith.constant 0 : index
      %31 = vector.load %arg5[%c0_18, %c0_19] : memref<8x128xf32, #tpu.memory_space<vmem>>, vector<8x128xf32>
      tpu.vector_store %arg5[%c0_18, %c0_19], %30 {strides = array<i32>} : memref<8x128xf32, #tpu.memory_space<vmem>>, vector<8x128xf32>,
    } else {
    }
    return
  }
  func.func @transform_0(%arg0: i32, %arg1: i32) -> (i32, i32) {
    %c0_i32 = arith.constant 0 : i32
    return %arg0, %arg1 : i32, i32
  }
  func.func @transform_1(%arg0: i32, %arg1: i32) -> (i32, i32) {
    %c0_i32 = arith.constant 0 : i32
    %c0_i32_0 = arith.constant 0 : i32
    return %arg1, %c0_i32 : i32, i32
  }
  func.func @transform_2(%arg0: i32, %arg1: i32) -> (i32, i32) {
    %c0_i32 = arith.constant 0 : i32
    %c0_i32_0 = arith.constant 0 : i32
    return %arg0, %c0_i32 : i32, i32
  }
  func.func @transform_3(%arg0: i32, %arg1: i32) -> (i32, i32) {
    %c0_i32 = arith.constant 0 : i32
    %c0_i32_0 = arith.constant 0 : i32
    return %arg0, %c0_i32 : i32, i32
  }
}

module attributes {stable_mosaic.version = 11 : i64} {
  func.func @_scale_shift_kernel(%arg0: i32, %arg1: memref<256x128xf32, #tpu.memory_space<vmem>>, %arg2: memref<1x128xf32, #tpu.memory_space<vmem>>, %arg3: memref<1x128xf32, #tpu.memory_space<vmem>>, %arg4: memref<256x128xf32, #tpu.memory_space<vmem>>) attributes {dimension_semantics = [#tpu.dimension_semantics<parallel>], iteration_bounds = array<i64: 2>, scalar_prefetch = 0 : i64, scratch_operands = 0 : i64, tpu.core_type = #tpu.core_type<tc>, window_params = [{transform_indices = @transform_0, window_bounds = array<i64: 256, 128>}, {pipeline_mode = #tpu.pipeline_mode<synchronous>, transform_indices = @transform_1, window_bounds = array<i64: 1, 128>}, {pipeline_mode = #tpu.pipeline_mode<synchronous>, transform_indices = @transform_2, window_bounds = array<i64: 1, 128>}, {transform_indices = @transform_3, window_bounds = array<i64: 256, 128>}]} {
    %c0 = arith.constant 0 : index
    %c0_0 = arith.constant 0 : index
    %0 = vector.load %arg1[%c0, %c0_0] : memref<256x128xf32, #tpu.memory_space<vmem>>, vector<256x128xf32>
    %c0_1 = arith.constant 0 : index
    %c0_2 = arith.constant 0 : index
    %1 = vector.load %arg2[%c0_1, %c0_2] : memref<1x128xf32, #tpu.memory_space<vmem>>, vector<1x128xf32>
    %2 = vector.broadcast %1 : vector<1x128xf32> to vector<256x128xf32>
    %3 = arith.mulf %0, %2 : vector<256x128xf32>
    %c0_3 = arith.constant 0 : index
    %c0_4 = arith.constant 0 : index
    %4 = vector.load %arg3[%c0_3, %c0_4] : memref<1x128xf32, #tpu.memory_space<vmem>>, vector<1x128xf32>
    %5 = vector.broadcast %4 : vector<1x128xf32> to vector<256x128xf32>
    %6 = arith.addf %3, %5 : vector<256x128xf32>
    %cst = arith.constant 0.000000e+00 : f32
    %7 = vector.broadcast %cst : f32 to vector<256x128xf32>
    %8 = arith.maximumf %6, %7 : vector<256x128xf32>
    %c0_5 = arith.constant 0 : index
    %c0_6 = arith.constant 0 : index
    %9 = vector.load %arg4[%c0_5, %c0_6] : memref<256x128xf32, #tpu.memory_space<vmem>>, vector<256x128xf32>
    tpu.vector_store %arg4[%c0_5, %c0_6], %8 {strides = array<i32>} : memref<256x128xf32, #tpu.memory_space<vmem>>, vector<256x128xf32>,
    return
  }
  func.func @transform_0(%arg0: i32) -> (i32, i32) {
    %c0_i32 = arith.constant 0 : i32
    %c0_i32_0 = arith.constant 0 : i32
    return %arg0, %c0_i32 : i32, i32
  }
  func.func @transform_1(%arg0: i32) -> (i32, i32) {
    %c0_i32 = arith.constant 0 : i32
    %c0_i32_0 = arith.constant 0 : i32
    %c0_i32_1 = arith.constant 0 : i32
    return %c0_i32, %c0_i32_0 : i32, i32
  }
  func.func @transform_2(%arg0: i32) -> (i32, i32) {
    %c0_i32 = arith.constant 0 : i32
    %c0_i32_0 = arith.constant 0 : i32
    %c0_i32_1 = arith.constant 0 : i32
    return %c0_i32, %c0_i32_0 : i32, i32
  }
  func.func @transform_3(%arg0: i32) -> (i32, i32) {
    %c0_i32 = arith.constant 0 : i32
    %c0_i32_0 = arith.constant 0 : i32
    return %arg0, %c0_i32 : i32, i32
  }
}

module attributes {stable_mosaic.version = 11 : i64} {
  func.func @_matmul_kernel(%arg0: i32, %arg1: i32, %arg2: memref<128x128xbf16, #tpu.memory_space<vmem>>, %arg3: memref<128x128xbf16, #tpu.memory_space<vmem>>, %arg4: memref<128x128xf32, #tpu.memory_space<vmem>>, %arg5: memref<8x128xf32, #tpu.memory_space<vmem>>, %arg6: memref<128x128xf32, #tpu.memory_space<vmem>>) attributes {dimension_semantics = [#tpu.dimension_semantics<parallel>, #tpu.dimension_semantics<arbitrary>], iteration_bounds = array<i64: 1, 1>, scalar_prefetch = 0 : i64, scratch_operands = 1 : i64, tpu.core_type = #tpu.core_type<tc>, window_params = [{transform_indices = @transform_0, window_bounds = array<i64: 128, 128>}, {transform_indices = @transform_1, window_bounds = array<i64: 128, 128>}, {transform_indices = @transform_2, window_bounds = array<i64: 128, 128>}, {transform_indices = @transform_3, window_bounds = array<i64: 8, 128>}]} {
    %c0_i32 = arith.constant 0 : i32
    %0 = arith.cmpi eq, %arg1, %c0_i32 : i32
    %1 = arith.extui %0 : i1 to i32
    %c0_i32_0 = arith.constant 0 : i32
    %2 = arith.cmpi ne, %1, %c0_i32_0 : i32
    scf.if %2 {
      %cst_10 = arith.constant 0.000000e+00 : f32
      %12 = vector.broadcast %cst_10 : f32 to vector<128x128xf32>
      %c0_11 = arith.constant 0 : index
      %c0_12 = arith.constant 0 : index
      %13 = vector.load %arg6[%c0_11, %c0_12] : memref<128x128xf32, #tpu.memory_space<vmem>>, vector<128x128xf32>
      tpu.vector_store %arg6[%c0_11, %c0_12], %12 {strides = array<i32>} : memref<128x128xf32, #tpu.memory_space<vmem>>, vector<128x128xf32>,
    } else {
    }
    %c0 = arith.constant 0 : index
    %c0_1 = arith.constant 0 : index
    %3 = vector.load %arg6[%c0, %c0_1] : memref<128x128xf32, #tpu.memory_space<vmem>>, vector<128x128xf32>
    %c0_2 = arith.constant 0 : index
    %c0_3 = arith.constant 0 : index
    %4 = vector.load %arg2[%c0_2, %c0_3] : memref<128x128xbf16, #tpu.memory_space<vmem>>, vector<128x128xbf16>
    %c0_4 = arith.constant 0 : index
    %c0_5 = arith.constant 0 : index
    %5 = vector.load %arg3[%c0_4, %c0_5] : memref<128x128xbf16, #tpu.memory_space<vmem>>, vector<128x128xbf16>
    %cst = arith.constant dense<0.000000e+00> : vector<128x128xf32>
    %6 = tpu.matmul %4, %5, %cst {dimension_numbers = #tpu.dot_dimension_numbers<[1], [0], [0], [1], [0, 0, 1, 1], [], []>} : vector<128x128xbf16>, vector<128x128xbf16>, vector<128x128xf32> -> vector<128x128xf32>
    %7 = arith.addf %3, %6 : vector<128x128xf32>
    %c0_6 = arith.constant 0 : index
    %c0_7 = arith.constant 0 : index
    %8 = vector.load %arg6[%c0_6, %c0_7] : memref<128x128xf32, #tpu.memory_space<vmem>>, vector<128x128xf32>
    tpu.vector_store %arg6[%c0_6, %c0_7], %7 {strides = array<i32>} : memref<128x128xf32, #tpu.memory_space<vmem>>, vector<128x128xf32>,
    %c0_i32_8 = arith.constant 0 : i32
    %9 = arith.cmpi eq, %arg1, %c0_i32_8 : i32
    %10 = arith.extui %9 : i1 to i32
    %c0_i32_9 = arith.constant 0 : i32
    %11 = arith.cmpi ne, %10, %c0_i32_9 : i32
    scf.if %11 {
      %c0_10 = arith.constant 0 : index
      %c0_11 = arith.constant 0 : index
      %12 = vector.load %arg6[%c0_10, %c0_11] : memref<128x128xf32, #tpu.memory_space<vmem>>, vector<128x128xf32>
      %c0_12 = arith.constant 0 : index
      %c0_13 = arith.constant 0 : index
      %13 = vector.load %arg4[%c0_12, %c0_13] : memref<128x128xf32, #tpu.memory_space<vmem>>, vector<128x128xf32>
      tpu.vector_store %arg4[%c0_12, %c0_13], %12 {strides = array<i32>} : memref<128x128xf32, #tpu.memory_space<vmem>>, vector<128x128xf32>,
      %cst_14 = arith.constant dense<0.000000e+00> : vector<128xf32>
      %14 = vector.multi_reduction <add>, %12, %cst_14 [0] : vector<128x128xf32> to vector<128xf32>
      %15 = vector.shape_cast %14 : vector<128xf32> to vector<1x128xf32>
      %16 = arith.mulf %12, %12 : vector<128x128xf32>
      %cst_15 = arith.constant dense<0.000000e+00> : vector<128xf32>
      %17 = vector.multi_reduction <add>, %16, %cst_15 [0] : vector<128x128xf32> to vector<128xf32>
      %18 = vector.shape_cast %17 : vector<128xf32> to vector<1x128xf32>
      %19 = tpu.iota {dimensions = array<i32: 0>} : vector<8x128xi32>
      %20 = vector.shape_cast %15 : vector<1x128xf32> to vector<1x128xf32>
      %21 = vector.broadcast %20 : vector<1x128xf32> to vector<8x128xf32>
      %22 = vector.shape_cast %18 : vector<1x128xf32> to vector<1x128xf32>
      %23 = vector.broadcast %22 : vector<1x128xf32> to vector<8x128xf32>
      %c0_i32_16 = arith.constant 0 : i32
      %24 = vector.broadcast %c0_i32_16 : i32 to vector<8x128xi32>
      %25 = arith.cmpi eq, %19, %24 : vector<8x128xi32>
      %c1_i32 = arith.constant 1 : i32
      %26 = vector.broadcast %c1_i32 : i32 to vector<8x128xi32>
      %27 = arith.cmpi eq, %19, %26 : vector<8x128xi32>
      %cst_17 = arith.constant 0.000000e+00 : f32
      %28 = vector.broadcast %cst_17 : f32 to vector<8x128xf32>
      %29 = arith.select %27, %23, %28 : vector<8x128xi1>, vector<8x128xf32>
      %30 = arith.select %25, %21, %29 : vector<8x128xi1>, vector<8x128xf32>
      %c0_18 = arith.constant 0 : index
      %c0_19 = arith.constant 0 : index
      %31 = vector.load %arg5[%c0_18, %c0_19] : memref<8x128xf32, #tpu.memory_space<vmem>>, vector<8x128xf32>
      tpu.vector_store %arg5[%c0_18, %c0_19], %30 {strides = array<i32>} : memref<8x128xf32, #tpu.memory_space<vmem>>, vector<8x128xf32>,
    } else {
    }
    return
  }
  func.func @transform_0(%arg0: i32, %arg1: i32) -> (i32, i32) {
    %c0_i32 = arith.constant 0 : i32
    return %arg0, %arg1 : i32, i32
  }
  func.func @transform_1(%arg0: i32, %arg1: i32) -> (i32, i32) {
    %c0_i32 = arith.constant 0 : i32
    %c0_i32_0 = arith.constant 0 : i32
    return %arg1, %c0_i32 : i32, i32
  }
  func.func @transform_2(%arg0: i32, %arg1: i32) -> (i32, i32) {
    %c0_i32 = arith.constant 0 : i32
    %c0_i32_0 = arith.constant 0 : i32
    return %arg0, %c0_i32 : i32, i32
  }
  func.func @transform_3(%arg0: i32, %arg1: i32) -> (i32, i32) {
    %c0_i32 = arith.constant 0 : i32
    %c0_i32_0 = arith.constant 0 : i32
    return %arg0, %c0_i32 : i32, i32
  }
}

module attributes {stable_mosaic.version = 11 : i64} {
  func.func @_scale_shift_kernel(%arg0: i32, %arg1: memref<128x128xf32, #tpu.memory_space<vmem>>, %arg2: memref<1x128xf32, #tpu.memory_space<vmem>>, %arg3: memref<1x128xf32, #tpu.memory_space<vmem>>, %arg4: memref<128x128xf32, #tpu.memory_space<vmem>>) attributes {dimension_semantics = [#tpu.dimension_semantics<parallel>], iteration_bounds = array<i64: 1>, scalar_prefetch = 0 : i64, scratch_operands = 0 : i64, tpu.core_type = #tpu.core_type<tc>, window_params = [{transform_indices = @transform_0, window_bounds = array<i64: 128, 128>}, {pipeline_mode = #tpu.pipeline_mode<synchronous>, transform_indices = @transform_1, window_bounds = array<i64: 1, 128>}, {pipeline_mode = #tpu.pipeline_mode<synchronous>, transform_indices = @transform_2, window_bounds = array<i64: 1, 128>}, {transform_indices = @transform_3, window_bounds = array<i64: 128, 128>}]} {
    %c0 = arith.constant 0 : index
    %c0_0 = arith.constant 0 : index
    %0 = vector.load %arg1[%c0, %c0_0] : memref<128x128xf32, #tpu.memory_space<vmem>>, vector<128x128xf32>
    %c0_1 = arith.constant 0 : index
    %c0_2 = arith.constant 0 : index
    %1 = vector.load %arg2[%c0_1, %c0_2] : memref<1x128xf32, #tpu.memory_space<vmem>>, vector<1x128xf32>
    %2 = vector.broadcast %1 : vector<1x128xf32> to vector<128x128xf32>
    %3 = arith.mulf %0, %2 : vector<128x128xf32>
    %c0_3 = arith.constant 0 : index
    %c0_4 = arith.constant 0 : index
    %4 = vector.load %arg3[%c0_3, %c0_4] : memref<1x128xf32, #tpu.memory_space<vmem>>, vector<1x128xf32>
    %5 = vector.broadcast %4 : vector<1x128xf32> to vector<128x128xf32>
    %6 = arith.addf %3, %5 : vector<128x128xf32>
    %cst = arith.constant 0.000000e+00 : f32
    %7 = vector.broadcast %cst : f32 to vector<128x128xf32>
    %8 = arith.maximumf %6, %7 : vector<128x128xf32>
    %c0_5 = arith.constant 0 : index
    %c0_6 = arith.constant 0 : index
    %9 = vector.load %arg4[%c0_5, %c0_6] : memref<128x128xf32, #tpu.memory_space<vmem>>, vector<128x128xf32>
    tpu.vector_store %arg4[%c0_5, %c0_6], %8 {strides = array<i32>} : memref<128x128xf32, #tpu.memory_space<vmem>>, vector<128x128xf32>,
    return
  }
  func.func @transform_0(%arg0: i32) -> (i32, i32) {
    %c0_i32 = arith.constant 0 : i32
    %c0_i32_0 = arith.constant 0 : i32
    return %arg0, %c0_i32 : i32, i32
  }
  func.func @transform_1(%arg0: i32) -> (i32, i32) {
    %c0_i32 = arith.constant 0 : i32
    %c0_i32_0 = arith.constant 0 : i32
    %c0_i32_1 = arith.constant 0 : i32
    return %c0_i32, %c0_i32_0 : i32, i32
  }
  func.func @transform_2(%arg0: i32) -> (i32, i32) {
    %c0_i32 = arith.constant 0 : i32
    %c0_i32_0 = arith.constant 0 : i32
    %c0_i32_1 = arith.constant 0 : i32
    return %c0_i32, %c0_i32_0 : i32, i32
  }
  func.func @transform_3(%arg0: i32) -> (i32, i32) {
    %c0_i32 = arith.constant 0 : i32
    %c0_i32_0 = arith.constant 0 : i32
    return %arg0, %c0_i32 : i32, i32
  }
}

module attributes {stable_mosaic.version = 11 : i64} {
  func.func @_matmul_kernel(%arg0: i32, %arg1: i32, %arg2: memref<32x256xbf16, #tpu.memory_space<vmem>>, %arg3: memref<256x128xbf16, #tpu.memory_space<vmem>>, %arg4: memref<32x128xf32, #tpu.memory_space<vmem>>, %arg5: memref<8x128xf32, #tpu.memory_space<vmem>>, %arg6: memref<32x128xf32, #tpu.memory_space<vmem>>) attributes {dimension_semantics = [#tpu.dimension_semantics<parallel>, #tpu.dimension_semantics<arbitrary>], iteration_bounds = array<i64: 1, 1>, scalar_prefetch = 0 : i64, scratch_operands = 1 : i64, tpu.core_type = #tpu.core_type<tc>, window_params = [{transform_indices = @transform_0, window_bounds = array<i64: 32, 256>}, {transform_indices = @transform_1, window_bounds = array<i64: 256, 128>}, {transform_indices = @transform_2, window_bounds = array<i64: 32, 128>}, {transform_indices = @transform_3, window_bounds = array<i64: 8, 128>}]} {
    %c0_i32 = arith.constant 0 : i32
    %0 = arith.cmpi eq, %arg1, %c0_i32 : i32
    %1 = arith.extui %0 : i1 to i32
    %c0_i32_0 = arith.constant 0 : i32
    %2 = arith.cmpi ne, %1, %c0_i32_0 : i32
    scf.if %2 {
      %cst_10 = arith.constant 0.000000e+00 : f32
      %12 = vector.broadcast %cst_10 : f32 to vector<32x128xf32>
      %c0_11 = arith.constant 0 : index
      %c0_12 = arith.constant 0 : index
      %13 = vector.load %arg6[%c0_11, %c0_12] : memref<32x128xf32, #tpu.memory_space<vmem>>, vector<32x128xf32>
      tpu.vector_store %arg6[%c0_11, %c0_12], %12 {strides = array<i32>} : memref<32x128xf32, #tpu.memory_space<vmem>>, vector<32x128xf32>,
    } else {
    }
    %c0 = arith.constant 0 : index
    %c0_1 = arith.constant 0 : index
    %3 = vector.load %arg6[%c0, %c0_1] : memref<32x128xf32, #tpu.memory_space<vmem>>, vector<32x128xf32>
    %c0_2 = arith.constant 0 : index
    %c0_3 = arith.constant 0 : index
    %4 = vector.load %arg2[%c0_2, %c0_3] : memref<32x256xbf16, #tpu.memory_space<vmem>>, vector<32x256xbf16>
    %c0_4 = arith.constant 0 : index
    %c0_5 = arith.constant 0 : index
    %5 = vector.load %arg3[%c0_4, %c0_5] : memref<256x128xbf16, #tpu.memory_space<vmem>>, vector<256x128xbf16>
    %cst = arith.constant dense<0.000000e+00> : vector<32x128xf32>
    %6 = tpu.matmul %4, %5, %cst {dimension_numbers = #tpu.dot_dimension_numbers<[1], [0], [0], [1], [0, 0, 1, 1], [], []>} : vector<32x256xbf16>, vector<256x128xbf16>, vector<32x128xf32> -> vector<32x128xf32>
    %7 = arith.addf %3, %6 : vector<32x128xf32>
    %c0_6 = arith.constant 0 : index
    %c0_7 = arith.constant 0 : index
    %8 = vector.load %arg6[%c0_6, %c0_7] : memref<32x128xf32, #tpu.memory_space<vmem>>, vector<32x128xf32>
    tpu.vector_store %arg6[%c0_6, %c0_7], %7 {strides = array<i32>} : memref<32x128xf32, #tpu.memory_space<vmem>>, vector<32x128xf32>,
    %c0_i32_8 = arith.constant 0 : i32
    %9 = arith.cmpi eq, %arg1, %c0_i32_8 : i32
    %10 = arith.extui %9 : i1 to i32
    %c0_i32_9 = arith.constant 0 : i32
    %11 = arith.cmpi ne, %10, %c0_i32_9 : i32
    scf.if %11 {
      %c0_10 = arith.constant 0 : index
      %c0_11 = arith.constant 0 : index
      %12 = vector.load %arg6[%c0_10, %c0_11] : memref<32x128xf32, #tpu.memory_space<vmem>>, vector<32x128xf32>
      %c0_12 = arith.constant 0 : index
      %c0_13 = arith.constant 0 : index
      %13 = vector.load %arg4[%c0_12, %c0_13] : memref<32x128xf32, #tpu.memory_space<vmem>>, vector<32x128xf32>
      tpu.vector_store %arg4[%c0_12, %c0_13], %12 {strides = array<i32>} : memref<32x128xf32, #tpu.memory_space<vmem>>, vector<32x128xf32>,
      %cst_14 = arith.constant dense<0.000000e+00> : vector<128xf32>
      %14 = vector.multi_reduction <add>, %12, %cst_14 [0] : vector<32x128xf32> to vector<128xf32>
      %15 = vector.shape_cast %14 : vector<128xf32> to vector<1x128xf32>
      %16 = arith.mulf %12, %12 : vector<32x128xf32>
      %cst_15 = arith.constant dense<0.000000e+00> : vector<128xf32>
      %17 = vector.multi_reduction <add>, %16, %cst_15 [0] : vector<32x128xf32> to vector<128xf32>
      %18 = vector.shape_cast %17 : vector<128xf32> to vector<1x128xf32>
      %19 = tpu.iota {dimensions = array<i32: 0>} : vector<8x128xi32>
      %20 = vector.shape_cast %15 : vector<1x128xf32> to vector<1x128xf32>
      %21 = vector.broadcast %20 : vector<1x128xf32> to vector<8x128xf32>
      %22 = vector.shape_cast %18 : vector<1x128xf32> to vector<1x128xf32>
      %23 = vector.broadcast %22 : vector<1x128xf32> to vector<8x128xf32>
      %c0_i32_16 = arith.constant 0 : i32
      %24 = vector.broadcast %c0_i32_16 : i32 to vector<8x128xi32>
      %25 = arith.cmpi eq, %19, %24 : vector<8x128xi32>
      %c1_i32 = arith.constant 1 : i32
      %26 = vector.broadcast %c1_i32 : i32 to vector<8x128xi32>
      %27 = arith.cmpi eq, %19, %26 : vector<8x128xi32>
      %cst_17 = arith.constant 0.000000e+00 : f32
      %28 = vector.broadcast %cst_17 : f32 to vector<8x128xf32>
      %29 = arith.select %27, %23, %28 : vector<8x128xi1>, vector<8x128xf32>
      %30 = arith.select %25, %21, %29 : vector<8x128xi1>, vector<8x128xf32>
      %c0_18 = arith.constant 0 : index
      %c0_19 = arith.constant 0 : index
      %31 = vector.load %arg5[%c0_18, %c0_19] : memref<8x128xf32, #tpu.memory_space<vmem>>, vector<8x128xf32>
      tpu.vector_store %arg5[%c0_18, %c0_19], %30 {strides = array<i32>} : memref<8x128xf32, #tpu.memory_space<vmem>>, vector<8x128xf32>,
    } else {
    }
    return
  }
  func.func @transform_0(%arg0: i32, %arg1: i32) -> (i32, i32) {
    %c0_i32 = arith.constant 0 : i32
    return %arg0, %arg1 : i32, i32
  }
  func.func @transform_1(%arg0: i32, %arg1: i32) -> (i32, i32) {
    %c0_i32 = arith.constant 0 : i32
    %c0_i32_0 = arith.constant 0 : i32
    return %arg1, %c0_i32 : i32, i32
  }
  func.func @transform_2(%arg0: i32, %arg1: i32) -> (i32, i32) {
    %c0_i32 = arith.constant 0 : i32
    %c0_i32_0 = arith.constant 0 : i32
    return %arg0, %c0_i32 : i32, i32
  }
  func.func @transform_3(%arg0: i32, %arg1: i32) -> (i32, i32) {
    %c0_i32 = arith.constant 0 : i32
    %c0_i32_0 = arith.constant 0 : i32
    return %arg0, %c0_i32 : i32, i32
  }
}

module attributes {stable_mosaic.version = 11 : i64} {
  func.func @_scale_shift_kernel(%arg0: i32, %arg1: memref<32x128xf32, #tpu.memory_space<vmem>>, %arg2: memref<1x128xf32, #tpu.memory_space<vmem>>, %arg3: memref<1x128xf32, #tpu.memory_space<vmem>>, %arg4: memref<32x128xf32, #tpu.memory_space<vmem>>) attributes {dimension_semantics = [#tpu.dimension_semantics<parallel>], iteration_bounds = array<i64: 1>, scalar_prefetch = 0 : i64, scratch_operands = 0 : i64, tpu.core_type = #tpu.core_type<tc>, window_params = [{transform_indices = @transform_0, window_bounds = array<i64: 32, 128>}, {pipeline_mode = #tpu.pipeline_mode<synchronous>, transform_indices = @transform_1, window_bounds = array<i64: 1, 128>}, {pipeline_mode = #tpu.pipeline_mode<synchronous>, transform_indices = @transform_2, window_bounds = array<i64: 1, 128>}, {transform_indices = @transform_3, window_bounds = array<i64: 32, 128>}]} {
    %c0 = arith.constant 0 : index
    %c0_0 = arith.constant 0 : index
    %0 = vector.load %arg1[%c0, %c0_0] : memref<32x128xf32, #tpu.memory_space<vmem>>, vector<32x128xf32>
    %c0_1 = arith.constant 0 : index
    %c0_2 = arith.constant 0 : index
    %1 = vector.load %arg2[%c0_1, %c0_2] : memref<1x128xf32, #tpu.memory_space<vmem>>, vector<1x128xf32>
    %2 = vector.broadcast %1 : vector<1x128xf32> to vector<32x128xf32>
    %3 = arith.mulf %0, %2 : vector<32x128xf32>
    %c0_3 = arith.constant 0 : index
    %c0_4 = arith.constant 0 : index
    %4 = vector.load %arg3[%c0_3, %c0_4] : memref<1x128xf32, #tpu.memory_space<vmem>>, vector<1x128xf32>
    %5 = vector.broadcast %4 : vector<1x128xf32> to vector<32x128xf32>
    %6 = arith.addf %3, %5 : vector<32x128xf32>
    %cst = arith.constant 0.000000e+00 : f32
    %7 = vector.broadcast %cst : f32 to vector<32x128xf32>
    %8 = arith.maximumf %6, %7 : vector<32x128xf32>
    %c0_5 = arith.constant 0 : index
    %c0_6 = arith.constant 0 : index
    %9 = vector.load %arg4[%c0_5, %c0_6] : memref<32x128xf32, #tpu.memory_space<vmem>>, vector<32x128xf32>
    tpu.vector_store %arg4[%c0_5, %c0_6], %8 {strides = array<i32>} : memref<32x128xf32, #tpu.memory_space<vmem>>, vector<32x128xf32>,
    return
  }
  func.func @transform_0(%arg0: i32) -> (i32, i32) {
    %c0_i32 = arith.constant 0 : i32
    %c0_i32_0 = arith.constant 0 : i32
    return %arg0, %c0_i32 : i32, i32
  }
  func.func @transform_1(%arg0: i32) -> (i32, i32) {
    %c0_i32 = arith.constant 0 : i32
    %c0_i32_0 = arith.constant 0 : i32
    %c0_i32_1 = arith.constant 0 : i32
    return %c0_i32, %c0_i32_0 : i32, i32
  }
  func.func @transform_2(%arg0: i32) -> (i32, i32) {
    %c0_i32 = arith.constant 0 : i32
    %c0_i32_0 = arith.constant 0 : i32
    %c0_i32_1 = arith.constant 0 : i32
    return %c0_i32, %c0_i32_0 : i32, i32
  }
  func.func @transform_3(%arg0: i32) -> (i32, i32) {
    %c0_i32 = arith.constant 0 : i32
    %c0_i32_0 = arith.constant 0 : i32
    return %arg0, %c0_i32 : i32, i32
  }
}

module attributes {stable_mosaic.version = 11 : i64} {
  func.func @_scale_shift_kernel(%arg0: i32, %arg1: memref<32x128xf32, #tpu.memory_space<vmem>>, %arg2: memref<1x128xf32, #tpu.memory_space<vmem>>, %arg3: memref<1x128xf32, #tpu.memory_space<vmem>>, %arg4: memref<32x128xf32, #tpu.memory_space<vmem>>, %arg5: memref<32x128xf32, #tpu.memory_space<vmem>>) attributes {dimension_semantics = [#tpu.dimension_semantics<parallel>], iteration_bounds = array<i64: 1>, scalar_prefetch = 0 : i64, scratch_operands = 0 : i64, tpu.core_type = #tpu.core_type<tc>, window_params = [{transform_indices = @transform_0, window_bounds = array<i64: 32, 128>}, {pipeline_mode = #tpu.pipeline_mode<synchronous>, transform_indices = @transform_1, window_bounds = array<i64: 1, 128>}, {pipeline_mode = #tpu.pipeline_mode<synchronous>, transform_indices = @transform_2, window_bounds = array<i64: 1, 128>}, {transform_indices = @transform_3, window_bounds = array<i64: 32, 128>}, {transform_indices = @transform_4, window_bounds = array<i64: 32, 128>}]} {
    %c0 = arith.constant 0 : index
    %c0_0 = arith.constant 0 : index
    %0 = vector.load %arg1[%c0, %c0_0] : memref<32x128xf32, #tpu.memory_space<vmem>>, vector<32x128xf32>
    %c0_1 = arith.constant 0 : index
    %c0_2 = arith.constant 0 : index
    %1 = vector.load %arg2[%c0_1, %c0_2] : memref<1x128xf32, #tpu.memory_space<vmem>>, vector<1x128xf32>
    %2 = vector.broadcast %1 : vector<1x128xf32> to vector<32x128xf32>
    %3 = arith.mulf %0, %2 : vector<32x128xf32>
    %c0_3 = arith.constant 0 : index
    %c0_4 = arith.constant 0 : index
    %4 = vector.load %arg3[%c0_3, %c0_4] : memref<1x128xf32, #tpu.memory_space<vmem>>, vector<1x128xf32>
    %5 = vector.broadcast %4 : vector<1x128xf32> to vector<32x128xf32>
    %6 = arith.addf %3, %5 : vector<32x128xf32>
    %c0_5 = arith.constant 0 : index
    %c0_6 = arith.constant 0 : index
    %7 = vector.load %arg4[%c0_5, %c0_6] : memref<32x128xf32, #tpu.memory_space<vmem>>, vector<32x128xf32>
    %8 = arith.addf %6, %7 : vector<32x128xf32>
    %c0_7 = arith.constant 0 : index
    %c0_8 = arith.constant 0 : index
    %9 = vector.load %arg5[%c0_7, %c0_8] : memref<32x128xf32, #tpu.memory_space<vmem>>, vector<32x128xf32>
    tpu.vector_store %arg5[%c0_7, %c0_8], %8 {strides = array<i32>} : memref<32x128xf32, #tpu.memory_space<vmem>>, vector<32x128xf32>,
    return
  }
  func.func @transform_0(%arg0: i32) -> (i32, i32) {
    %c0_i32 = arith.constant 0 : i32
    %c0_i32_0 = arith.constant 0 : i32
    return %arg0, %c0_i32 : i32, i32
  }
  func.func @transform_1(%arg0: i32) -> (i32, i32) {
    %c0_i32 = arith.constant 0 : i32
    %c0_i32_0 = arith.constant 0 : i32
    %c0_i32_1 = arith.constant 0 : i32
    return %c0_i32, %c0_i32_0 : i32, i32
  }
  func.func @transform_2(%arg0: i32) -> (i32, i32) {
    %c0_i32 = arith.constant 0 : i32
    %c0_i32_0 = arith.constant 0 : i32
    %c0_i32_1 = arith.constant 0 : i32
    return %c0_i32, %c0_i32_0 : i32, i32
  }
  func.func @transform_3(%arg0: i32) -> (i32, i32) {
    %c0_i32 = arith.constant 0 : i32
    %c0_i32_0 = arith.constant 0 : i32
    return %arg0, %c0_i32 : i32, i32
  }
  func.func @transform_4(%arg0: i32) -> (i32, i32) {
    %c0_i32 = arith.constant 0 : i32
    %c0_i32_0 = arith.constant 0 : i32
    return %arg0, %c0_i32 : i32, i32
  }
}

module attributes {stable_mosaic.version = 11 : i64} {
  func.func @_matmul_kernel(%arg0: i32, %arg1: i32, %arg2: memref<32x384xbf16, #tpu.memory_space<vmem>>, %arg3: memref<384x128xbf16, #tpu.memory_space<vmem>>, %arg4: memref<32x128xf32, #tpu.memory_space<vmem>>, %arg5: memref<8x128xf32, #tpu.memory_space<vmem>>, %arg6: memref<32x128xf32, #tpu.memory_space<vmem>>) attributes {dimension_semantics = [#tpu.dimension_semantics<parallel>, #tpu.dimension_semantics<arbitrary>], iteration_bounds = array<i64: 1, 1>, scalar_prefetch = 0 : i64, scratch_operands = 1 : i64, tpu.core_type = #tpu.core_type<tc>, window_params = [{transform_indices = @transform_0, window_bounds = array<i64: 32, 384>}, {transform_indices = @transform_1, window_bounds = array<i64: 384, 128>}, {transform_indices = @transform_2, window_bounds = array<i64: 32, 128>}, {transform_indices = @transform_3, window_bounds = array<i64: 8, 128>}]} {
    %c0_i32 = arith.constant 0 : i32
    %0 = arith.cmpi eq, %arg1, %c0_i32 : i32
    %1 = arith.extui %0 : i1 to i32
    %c0_i32_0 = arith.constant 0 : i32
    %2 = arith.cmpi ne, %1, %c0_i32_0 : i32
    scf.if %2 {
      %cst_10 = arith.constant 0.000000e+00 : f32
      %12 = vector.broadcast %cst_10 : f32 to vector<32x128xf32>
      %c0_11 = arith.constant 0 : index
      %c0_12 = arith.constant 0 : index
      %13 = vector.load %arg6[%c0_11, %c0_12] : memref<32x128xf32, #tpu.memory_space<vmem>>, vector<32x128xf32>
      tpu.vector_store %arg6[%c0_11, %c0_12], %12 {strides = array<i32>} : memref<32x128xf32, #tpu.memory_space<vmem>>, vector<32x128xf32>,
    } else {
    }
    %c0 = arith.constant 0 : index
    %c0_1 = arith.constant 0 : index
    %3 = vector.load %arg6[%c0, %c0_1] : memref<32x128xf32, #tpu.memory_space<vmem>>, vector<32x128xf32>
    %c0_2 = arith.constant 0 : index
    %c0_3 = arith.constant 0 : index
    %4 = vector.load %arg2[%c0_2, %c0_3] : memref<32x384xbf16, #tpu.memory_space<vmem>>, vector<32x384xbf16>
    %c0_4 = arith.constant 0 : index
    %c0_5 = arith.constant 0 : index
    %5 = vector.load %arg3[%c0_4, %c0_5] : memref<384x128xbf16, #tpu.memory_space<vmem>>, vector<384x128xbf16>
    %cst = arith.constant dense<0.000000e+00> : vector<32x128xf32>
    %6 = tpu.matmul %4, %5, %cst {dimension_numbers = #tpu.dot_dimension_numbers<[1], [0], [0], [1], [0, 0, 1, 1], [], []>} : vector<32x384xbf16>, vector<384x128xbf16>, vector<32x128xf32> -> vector<32x128xf32>
    %7 = arith.addf %3, %6 : vector<32x128xf32>
    %c0_6 = arith.constant 0 : index
    %c0_7 = arith.constant 0 : index
    %8 = vector.load %arg6[%c0_6, %c0_7] : memref<32x128xf32, #tpu.memory_space<vmem>>, vector<32x128xf32>
    tpu.vector_store %arg6[%c0_6, %c0_7], %7 {strides = array<i32>} : memref<32x128xf32, #tpu.memory_space<vmem>>, vector<32x128xf32>,
    %c0_i32_8 = arith.constant 0 : i32
    %9 = arith.cmpi eq, %arg1, %c0_i32_8 : i32
    %10 = arith.extui %9 : i1 to i32
    %c0_i32_9 = arith.constant 0 : i32
    %11 = arith.cmpi ne, %10, %c0_i32_9 : i32
    scf.if %11 {
      %c0_10 = arith.constant 0 : index
      %c0_11 = arith.constant 0 : index
      %12 = vector.load %arg6[%c0_10, %c0_11] : memref<32x128xf32, #tpu.memory_space<vmem>>, vector<32x128xf32>
      %c0_12 = arith.constant 0 : index
      %c0_13 = arith.constant 0 : index
      %13 = vector.load %arg4[%c0_12, %c0_13] : memref<32x128xf32, #tpu.memory_space<vmem>>, vector<32x128xf32>
      tpu.vector_store %arg4[%c0_12, %c0_13], %12 {strides = array<i32>} : memref<32x128xf32, #tpu.memory_space<vmem>>, vector<32x128xf32>,
      %cst_14 = arith.constant dense<0.000000e+00> : vector<128xf32>
      %14 = vector.multi_reduction <add>, %12, %cst_14 [0] : vector<32x128xf32> to vector<128xf32>
      %15 = vector.shape_cast %14 : vector<128xf32> to vector<1x128xf32>
      %16 = arith.mulf %12, %12 : vector<32x128xf32>
      %cst_15 = arith.constant dense<0.000000e+00> : vector<128xf32>
      %17 = vector.multi_reduction <add>, %16, %cst_15 [0] : vector<32x128xf32> to vector<128xf32>
      %18 = vector.shape_cast %17 : vector<128xf32> to vector<1x128xf32>
      %19 = tpu.iota {dimensions = array<i32: 0>} : vector<8x128xi32>
      %20 = vector.shape_cast %15 : vector<1x128xf32> to vector<1x128xf32>
      %21 = vector.broadcast %20 : vector<1x128xf32> to vector<8x128xf32>
      %22 = vector.shape_cast %18 : vector<1x128xf32> to vector<1x128xf32>
      %23 = vector.broadcast %22 : vector<1x128xf32> to vector<8x128xf32>
      %c0_i32_16 = arith.constant 0 : i32
      %24 = vector.broadcast %c0_i32_16 : i32 to vector<8x128xi32>
      %25 = arith.cmpi eq, %19, %24 : vector<8x128xi32>
      %c1_i32 = arith.constant 1 : i32
      %26 = vector.broadcast %c1_i32 : i32 to vector<8x128xi32>
      %27 = arith.cmpi eq, %19, %26 : vector<8x128xi32>
      %cst_17 = arith.constant 0.000000e+00 : f32
      %28 = vector.broadcast %cst_17 : f32 to vector<8x128xf32>
      %29 = arith.select %27, %23, %28 : vector<8x128xi1>, vector<8x128xf32>
      %30 = arith.select %25, %21, %29 : vector<8x128xi1>, vector<8x128xf32>
      %c0_18 = arith.constant 0 : index
      %c0_19 = arith.constant 0 : index
      %31 = vector.load %arg5[%c0_18, %c0_19] : memref<8x128xf32, #tpu.memory_space<vmem>>, vector<8x128xf32>
      tpu.vector_store %arg5[%c0_18, %c0_19], %30 {strides = array<i32>} : memref<8x128xf32, #tpu.memory_space<vmem>>, vector<8x128xf32>,
    } else {
    }
    return
  }
  func.func @transform_0(%arg0: i32, %arg1: i32) -> (i32, i32) {
    %c0_i32 = arith.constant 0 : i32
    return %arg0, %arg1 : i32, i32
  }
  func.func @transform_1(%arg0: i32, %arg1: i32) -> (i32, i32) {
    %c0_i32 = arith.constant 0 : i32
    %c0_i32_0 = arith.constant 0 : i32
    return %arg1, %c0_i32 : i32, i32
  }
  func.func @transform_2(%arg0: i32, %arg1: i32) -> (i32, i32) {
    %c0_i32 = arith.constant 0 : i32
    %c0_i32_0 = arith.constant 0 : i32
    return %arg0, %c0_i32 : i32, i32
  }
  func.func @transform_3(%arg0: i32, %arg1: i32) -> (i32, i32) {
    %c0_i32 = arith.constant 0 : i32
    %c0_i32_0 = arith.constant 0 : i32
    return %arg0, %c0_i32 : i32, i32
  }
}

module attributes {stable_mosaic.version = 11 : i64} {
  func.func @_matmul_kernel(%arg0: i32, %arg1: i32, %arg2: memref<32x128xbf16, #tpu.memory_space<vmem>>, %arg3: memref<128x128xbf16, #tpu.memory_space<vmem>>, %arg4: memref<1x128xf32, #tpu.memory_space<vmem>>, %arg5: memref<32x128xf32, #tpu.memory_space<vmem>>, %arg6: memref<32x128xf32, #tpu.memory_space<vmem>>) attributes {dimension_semantics = [#tpu.dimension_semantics<parallel>, #tpu.dimension_semantics<arbitrary>], iteration_bounds = array<i64: 1, 1>, scalar_prefetch = 0 : i64, scratch_operands = 1 : i64, tpu.core_type = #tpu.core_type<tc>, window_params = [{transform_indices = @transform_0, window_bounds = array<i64: 32, 128>}, {transform_indices = @transform_1, window_bounds = array<i64: 128, 128>}, {pipeline_mode = #tpu.pipeline_mode<synchronous>, transform_indices = @transform_2, window_bounds = array<i64: 1, 128>}, {transform_indices = @transform_3, window_bounds = array<i64: 32, 128>}]} {
    %c0_i32 = arith.constant 0 : i32
    %0 = arith.cmpi eq, %arg1, %c0_i32 : i32
    %1 = arith.extui %0 : i1 to i32
    %c0_i32_0 = arith.constant 0 : i32
    %2 = arith.cmpi ne, %1, %c0_i32_0 : i32
    scf.if %2 {
      %cst_10 = arith.constant 0.000000e+00 : f32
      %12 = vector.broadcast %cst_10 : f32 to vector<32x128xf32>
      %c0_11 = arith.constant 0 : index
      %c0_12 = arith.constant 0 : index
      %13 = vector.load %arg6[%c0_11, %c0_12] : memref<32x128xf32, #tpu.memory_space<vmem>>, vector<32x128xf32>
      tpu.vector_store %arg6[%c0_11, %c0_12], %12 {strides = array<i32>} : memref<32x128xf32, #tpu.memory_space<vmem>>, vector<32x128xf32>,
    } else {
    }
    %c0 = arith.constant 0 : index
    %c0_1 = arith.constant 0 : index
    %3 = vector.load %arg6[%c0, %c0_1] : memref<32x128xf32, #tpu.memory_space<vmem>>, vector<32x128xf32>
    %c0_2 = arith.constant 0 : index
    %c0_3 = arith.constant 0 : index
    %4 = vector.load %arg2[%c0_2, %c0_3] : memref<32x128xbf16, #tpu.memory_space<vmem>>, vector<32x128xbf16>
    %c0_4 = arith.constant 0 : index
    %c0_5 = arith.constant 0 : index
    %5 = vector.load %arg3[%c0_4, %c0_5] : memref<128x128xbf16, #tpu.memory_space<vmem>>, vector<128x128xbf16>
    %cst = arith.constant dense<0.000000e+00> : vector<32x128xf32>
    %6 = tpu.matmul %4, %5, %cst {dimension_numbers = #tpu.dot_dimension_numbers<[1], [0], [0], [1], [0, 0, 1, 1], [], []>} : vector<32x128xbf16>, vector<128x128xbf16>, vector<32x128xf32> -> vector<32x128xf32>
    %7 = arith.addf %3, %6 : vector<32x128xf32>
    %c0_6 = arith.constant 0 : index
    %c0_7 = arith.constant 0 : index
    %8 = vector.load %arg6[%c0_6, %c0_7] : memref<32x128xf32, #tpu.memory_space<vmem>>, vector<32x128xf32>
    tpu.vector_store %arg6[%c0_6, %c0_7], %7 {strides = array<i32>} : memref<32x128xf32, #tpu.memory_space<vmem>>, vector<32x128xf32>,
    %c0_i32_8 = arith.constant 0 : i32
    %9 = arith.cmpi eq, %arg1, %c0_i32_8 : i32
    %10 = arith.extui %9 : i1 to i32
    %c0_i32_9 = arith.constant 0 : i32
    %11 = arith.cmpi ne, %10, %c0_i32_9 : i32
    scf.if %11 {
      %c0_10 = arith.constant 0 : index
      %c0_11 = arith.constant 0 : index
      %12 = vector.load %arg6[%c0_10, %c0_11] : memref<32x128xf32, #tpu.memory_space<vmem>>, vector<32x128xf32>
      %c0_12 = arith.constant 0 : index
      %c0_13 = arith.constant 0 : index
      %13 = vector.load %arg4[%c0_12, %c0_13] : memref<1x128xf32, #tpu.memory_space<vmem>>, vector<1x128xf32>
      %14 = vector.broadcast %13 : vector<1x128xf32> to vector<32x128xf32>
      %15 = arith.addf %12, %14 : vector<32x128xf32>
      %c0_14 = arith.constant 0 : index
      %c0_15 = arith.constant 0 : index
      %16 = vector.load %arg5[%c0_14, %c0_15] : memref<32x128xf32, #tpu.memory_space<vmem>>, vector<32x128xf32>
      tpu.vector_store %arg5[%c0_14, %c0_15], %15 {strides = array<i32>} : memref<32x128xf32, #tpu.memory_space<vmem>>, vector<32x128xf32>,
    } else {
    }
    return
  }
  func.func @transform_0(%arg0: i32, %arg1: i32) -> (i32, i32) {
    %c0_i32 = arith.constant 0 : i32
    return %arg0, %arg1 : i32, i32
  }
  func.func @transform_1(%arg0: i32, %arg1: i32) -> (i32, i32) {
    %c0_i32 = arith.constant 0 : i32
    %c0_i32_0 = arith.constant 0 : i32
    return %arg1, %c0_i32 : i32, i32
  }
  func.func @transform_2(%arg0: i32, %arg1: i32) -> (i32, i32) {
    %c0_i32 = arith.constant 0 : i32
    %c0_i32_0 = arith.constant 0 : i32
    %c0_i32_1 = arith.constant 0 : i32
    return %c0_i32, %c0_i32_0 : i32, i32
  }
  func.func @transform_3(%arg0: i32, %arg1: i32) -> (i32, i32) {
    %c0_i32 = arith.constant 0 : i32
    %c0_i32_0 = arith.constant 0 : i32
    return %arg0, %c0_i32 : i32, i32
  }
}

module attributes {stable_mosaic.version = 11 : i64} {
  func.func @_matmul_kernel(%arg0: i32, %arg1: i32, %arg2: memref<32x128xbf16, #tpu.memory_space<vmem>>, %arg3: memref<128x128xbf16, #tpu.memory_space<vmem>>, %arg4: memref<32x128xf32, #tpu.memory_space<vmem>>, %arg5: memref<8x128xf32, #tpu.memory_space<vmem>>, %arg6: memref<32x128xf32, #tpu.memory_space<vmem>>) attributes {dimension_semantics = [#tpu.dimension_semantics<parallel>, #tpu.dimension_semantics<arbitrary>], iteration_bounds = array<i64: 1, 1>, scalar_prefetch = 0 : i64, scratch_operands = 1 : i64, tpu.core_type = #tpu.core_type<tc>, window_params = [{transform_indices = @transform_0, window_bounds = array<i64: 32, 128>}, {transform_indices = @transform_1, window_bounds = array<i64: 128, 128>}, {transform_indices = @transform_2, window_bounds = array<i64: 32, 128>}, {transform_indices = @transform_3, window_bounds = array<i64: 8, 128>}]} {
    %c0_i32 = arith.constant 0 : i32
    %0 = arith.cmpi eq, %arg1, %c0_i32 : i32
    %1 = arith.extui %0 : i1 to i32
    %c0_i32_0 = arith.constant 0 : i32
    %2 = arith.cmpi ne, %1, %c0_i32_0 : i32
    scf.if %2 {
      %cst_10 = arith.constant 0.000000e+00 : f32
      %12 = vector.broadcast %cst_10 : f32 to vector<32x128xf32>
      %c0_11 = arith.constant 0 : index
      %c0_12 = arith.constant 0 : index
      %13 = vector.load %arg6[%c0_11, %c0_12] : memref<32x128xf32, #tpu.memory_space<vmem>>, vector<32x128xf32>
      tpu.vector_store %arg6[%c0_11, %c0_12], %12 {strides = array<i32>} : memref<32x128xf32, #tpu.memory_space<vmem>>, vector<32x128xf32>,
    } else {
    }
    %c0 = arith.constant 0 : index
    %c0_1 = arith.constant 0 : index
    %3 = vector.load %arg6[%c0, %c0_1] : memref<32x128xf32, #tpu.memory_space<vmem>>, vector<32x128xf32>
    %c0_2 = arith.constant 0 : index
    %c0_3 = arith.constant 0 : index
    %4 = vector.load %arg2[%c0_2, %c0_3] : memref<32x128xbf16, #tpu.memory_space<vmem>>, vector<32x128xbf16>
    %c0_4 = arith.constant 0 : index
    %c0_5 = arith.constant 0 : index
    %5 = vector.load %arg3[%c0_4, %c0_5] : memref<128x128xbf16, #tpu.memory_space<vmem>>, vector<128x128xbf16>
    %cst = arith.constant dense<0.000000e+00> : vector<32x128xf32>
    %6 = tpu.matmul %4, %5, %cst {dimension_numbers = #tpu.dot_dimension_numbers<[1], [0], [0], [1], [0, 0, 1, 1], [], []>} : vector<32x128xbf16>, vector<128x128xbf16>, vector<32x128xf32> -> vector<32x128xf32>
    %7 = arith.addf %3, %6 : vector<32x128xf32>
    %c0_6 = arith.constant 0 : index
    %c0_7 = arith.constant 0 : index
    %8 = vector.load %arg6[%c0_6, %c0_7] : memref<32x128xf32, #tpu.memory_space<vmem>>, vector<32x128xf32>
    tpu.vector_store %arg6[%c0_6, %c0_7], %7 {strides = array<i32>} : memref<32x128xf32, #tpu.memory_space<vmem>>, vector<32x128xf32>,
    %c0_i32_8 = arith.constant 0 : i32
    %9 = arith.cmpi eq, %arg1, %c0_i32_8 : i32
    %10 = arith.extui %9 : i1 to i32
    %c0_i32_9 = arith.constant 0 : i32
    %11 = arith.cmpi ne, %10, %c0_i32_9 : i32
    scf.if %11 {
      %c0_10 = arith.constant 0 : index
      %c0_11 = arith.constant 0 : index
      %12 = vector.load %arg6[%c0_10, %c0_11] : memref<32x128xf32, #tpu.memory_space<vmem>>, vector<32x128xf32>
      %c0_12 = arith.constant 0 : index
      %c0_13 = arith.constant 0 : index
      %13 = vector.load %arg4[%c0_12, %c0_13] : memref<32x128xf32, #tpu.memory_space<vmem>>, vector<32x128xf32>
      tpu.vector_store %arg4[%c0_12, %c0_13], %12 {strides = array<i32>} : memref<32x128xf32, #tpu.memory_space<vmem>>, vector<32x128xf32>,
      %cst_14 = arith.constant dense<0.000000e+00> : vector<128xf32>
      %14 = vector.multi_reduction <add>, %12, %cst_14 [0] : vector<32x128xf32> to vector<128xf32>
      %15 = vector.shape_cast %14 : vector<128xf32> to vector<1x128xf32>
      %16 = arith.mulf %12, %12 : vector<32x128xf32>
      %cst_15 = arith.constant dense<0.000000e+00> : vector<128xf32>
      %17 = vector.multi_reduction <add>, %16, %cst_15 [0] : vector<32x128xf32> to vector<128xf32>
      %18 = vector.shape_cast %17 : vector<128xf32> to vector<1x128xf32>
      %19 = tpu.iota {dimensions = array<i32: 0>} : vector<8x128xi32>
      %20 = vector.shape_cast %15 : vector<1x128xf32> to vector<1x128xf32>
      %21 = vector.broadcast %20 : vector<1x128xf32> to vector<8x128xf32>
      %22 = vector.shape_cast %18 : vector<1x128xf32> to vector<1x128xf32>
      %23 = vector.broadcast %22 : vector<1x128xf32> to vector<8x128xf32>
      %c0_i32_16 = arith.constant 0 : i32
      %24 = vector.broadcast %c0_i32_16 : i32 to vector<8x128xi32>
      %25 = arith.cmpi eq, %19, %24 : vector<8x128xi32>
      %c1_i32 = arith.constant 1 : i32
      %26 = vector.broadcast %c1_i32 : i32 to vector<8x128xi32>
      %27 = arith.cmpi eq, %19, %26 : vector<8x128xi32>
      %cst_17 = arith.constant 0.000000e+00 : f32
      %28 = vector.broadcast %cst_17 : f32 to vector<8x128xf32>
      %29 = arith.select %27, %23, %28 : vector<8x128xi1>, vector<8x128xf32>
      %30 = arith.select %25, %21, %29 : vector<8x128xi1>, vector<8x128xf32>
      %c0_18 = arith.constant 0 : index
      %c0_19 = arith.constant 0 : index
      %31 = vector.load %arg5[%c0_18, %c0_19] : memref<8x128xf32, #tpu.memory_space<vmem>>, vector<8x128xf32>
      tpu.vector_store %arg5[%c0_18, %c0_19], %30 {strides = array<i32>} : memref<8x128xf32, #tpu.memory_space<vmem>>, vector<8x128xf32>,
    } else {
    }
    return
  }
  func.func @transform_0(%arg0: i32, %arg1: i32) -> (i32, i32) {
    %c0_i32 = arith.constant 0 : i32
    return %arg0, %arg1 : i32, i32
  }
  func.func @transform_1(%arg0: i32, %arg1: i32) -> (i32, i32) {
    %c0_i32 = arith.constant 0 : i32
    %c0_i32_0 = arith.constant 0 : i32
    return %arg1, %c0_i32 : i32, i32
  }
  func.func @transform_2(%arg0: i32, %arg1: i32) -> (i32, i32) {
    %c0_i32 = arith.constant 0 : i32
    %c0_i32_0 = arith.constant 0 : i32
    return %arg0, %c0_i32 : i32, i32
  }
  func.func @transform_3(%arg0: i32, %arg1: i32) -> (i32, i32) {
    %c0_i32 = arith.constant 0 : i32
    %c0_i32_0 = arith.constant 0 : i32
    return %arg0, %c0_i32 : i32, i32
  }
}

module attributes {stable_mosaic.version = 11 : i64} {
  func.func @_matmul_kernel(%arg0: i32, %arg1: i32, %arg2: memref<256x512xbf16, #tpu.memory_space<vmem>>, %arg3: memref<512x128xbf16, #tpu.memory_space<vmem>>, %arg4: memref<1x128xf32, #tpu.memory_space<vmem>>, %arg5: memref<256x128xf32, #tpu.memory_space<vmem>>, %arg6: memref<256x128xf32, #tpu.memory_space<vmem>>) attributes {dimension_semantics = [#tpu.dimension_semantics<parallel>, #tpu.dimension_semantics<arbitrary>], iteration_bounds = array<i64: 2, 1>, scalar_prefetch = 0 : i64, scratch_operands = 1 : i64, tpu.core_type = #tpu.core_type<tc>, window_params = [{transform_indices = @transform_0, window_bounds = array<i64: 256, 512>}, {transform_indices = @transform_1, window_bounds = array<i64: 512, 128>}, {pipeline_mode = #tpu.pipeline_mode<synchronous>, transform_indices = @transform_2, window_bounds = array<i64: 1, 128>}, {transform_indices = @transform_3, window_bounds = array<i64: 256, 128>}]} {
    %c0_i32 = arith.constant 0 : i32
    %0 = arith.cmpi eq, %arg1, %c0_i32 : i32
    %1 = arith.extui %0 : i1 to i32
    %c0_i32_0 = arith.constant 0 : i32
    %2 = arith.cmpi ne, %1, %c0_i32_0 : i32
    scf.if %2 {
      %cst_10 = arith.constant 0.000000e+00 : f32
      %12 = vector.broadcast %cst_10 : f32 to vector<256x128xf32>
      %c0_11 = arith.constant 0 : index
      %c0_12 = arith.constant 0 : index
      %13 = vector.load %arg6[%c0_11, %c0_12] : memref<256x128xf32, #tpu.memory_space<vmem>>, vector<256x128xf32>
      tpu.vector_store %arg6[%c0_11, %c0_12], %12 {strides = array<i32>} : memref<256x128xf32, #tpu.memory_space<vmem>>, vector<256x128xf32>,
    } else {
    }
    %c0 = arith.constant 0 : index
    %c0_1 = arith.constant 0 : index
    %3 = vector.load %arg6[%c0, %c0_1] : memref<256x128xf32, #tpu.memory_space<vmem>>, vector<256x128xf32>
    %c0_2 = arith.constant 0 : index
    %c0_3 = arith.constant 0 : index
    %4 = vector.load %arg2[%c0_2, %c0_3] : memref<256x512xbf16, #tpu.memory_space<vmem>>, vector<256x512xbf16>
    %c0_4 = arith.constant 0 : index
    %c0_5 = arith.constant 0 : index
    %5 = vector.load %arg3[%c0_4, %c0_5] : memref<512x128xbf16, #tpu.memory_space<vmem>>, vector<512x128xbf16>
    %cst = arith.constant dense<0.000000e+00> : vector<256x128xf32>
    %6 = tpu.matmul %4, %5, %cst {dimension_numbers = #tpu.dot_dimension_numbers<[1], [0], [0], [1], [0, 0, 1, 1], [], []>} : vector<256x512xbf16>, vector<512x128xbf16>, vector<256x128xf32> -> vector<256x128xf32>
    %7 = arith.addf %3, %6 : vector<256x128xf32>
    %c0_6 = arith.constant 0 : index
    %c0_7 = arith.constant 0 : index
    %8 = vector.load %arg6[%c0_6, %c0_7] : memref<256x128xf32, #tpu.memory_space<vmem>>, vector<256x128xf32>
    tpu.vector_store %arg6[%c0_6, %c0_7], %7 {strides = array<i32>} : memref<256x128xf32, #tpu.memory_space<vmem>>, vector<256x128xf32>,
    %c0_i32_8 = arith.constant 0 : i32
    %9 = arith.cmpi eq, %arg1, %c0_i32_8 : i32
    %10 = arith.extui %9 : i1 to i32
    %c0_i32_9 = arith.constant 0 : i32
    %11 = arith.cmpi ne, %10, %c0_i32_9 : i32
    scf.if %11 {
      %c0_10 = arith.constant 0 : index
      %c0_11 = arith.constant 0 : index
      %12 = vector.load %arg6[%c0_10, %c0_11] : memref<256x128xf32, #tpu.memory_space<vmem>>, vector<256x128xf32>
      %c0_12 = arith.constant 0 : index
      %c0_13 = arith.constant 0 : index
      %13 = vector.load %arg4[%c0_12, %c0_13] : memref<1x128xf32, #tpu.memory_space<vmem>>, vector<1x128xf32>
      %14 = vector.broadcast %13 : vector<1x128xf32> to vector<256x128xf32>
      %15 = arith.addf %12, %14 : vector<256x128xf32>
      %16 = math.tanh %15 : vector<256x128xf32>
      %c0_14 = arith.constant 0 : index
      %c0_15 = arith.constant 0 : index
      %17 = vector.load %arg5[%c0_14, %c0_15] : memref<256x128xf32, #tpu.memory_space<vmem>>, vector<256x128xf32>
      tpu.vector_store %arg5[%c0_14, %c0_15], %16 {strides = array<i32>} : memref<256x128xf32, #tpu.memory_space<vmem>>, vector<256x128xf32>,
    } else {
    }
    return
  }
  func.func @transform_0(%arg0: i32, %arg1: i32) -> (i32, i32) {
    %c0_i32 = arith.constant 0 : i32
    return %arg0, %arg1 : i32, i32
  }
  func.func @transform_1(%arg0: i32, %arg1: i32) -> (i32, i32) {
    %c0_i32 = arith.constant 0 : i32
    %c0_i32_0 = arith.constant 0 : i32
    return %arg1, %c0_i32 : i32, i32
  }
  func.func @transform_2(%arg0: i32, %arg1: i32) -> (i32, i32) {
    %c0_i32 = arith.constant 0 : i32
    %c0_i32_0 = arith.constant 0 : i32
    %c0_i32_1 = arith.constant 0 : i32
    return %c0_i32, %c0_i32_0 : i32, i32
  }
  func.func @transform_3(%arg0: i32, %arg1: i32) -> (i32, i32) {
    %c0_i32 = arith.constant 0 : i32
    %c0_i32_0 = arith.constant 0 : i32
    return %arg0, %c0_i32 : i32, i32
  }
}

</mosaic_0001>

<bundles_post_ra>
// kernel: global_generator_forward.38
= control target key start
LH: loop header
LB: loop body
LE: loop exit
PB: predicated region body
PF: predicated region fallthrough
CT: control target
= control target key end

     0   :  { %s453_s12 = smov 0   ;;  %s612_s0 = inlined_call_operand.vmem [shape: f32[512,128], index: 0, kind: input, shape index: {}]   ;;  %s613_s1 = inlined_call_operand.vmem [shape: f32[1,128], index: 1, kind: input, shape index: {}]   ;;  %s614_s2 = inlined_call_operand.vmem [shape: f32[1,128], index: 2, kind: input, shape index: {}]   ;;  %s615_s3 = inlined_call_operand.vmem [shape: f32[512,128], index: 3, kind: output, shape index: {}]  }
   0x1 LB: > { %s404_s13 = sadd.s32 4294967295, %s431_s12   ;;  %p408_p0 = scmp.ge.s32.totalorder %s431_s12, 1  ;;  %s431_s12 = sphi %s453_s12, %s13_s12  }
   0x2   : > { %p138_p1 = scmp.lt.s32.totalorder %s431_s12, 3 }
   0x4   : > { %p139_p2 = pnand %p408_p0, %p138_p1 }
   0x5   : > { %s409_s14 = sshll.u32 (!%p139_p2), %s404_s13, 5  ;;  %v464_v0 = vld [vmem:[%s613_s1] ss:$0 sm:$0xff] (!%p139_p2) }
   0x6   : > { %142 = sbr.rel (%p139_p2) target bundleno = 46 (0x2e), region = 32  ;;  %p163_p3 = scmp.lt.s32.totalorder (!%p139_p2), %s409_s14, 63  ;;  %v474_v1 = vld [vmem:[%s614_s2] ss:$0 sm:$0xff] (!%p139_p2) }
   0xd   : > { %s617_s14 = smov (!%p163_p3, %s409_s14), 63 }
   0xe   : > { %s410_s15 = sshll.u32 %s617_s14, 3 }
   0xf   : > { %s469_s20 = scalar_lea.vmem %s612_s0, %s410_s15  ;;  %s497_s25 = scalar_lea.vmem %s615_s3, %s410_s15 }
  0x10   : > { %v174_v2 = vld [vmem:[%s469_s20] sm:$0xff]  ;;  %v175_v3 = vld [vmem:[%s469_s20 + $0x8] sm:$0xff]  ;;  %v176_v4 = vld [vmem:[%s469_s20 + $0x10] sm:$0xff] }
  0x11   : > { %v213_v5 = vmul.f32 %v464_v0, %v174_v2  ;;  %v214_v6 = vmul.f32 %v464_v0, %v175_v3  ;;  %v215_v7 = vmul.f32 %v464_v0, %v176_v4  ;;  %v177_v8 = vld [vmem:[%s469_s20 + $0x18] sm:$0xff]  ;;  %v178_v9 = vld [vmem:[%s469_s20 + $0x20] sm:$0xff]  ;;  %v179_v10 = vld [vmem:[%s469_s20 + $0x28] sm:$0xff] }
  0x12   : > { %v216_v11 = vmul.f32 %v464_v0, %v177_v8  ;;  %v217_v12 = vmul.f32 %v464_v0, %v178_v9  ;;  %v218_v13 = vmul.f32 %v464_v0, %v179_v10  ;;  %v180_v14 = vld [vmem:[%s469_s20 + $0x30] sm:$0xff]  ;;  %v181_v15 = vld [vmem:[%s469_s20 + $0x38] sm:$0xff]  ;;  %v182_v24 = vld [vmem:[%s469_s20 + $0x40] sm:$0xff] }
  0x13   : > { %v252_v16 = vadd.f32 %v474_v1, %v213_v5  ;;  %v253_v17 = vadd.f32 %v474_v1, %v214_v6  ;;  %v254_v18 = vadd.f32 %v474_v1, %v215_v7  ;;  %v219_v19 = vmul.f32 %v464_v0, %v180_v14  ;;  %v183_v25 = vld [vmem:[%s469_s20 + $0x48] sm:$0xff]  ;;  %v184_v26 = vld [vmem:[%s469_s20 + $0x50] sm:$0xff]  ;;  %v185_v31 = vld [vmem:[%s469_s20 + $0x58] sm:$0xff] }
  0x14   : > { %v255_v20 = vadd.f32 %v474_v1, %v216_v11  ;;  %v256_v21 = vadd.f32 %v474_v1, %v217_v12  ;;  %v257_v22 = vadd.f32 %v474_v1, %v218_v13  ;;  %v220_v23 = vmul.f32 %v464_v0, %v181_v15  ;;  %v186_v32 = vld [vmem:[%s469_s20 + $0x60] sm:$0xff]  ;;  %v187_v33 = vld [vmem:[%s469_s20 + $0x68] sm:$0xff]  ;;  %v188_v38 = vld [vmem:[%s469_s20 + $0x70] sm:$0xff] }
  0x15   : > { %v284_v27 = vmax.f32 %v252_v16, 0.0  ;;  %v285_v28 = vmax.f32 %v253_v17, 0.0  ;;  %v286_v29 = vmax.f32 %v254_v18, 0.0  ;;  %v258_v30 = vadd.f32 %v474_v1, %v219_v19  ;;  %v189_v43 = vld [vmem:[%s469_s20 + $0x78] sm:$0xff]  ;;  %v190_v56 = vld [vmem:[%s469_s20 + $0x80] sm:$0xff]  ;;  %v191_v57 = vld [vmem:[%s469_s20 + $0x88] sm:$0xff] }
  0x16   : > { %v287_v34 = vmax.f32 %v255_v20, 0.0  ;;  %v288_v35 = vmax.f32 %v256_v21, 0.0  ;;  %v289_v36 = vmax.f32 %v257_v22, 0.0  ;;  %v259_v37 = vadd.f32 %v474_v1, %v220_v23  ;;  %v192_v58 = vld [vmem:[%s469_s20 + $0x90] sm:$0xff]  ;;  %v193_v63 = vld [vmem:[%s469_s20 + $0x98] sm:$0xff]  ;;  %v194_v2 = vld [vmem:[%s469_s20 + $0xa0] sm:$0xff] }
  0x17   : > { %316 = vst [vmem:[%s497_s25] sm:$0xff] %v284_v27  ;;  %317 = vst [vmem:[%s497_s25 + $0x8] sm:$0xff] %v285_v28  ;;  %v290_v39 = vmax.f32 %v258_v30, 0.0  ;;  %v221_v40 = vmul.f32 %v464_v0, %v182_v24  ;;  %v222_v41 = vmul.f32 %v464_v0, %v183_v25  ;;  %v223_v42 = vmul.f32 %v464_v0, %v184_v26  ;;  %v195_v3 = vld [vmem:[%s469_s20 + $0xa8] sm:$0xff]  ;;  %v196_v8 = vld [vmem:[%s469_s20 + $0xb0] sm:$0xff] }
  0x18   : > { %318 = vst [vmem:[%s497_s25 + $0x10] sm:$0xff] %v286_v29  ;;  %319 = vst [vmem:[%s497_s25 + $0x18] sm:$0xff] %v287_v34  ;;  %v291_v44 = vmax.f32 %v259_v37, 0.0  ;;  %v224_v45 = vmul.f32 %v464_v0, %v185_v31  ;;  %v225_v46 = vmul.f32 %v464_v0, %v186_v32  ;;  %v226_v47 = vmul.f32 %v464_v0, %v187_v33  ;;  %v197_v13 = vld [vmem:[%s469_s20 + $0xb8] sm:$0xff]  ;;  %v198_v26 = vld [vmem:[%s469_s20 + $0xc0] sm:$0xff] }
  0x19   : > { %320 = vst [vmem:[%s497_s25 + $0x20] sm:$0xff] %v288_v35  ;;  %321 = vst [vmem:[%s497_s25 + $0x28] sm:$0xff] %v289_v36  ;;  %v260_v48 = vadd.f32 %v474_v1, %v221_v40  ;;  %v261_v49 = vadd.f32 %v474_v1, %v222_v41  ;;  %v262_v50 = vadd.f32 %v474_v1, %v223_v42  ;;  %v199_v27 = vld [vmem:[%s469_s20 + $0xc8] sm:$0xff]  ;;  %v200_v28 = vld [vmem:[%s469_s20 + $0xd0] sm:$0xff] }
  0x1a   : > { %322 = vst [vmem:[%s497_s25 + $0x30] sm:$0xff] %v290_v39  ;;  %v227_v51 = vmul.f32 %v464_v0, %v188_v38  ;;  %323 = vst [vmem:[%s497_s25 + $0x38] sm:$0xff] %v291_v44  ;;  %v263_v52 = vadd.f32 %v474_v1, %v224_v45  ;;  %v264_v53 = vadd.f32 %v474_v1, %v225_v46  ;;  %v201_v33 = vld [vmem:[%s469_s20 + $0xd8] sm:$0xff]  ;;  %v202_v34 = vld [vmem:[%s469_s20 + $0xe0] sm:$0xff] }
  0x1b   : > { %v265_v54 = vadd.f32 %v474_v1, %v226_v47  ;;  %v228_v55 = vmul.f32 %v464_v0, %v189_v43  ;;  %v292_v59 = vmax.f32 %v260_v48, 0.0  ;;  %v293_v60 = vmax.f32 %v261_v49, 0.0  ;;  %v203_v35 = vld [vmem:[%s469_s20 + $0xe8] sm:$0xff]  ;;  %v204_v40 = vld [vmem:[%s469_s20 + $0xf0] sm:$0xff]  ;;  %v205_v45 = vld [vmem:[%s469_s20 + $0xf8] sm:$0xff] }
  0x1c   : > { %v294_v61 = vmax.f32 %v262_v50, 0.0  ;;  %v266_v62 = vadd.f32 %v474_v1, %v227_v51  ;;  %v295_v4 = vmax.f32 %v263_v52, 0.0  ;;  %v296_v5 = vmax.f32 %v264_v53, 0.0 }
  0x1d   : > { %v297_v6 = vmax.f32 %v265_v54, 0.0  ;;  %v267_v7 = vadd.f32 %v474_v1, %v228_v55  ;;  %324 = vst [vmem:[%s497_s25 + $0x40] sm:$0xff] %v292_v59  ;;  %325 = vst [vmem:[%s497_s25 + $0x48] sm:$0xff] %v293_v60  ;;  %v229_v10 = vmul.f32 %v464_v0, %v190_v56  ;;  %v230_v11 = vmul.f32 %v464_v0, %v191_v57 }
  0x1e   : > { %326 = vst [vmem:[%s497_s25 + $0x50] sm:$0xff] %v294_v61  ;;  %v298_v9 = vmax.f32 %v266_v62, 0.0  ;;  %v231_v12 = vmul.f32 %v464_v0, %v192_v58  ;;  %327 = vst [vmem:[%s497_s25 + $0x58] sm:$0xff] %v295_v4  ;;  %v232_v15 = vmul.f32 %v464_v0, %v193_v63  ;;  %v233_v16 = vmul.f32 %v464_v0, %v194_v2 }
  0x1f   : > { %328 = vst [vmem:[%s497_s25 + $0x60] sm:$0xff] %v296_v5  ;;  %329 = vst [vmem:[%s497_s25 + $0x68] sm:$0xff] %v297_v6  ;;  %v299_v14 = vmax.f32 %v267_v7, 0.0  ;;  %v234_v17 = vmul.f32 %v464_v0, %v195_v3  ;;  %v268_v18 = vadd.f32 %v474_v1, %v229_v10  ;;  %v269_v19 = vadd.f32 %v474_v1, %v230_v11 }
  0x20   : > { %330 = vst [vmem:[%s497_s25 + $0x70] sm:$0xff] %v298_v9  ;;  %v270_v20 = vadd.f32 %v474_v1, %v231_v12  ;;  %v235_v21 = vmul.f32 %v464_v0, %v196_v8  ;;  %v271_v22 = vadd.f32 %v474_v1, %v232_v15  ;;  %v272_v23 = vadd.f32 %v474_v1, %v233_v16 }
  0x21   : > { %331 = vst [vmem:[%s497_s25 + $0x78] sm:$0xff] %v299_v14  ;;  %v273_v24 = vadd.f32 %v474_v1, %v234_v17  ;;  %v236_v25 = vmul.f32 %v464_v0, %v197_v13  ;;  %v300_v29 = vmax.f32 %v268_v18, 0.0  ;;  %v301_v30 = vmax.f32 %v269_v19, 0.0 }
  0x22   : > { %v302_v31 = vmax.f32 %v270_v20, 0.0  ;;  %v274_v32 = vadd.f32 %v474_v1, %v235_v21  ;;  %v303_v36 = vmax.f32 %v271_v22, 0.0  ;;  %v304_v37 = vmax.f32 %v272_v23, 0.0 }
  0x23   : > { %v305_v38 = vmax.f32 %v273_v24, 0.0  ;;  %v275_v39 = vadd.f32 %v474_v1, %v236_v25  ;;  %332 = vst [vmem:[%s497_s25 + $0x80] sm:$0xff] %v300_v29  ;;  %333 = vst [vmem:[%s497_s25 + $0x88] sm:$0xff] %v301_v30  ;;  %v237_v42 = vmul.f32 %v464_v0, %v198_v26  ;;  %v238_v43 = vmul.f32 %v464_v0, %v199_v27 }
  0x24   : > { %334 = vst [vmem:[%s497_s25 + $0x90] sm:$0xff] %v302_v31  ;;  %v306_v41 = vmax.f32 %v274_v32, 0.0  ;;  %v239_v44 = vmul.f32 %v464_v0, %v200_v28  ;;  %335 = vst [vmem:[%s497_s25 + $0x98] sm:$0xff] %v303_v36  ;;  %v240_v47 = vmul.f32 %v464_v0, %v201_v33  ;;  %v241_v48 = vmul.f32 %v464_v0, %v202_v34 }
  0x25   : > { %336 = vst [vmem:[%s497_s25 + $0xa0] sm:$0xff] %v304_v37  ;;  %337 = vst [vmem:[%s497_s25 + $0xa8] sm:$0xff] %v305_v38  ;;  %v307_v46 = vmax.f32 %v275_v39, 0.0  ;;  %v242_v49 = vmul.f32 %v464_v0, %v203_v35  ;;  %v276_v50 = vadd.f32 %v474_v1, %v237_v42  ;;  %v277_v51 = vadd.f32 %v474_v1, %v238_v43 }
  0x26   : > { %338 = vst [vmem:[%s497_s25 + $0xb0] sm:$0xff] %v306_v41  ;;  %v278_v52 = vadd.f32 %v474_v1, %v239_v44  ;;  %v243_v53 = vmul.f32 %v464_v0, %v204_v40  ;;  %v279_v54 = vadd.f32 %v474_v1, %v240_v47  ;;  %v280_v55 = vadd.f32 %v474_v1, %v241_v48 }
  0x27   : > { %339 = vst [vmem:[%s497_s25 + $0xb8] sm:$0xff] %v307_v46  ;;  %v281_v56 = vadd.f32 %v474_v1, %v242_v49  ;;  %v244_v57 = vmul.f32 %v464_v0, %v205_v45  ;;  %v308_v58 = vmax.f32 %v276_v50, 0.0  ;;  %v309_v59 = vmax.f32 %v277_v51, 0.0 }
  0x28   : > { %v310_v60 = vmax.f32 %v278_v52, 0.0  ;;  %v282_v61 = vadd.f32 %v474_v1, %v243_v53  ;;  %v311_v62 = vmax.f32 %v279_v54, 0.0  ;;  %v312_v63 = vmax.f32 %v280_v55, 0.0 }
  0x29   : > { %v313_v2 = vmax.f32 %v281_v56, 0.0  ;;  %v283_v3 = vadd.f32 %v474_v1, %v244_v57  ;;  %340 = vst [vmem:[%s497_s25 + $0xc0] sm:$0xff] %v308_v58  ;;  %341 = vst [vmem:[%s497_s25 + $0xc8] sm:$0xff] %v309_v59 }
  0x2a   : > { %342 = vst [vmem:[%s497_s25 + $0xd0] sm:$0xff] %v310_v60  ;;  %v314_v4 = vmax.f32 %v282_v61, 0.0  ;;  %343 = vst [vmem:[%s497_s25 + $0xd8] sm:$0xff] %v311_v62 }
  0x2b   : > { %344 = vst [vmem:[%s497_s25 + $0xe0] sm:$0xff] %v312_v63  ;;  %345 = vst [vmem:[%s497_s25 + $0xe8] sm:$0xff] %v313_v2  ;;  %v315_v0 = vmax.f32 %v283_v3, 0.0 }
  0x2c   : > { %346 = vst [vmem:[%s497_s25 + $0xf0] sm:$0xff] %v314_v4 }
  0x2d   : > { %347 = vst [vmem:[%s497_s25 + $0xf8] sm:$0xff] %v315_v0 }
  0x2e PF: > { %s13_s12 = sadd.s32 1, %s431_s12  }
  0x2f   : > { %p10_p4 = scmp.ge.s32.totalorder %s13_s12, 4  }
  0x31   :  { %12 = sbr.rel (!%p10_p4) target bundleno = 1 (0x1), region = 62 }

// kernel: global_generator_forward.37
= control target key start
LH: loop header
LB: loop body
LE: loop exit
PB: predicated region body
PF: predicated region fallthrough
CT: control target
= control target key end

     0   :  { %s1472_s12 = smov 0   ;;  %s1474_s13 = smov 0   ;;  %s1720_s0 = inlined_call_operand.vmem [shape: bf16[512,256], index: 0, kind: input, shape index: {}]   ;;  %s1721_s1 = inlined_call_operand.vmem [shape: bf16[256,128], index: 1, kind: input, shape index: {}]   ;;  %s1722_s2 = inlined_call_operand.vmem [shape: f32[512,128], index: 2, kind: output, shape index: {0}]   ;;  %s1723_s3 = inlined_call_operand.vmem [shape: f32[16,128], index: 3, kind: output, shape index: {1}]  }
   0x1   :  { %s1476_s14 = smov 0  }
   0x2 LB: > { %s26_s15 = sadd.s32 1, %s1446_s13  ;;  %p1154_p0 = scmp.ge.s32.totalorder %s1450_s14, 1  ;;  %s1450_s14 = sphi %s1476_s14, %s14_s14   ;;  %s1446_s13 = sphi %s1474_s13, %s1725_s13   ;;  %s1442_s12 = sphi %s1472_s12, %s1724_s12  }
   0x3   : > { %p28_p1 = scmp.ge.s32.totalorder %s26_s15, 2  ;;  %p172_p2 = scmp.lt.s32.totalorder %s1450_s14, 3 }
   0x5   : > { %s1727_s15 = smov (%p28_p1, %s26_s15), 0  ;;  %p173_p3 = pnand %p1154_p0, %p172_p2 }
   0x6   : > { %v1364_v0 = vld [vmem:[%s1721_s1 + $0x40] sm:$0xff] (!%p173_p3)   ;;  %s1155_s18 = sshll.u32 (!%p173_p3), %s1442_s12, 5  ;;  %v1366_v2 = vld [vmem:[%s1721_s1 + $0x48] sm:$0xff] (!%p173_p3)   ;;  %v1368_v4 = vld [vmem:[%s1721_s1 + $0x50] sm:$0xff] (!%p173_p3)   ;;  %p234_p5 = scmp.lt.s32.totalorder (!%p173_p3), %s1442_s12, 1 }
   0x7   : > { %176 = sbr.rel (%p173_p3) target bundleno = 363 (0x16b), region = 28  ;;  %v1365_v1 = vld [vmem:[%s1721_s1] sm:$0xff] (!%p173_p3)   ;;  %1212 = vmatprep.subr.bf16.mxu0 (!%p173_p3), %v1364_v0  ;;  %1324 = vmatprep.subr.bf16.mxu1 (!%p173_p3), %v1364_v0  ;;  %v1367_v3 = vld [vmem:[%s1721_s1 + $0x8] sm:$0xff] (!%p173_p3)   ;;  %p212_p4 = scmp.lt.s32.totalorder (!%p173_p3), %s1155_s18, 63  ;;  %v1369_v5 = vld [vmem:[%s1721_s1 + $0x10] sm:$0xff] (!%p173_p3)  }
   0x8   : > { %1213 = vmatpush3.bf16.msra.mxu0 (!%p173_p3), %v1365_v1  ;;  %1332 = vmatpush3.bf16.msra.mxu1 (!%p173_p3), %v1365_v1  ;;  %v1370_v6 = vld [vmem:[%s1721_s1 + $0x58] sm:$0xff] (!%p173_p3)   ;;  %v1372_v8 = vld [vmem:[%s1721_s1 + $0x60] sm:$0xff] (!%p173_p3)   ;;  %v1374_v10 = vld [vmem:[%s1721_s1 + $0x68] sm:$0xff] (!%p173_p3)  }
   0x9   : > { %1214 = vmatprep.subr.bf16.mxu0 (!%p173_p3), %v1366_v2  ;;  %1325 = vmatprep.subr.bf16.mxu1 (!%p173_p3), %v1366_v2  ;;  %v1371_v7 = vld [vmem:[%s1721_s1 + $0x18] sm:$0xff] (!%p173_p3)   ;;  %v1373_v9 = vld [vmem:[%s1721_s1 + $0x20] sm:$0xff] (!%p173_p3)   ;;  %v1375_v12 = vld [vmem:[%s1721_s1 + $0x28] sm:$0xff] (!%p173_p3)  }
   0xa   : > { %v1376_v13 = vld [vmem:[%s1721_s1 + $0x70] sm:$0xff] (!%p173_p3)   ;;  %v1378_v16 = vld [vmem:[%s1721_s1 + $0x78] sm:$0xff] (!%p173_p3)  }
   0xb   : > { %v1377_v15 = vld [vmem:[%s1721_s1 + $0x30] sm:$0xff] (!%p173_p3)   ;;  %v1379_v17 = vld [vmem:[%s1721_s1 + $0x38] sm:$0xff] (!%p173_p3)  }
   0xc   : > { %1215 = vmatpush3.bf16.msra.mxu0 (!%p173_p3), %v1367_v3  ;;  %1333 = vmatpush3.bf16.msra.mxu1 (!%p173_p3), %v1367_v3 }
   0xd   : > { %1216 = vmatprep.subr.bf16.mxu0 (!%p173_p3), %v1368_v4  ;;  %1326 = vmatprep.subr.bf16.mxu1 (!%p173_p3), %v1368_v4 }
   0xe   : > { %s1729_s18 = smov (!%p212_p4, %s1155_s18), 63  ;;  %s1731_s12 = smov (!%p234_p5, %s1442_s12), 1 }
   0xf   : > { %s1211_s6 = sshll.u32 %s1729_s18, 3  ;;  %s1160_s18 = sshll.u32 %s1731_s12, 3 }
  0x10   : > { %1217 = vmatpush3.bf16.msra.mxu0 %v1369_v5  ;;  %1334 = vmatpush3.bf16.msra.mxu1 %v1369_v5  ;;  %s1528_s11 = scalar_lea.vmem %s1720_s0, %s1211_s6  ;;  %s1588_s7 = scalar_lea.vmem %s1722_s2, %s1211_s6 }
  0x11   : > { %1218 = vmatprep.subr.bf16.mxu0 %v1370_v6  ;;  %1327 = vmatprep.subr.bf16.mxu1 %v1370_v6  ;;  %v1382_v11 = vld [vmem:[%s1528_s11 + $0x4] ss:$8 sps:$4 sm:$0xff]   ;;  %v1380_v18 = vld [vmem:[%s1528_s11] ss:$8 sps:$4 sm:$0xff]   ;;  %v1383_v19 = vld [vmem:[%s1528_s11 + $0x14] ss:$8 sps:$4 sm:$0xff]   ;;  %s237_s9 = scalar_lea.vmem %s1723_s3, %s1160_s18 }
  0x12   : > { %659 = vmatprep.mubr.bf16.mxu0 %v1382_v11  ;;  %v1394_v14 = vld [vmem:[%s1528_s11 + $0x84] ss:$8 sps:$4 sm:$0xff]   ;;  %v1392_v20 = vld [vmem:[%s1528_s11 + $0x80] ss:$8 sps:$4 sm:$0xff]   ;;  %v1398_v21 = vld [vmem:[%s1528_s11 + $0x94] ss:$8 sps:$4 sm:$0xff]  }
  0x13   : > { %723 = vmatprep.mubr.bf16.mxu1 %v1394_v14  ;;  %v1385_v22 = vld [vmem:[%s1528_s11 + $0x10] ss:$8 sps:$4 sm:$0xff]   ;;  %v1386_v23 = vld [vmem:[%s1528_s11 + $0x24] ss:$8 sps:$4 sm:$0xff]   ;;  %v1388_v26 = vld [vmem:[%s1528_s11 + $0x20] ss:$8 sps:$4 sm:$0xff]  }
  0x14   : > { %1219 = vmatpush3.bf16.msra.mxu0 %v1371_v7  ;;  %1335 = vmatpush3.bf16.msra.mxu1 %v1371_v7  ;;  %v1400_v24 = vld [vmem:[%s1528_s11 + $0x90] ss:$8 sps:$4 sm:$0xff]   ;;  %v1404_v25 = vld [vmem:[%s1528_s11 + $0xa4] ss:$8 sps:$4 sm:$0xff]   ;;  %v1389_v27 = vld [vmem:[%s1528_s11 + $0x34] ss:$8 sps:$4 sm:$0xff]  }
  0x15   : > { %1220 = vmatprep.subr.bf16.mxu0 %v1372_v8  ;;  %1328 = vmatprep.subr.bf16.mxu1 %v1372_v8  ;;  %v1406_v28 = vld [vmem:[%s1528_s11 + $0xa0] ss:$8 sps:$4 sm:$0xff]   ;;  %v1410_v29 = vld [vmem:[%s1528_s11 + $0xb4] ss:$8 sps:$4 sm:$0xff]   ;;  %v1391_v30 = vld [vmem:[%s1528_s11 + $0x30] ss:$8 sps:$4 sm:$0xff]  }
  0x16   : > { %v1395_v31 = vld [vmem:[%s1528_s11 + $0x44] ss:$8 sps:$4 sm:$0xff]   ;;  %v1412_v32 = vld [vmem:[%s1528_s11 + $0xb0] ss:$8 sps:$4 sm:$0xff]   ;;  %v1397_v34 = vld [vmem:[%s1528_s11 + $0x40] ss:$8 sps:$4 sm:$0xff]  }
  0x17   : > { %v1416_v33 = vld [vmem:[%s1528_s11 + $0xc4] ss:$8 sps:$4 sm:$0xff]   ;;  %v1401_v35 = vld [vmem:[%s1528_s11 + $0x54] ss:$8 sps:$4 sm:$0xff]   ;;  %v1418_v36 = vld [vmem:[%s1528_s11 + $0xc0] ss:$8 sps:$4 sm:$0xff]  }
  0x18   : > { %1221 = vmatpush3.bf16.msra.mxu0 %v1373_v9  ;;  %1336 = vmatpush3.bf16.msra.mxu1 %v1373_v9  ;;  %v1419_v37 = vld [vmem:[%s1528_s11 + $0xd4] ss:$8 sps:$4 sm:$0xff]   ;;  %v1403_v38 = vld [vmem:[%s1528_s11 + $0x50] ss:$8 sps:$4 sm:$0xff]   ;;  %v1407_v39 = vld [vmem:[%s1528_s11 + $0x64] ss:$8 sps:$4 sm:$0xff]  }
  0x19   : > { %1222 = vmatprep.subr.bf16.mxu0 %v1374_v10  ;;  %1329 = vmatprep.subr.bf16.mxu1 %v1374_v10  ;;  %v1421_v40 = vld [vmem:[%s1528_s11 + $0xd0] ss:$8 sps:$4 sm:$0xff]   ;;  %v1422_v41 = vld [vmem:[%s1528_s11 + $0xe4] ss:$8 sps:$4 sm:$0xff]   ;;  %v1409_v42 = vld [vmem:[%s1528_s11 + $0x60] ss:$8 sps:$4 sm:$0xff]  }
  0x1a   : > { %v1413_v43 = vld [vmem:[%s1528_s11 + $0x74] ss:$8 sps:$4 sm:$0xff]   ;;  %v1424_v44 = vld [vmem:[%s1528_s11 + $0xe0] ss:$8 sps:$4 sm:$0xff]   ;;  %v1415_v46 = vld [vmem:[%s1528_s11 + $0x70] ss:$8 sps:$4 sm:$0xff]  }
  0x1b   : > { %v1425_v45 = vld [vmem:[%s1528_s11 + $0xf4] ss:$8 sps:$4 sm:$0xff]   ;;  %v1427_v47 = vld [vmem:[%s1528_s11 + $0xf0] ss:$8 sps:$4 sm:$0xff]  }
  0x1c   : > { %1223 = vmatpush3.bf16.msra.mxu0 %v1375_v12  ;;  %1337 = vmatpush3.bf16.msra.mxu1 %v1375_v12 }
  0x1d   : > { %1224 = vmatprep.subr.bf16.mxu0 %v1376_v13  ;;  %1330 = vmatprep.subr.bf16.mxu1 %v1376_v13 }
  0x20   : > { %1225 = vmatpush3.bf16.msra.mxu0 %v1377_v15  ;;  %1338 = vmatpush3.bf16.msra.mxu1 %v1377_v15 }
  0x21   : > { %1226 = vmatprep.subr.bf16.mxu0 %v1378_v16  ;;  %1331 = vmatprep.subr.bf16.mxu1 %v1378_v16 }
  0x24   : > { %1227 = vmatpush3.bf16.msra.mxu0 %v1379_v17  ;;  %1339 = vmatpush3.bf16.msra.mxu1 %v1379_v17 }
  0x27   : > { %660 = vmatmul.mubr.bf16.vlgmr.msra.gmra.mrb[0].mxu0 %v1380_v18  ;;  %724 = vmatmul.mubr.bf16.vlgmr.msra.gmra.mrb[0].mxu1 %v1392_v20 }
  0x28   : > { %667 = vmatprep.mubr.bf16.mxu0 %v1383_v19  ;;  %731 = vmatprep.mubr.bf16.mxu1 %v1398_v21 }
  0x2f   : > { %668 = vmatmul.mubr.bf16.gmra.mrb[4].mxu0 %v1385_v22  ;;  %732 = vmatmul.mubr.bf16.gmra.mrb[4].mxu1 %v1400_v24 }
  0x30   : > { %675 = vmatprep.mubr.bf16.mxu0 %v1386_v23  ;;  %739 = vmatprep.mubr.bf16.mxu1 %v1404_v25 }
  0x37   : > { %676 = vmatmul.mubr.bf16.gmra.mrb[8].mxu0 %v1388_v26  ;;  %740 = vmatmul.mubr.bf16.gmra.mrb[8].mxu1 %v1406_v28 }
  0x38   : > { %683 = vmatprep.mubr.bf16.mxu0 %v1389_v27  ;;  %747 = vmatprep.mubr.bf16.mxu1 %v1410_v29 }
  0x3f   : > { %684 = vmatmul.mubr.bf16.gmra.mrb[12].mxu0 %v1391_v30  ;;  %748 = vmatmul.mubr.bf16.gmra.mrb[12].mxu1 %v1412_v32 }
  0x40   : > { %691 = vmatprep.mubr.bf16.mxu0 %v1395_v31  ;;  %755 = vmatprep.mubr.bf16.mxu1 %v1416_v33 }
  0x47   : > { %692 = vmatmul.mubr.bf16.gmra.mrb[16].mxu0 %v1397_v34  ;;  %756 = vmatmul.mubr.bf16.gmra.mrb[16].mxu1 %v1418_v36 }
  0x48   : > { %699 = vmatprep.mubr.bf16.mxu0 %v1401_v35  ;;  %763 = vmatprep.mubr.bf16.mxu1 %v1419_v37 }
  0x4f   : > { %700 = vmatmul.mubr.bf16.gmra.mrb[20].mxu0 %v1403_v38  ;;  %764 = vmatmul.mubr.bf16.gmra.mrb[20].mxu1 %v1421_v40 }
  0x50   : > { %707 = vmatprep.mubr.bf16.mxu0 %v1407_v39  ;;  %771 = vmatprep.mubr.bf16.mxu1 %v1422_v41 }
  0x57   : > { %708 = vmatmul.mubr.bf16.gmra.mrb[24].mxu0 %v1409_v42  ;;  %772 = vmatmul.mubr.bf16.gmra.mrb[24].mxu1 %v1424_v44 }
  0x58   : > { %715 = vmatprep.mubr.bf16.mxu0 %v1413_v43  ;;  %779 = vmatprep.mubr.bf16.mxu1 %v1425_v45 }
  0x5f   : > { %716 = vmatmul.mubr.bf16.gmra.mrb[28].mxu0 %v1415_v46  ;;  %780 = vmatmul.mubr.bf16.gmra.mrb[28].mxu1 %v1427_v47 }
  0xfa   : > { %v1228_v48 = vpop.f32.mrb[0].mxu0  ;;  %v1276_v50 = vpop.f32.mrb[0].mxu1 }
  0xfb   : > { %v1229_v49 = vpop.f32.mrb[1].mxu0  ;;  %v1277_v53 = vpop.f32.mrb[1].mxu1 }
  0xfc   : > { %v1230_v51 = vadd.f32 %v1229_v49, %v1228_v48  ;;  %v1231_v52 = vpop.f32.mrb[2].mxu0  ;;  %v1590_v55 = vadd.f32 %v1277_v53, %v1276_v50  ;;  %v1279_v56 = vpop.f32.mrb[2].mxu1 }
  0xfd   : > { %v1232_v54 = vpop.f32.mrb[3].mxu0  ;;  %v1280_v58 = vpop.f32.mrb[3].mxu1 }
  0xfe   : > { %887 = vst [vmem:[%s1588_s7] sm:$0xff] %v1230_v51  ;;  %v1233_v57 = vadd.f32 %v1232_v54, %v1231_v52  ;;  %903 = vst [vmem:[%s1588_s7 + $0x80] sm:$0xff] %v1590_v55  ;;  %v1595_v59 = vadd.f32 %v1280_v58, %v1279_v56  ;;  %v956_v60 = vmul.f32 %v1230_v51, %v1230_v51 }
 0x100   : > { %888 = vst [vmem:[%s1588_s7 + $0x8] sm:$0xff] %v1233_v57  ;;  %v919_v61 = vadd.f32 %v1233_v57, %v1230_v51  ;;  %v957_v62 = vmul.f32 %v1233_v57, %v1233_v57  ;;  %904 = vst [vmem:[%s1588_s7 + $0x88] sm:$0xff] %v1595_v59 }
 0x102   : > { %v988_v63 = vadd.f32 %v957_v62, %v956_v60  ;;  %v1234_v0 = vpop.f32.mrb[4].mxu0  ;;  %v1282_v2 = vpop.f32.mrb[4].mxu1 }
 0x103   : > { %v1235_v1 = vpop.f32.mrb[5].mxu0  ;;  %v1283_v5 = vpop.f32.mrb[5].mxu1 }
 0x104   : > { %v1236_v3 = vadd.f32 %v1235_v1, %v1234_v0  ;;  %v1237_v4 = vpop.f32.mrb[6].mxu0  ;;  %v1600_v7 = vadd.f32 %v1283_v5, %v1282_v2  ;;  %v1285_v8 = vpop.f32.mrb[6].mxu1 }
 0x105   : > { %v1238_v6 = vpop.f32.mrb[7].mxu0  ;;  %v1286_v12 = vpop.f32.mrb[7].mxu1 }
 0x106   : > { %889 = vst [vmem:[%s1588_s7 + $0x10] sm:$0xff] %v1236_v3  ;;  %v920_v9 = vadd.f32 %v1236_v3, %v919_v61  ;;  %v958_v10 = vmul.f32 %v1236_v3, %v1236_v3  ;;  %v1239_v11 = vadd.f32 %v1238_v6, %v1237_v4  ;;  %905 = vst [vmem:[%s1588_s7 + $0x90] sm:$0xff] %v1600_v7 }
 0x107   : > { %v1605_v13 = vadd.f32 %v1286_v12, %v1285_v8 }
 0x108   : > { %v989_v14 = vadd.f32 %v988_v63, %v958_v10  ;;  %890 = vst [vmem:[%s1588_s7 + $0x18] sm:$0xff] %v1239_v11  ;;  %v921_v15 = vadd.f32 %v1239_v11, %v920_v9  ;;  %v959_v16 = vmul.f32 %v1239_v11, %v1239_v11 }
 0x109   : > { %906 = vst [vmem:[%s1588_s7 + $0x98] sm:$0xff] %v1605_v13 }
 0x10a   : > { %v990_v17 = vadd.f32 %v989_v14, %v959_v16  ;;  %v1240_v18 = vpop.f32.mrb[8].mxu0  ;;  %v1288_v20 = vpop.f32.mrb[8].mxu1 }
 0x10b   : > { %v1241_v19 = vpop.f32.mrb[9].mxu0  ;;  %v1289_v23 = vpop.f32.mrb[9].mxu1 }
 0x10c   : > { %v1242_v21 = vadd.f32 %v1241_v19, %v1240_v18  ;;  %v1243_v22 = vpop.f32.mrb[10].mxu0  ;;  %v1610_v25 = vadd.f32 %v1289_v23, %v1288_v20  ;;  %v1291_v26 = vpop.f32.mrb[10].mxu1 }
 0x10d   : > { %v1244_v24 = vpop.f32.mrb[11].mxu0  ;;  %v1292_v30 = vpop.f32.mrb[11].mxu1 }
 0x10e   : > { %891 = vst [vmem:[%s1588_s7 + $0x20] sm:$0xff] %v1242_v21  ;;  %v922_v27 = vadd.f32 %v1242_v21, %v921_v15  ;;  %v960_v28 = vmul.f32 %v1242_v21, %v1242_v21  ;;  %v1245_v29 = vadd.f32 %v1244_v24, %v1243_v22  ;;  %907 = vst [vmem:[%s1588_s7 + $0xa0] sm:$0xff] %v1610_v25 }
 0x10f   : > { %v1615_v31 = vadd.f32 %v1292_v30, %v1291_v26 }
 0x110   : > { %v991_v32 = vadd.f32 %v990_v17, %v960_v28  ;;  %892 = vst [vmem:[%s1588_s7 + $0x28] sm:$0xff] %v1245_v29  ;;  %v923_v33 = vadd.f32 %v1245_v29, %v922_v27  ;;  %v961_v34 = vmul.f32 %v1245_v29, %v1245_v29 }
 0x111   : > { %908 = vst [vmem:[%s1588_s7 + $0xa8] sm:$0xff] %v1615_v31 }
 0x112   : > { %v992_v35 = vadd.f32 %v991_v32, %v961_v34  ;;  %v1246_v36 = vpop.f32.mrb[12].mxu0  ;;  %v1294_v38 = vpop.f32.mrb[12].mxu1 }
 0x113   : > { %v1247_v37 = vpop.f32.mrb[13].mxu0  ;;  %v1295_v41 = vpop.f32.mrb[13].mxu1 }
 0x114   : > { %v1248_v39 = vadd.f32 %v1247_v37, %v1246_v36  ;;  %v1249_v40 = vpop.f32.mrb[14].mxu0  ;;  %v1620_v43 = vadd.f32 %v1295_v41, %v1294_v38  ;;  %v1297_v44 = vpop.f32.mrb[14].mxu1 }
 0x115   : > { %v1250_v42 = vpop.f32.mrb[15].mxu0  ;;  %v1298_v48 = vpop.f32.mrb[15].mxu1 }
 0x116   : > { %893 = vst [vmem:[%s1588_s7 + $0x30] sm:$0xff] %v1248_v39  ;;  %v924_v45 = vadd.f32 %v1248_v39, %v923_v33  ;;  %v962_v46 = vmul.f32 %v1248_v39, %v1248_v39  ;;  %v1251_v47 = vadd.f32 %v1250_v42, %v1249_v40  ;;  %909 = vst [vmem:[%s1588_s7 + $0xb0] sm:$0xff] %v1620_v43 }
 0x117   : > { %v1625_v49 = vadd.f32 %v1298_v48, %v1297_v44 }
 0x118   : > { %v993_v50 = vadd.f32 %v992_v35, %v962_v46  ;;  %894 = vst [vmem:[%s1588_s7 + $0x38] sm:$0xff] %v1251_v47  ;;  %v925_v51 = vadd.f32 %v1251_v47, %v924_v45  ;;  %v963_v52 = vmul.f32 %v1251_v47, %v1251_v47 }
 0x119   : > { %910 = vst [vmem:[%s1588_s7 + $0xb8] sm:$0xff] %v1625_v49 }
 0x11a   : > { %v994_v53 = vadd.f32 %v993_v50, %v963_v52  ;;  %v1252_v54 = vpop.f32.mrb[16].mxu0  ;;  %v1300_v57 = vpop.f32.mrb[16].mxu1 }
 0x11b   : > { %v1253_v56 = vpop.f32.mrb[17].mxu0  ;;  %v1301_v61 = vpop.f32.mrb[17].mxu1 }
 0x11c   : > { %v1254_v58 = vadd.f32 %v1253_v56, %v1252_v54  ;;  %v1255_v60 = vpop.f32.mrb[18].mxu0  ;;  %v1630_v63 = vadd.f32 %v1301_v61, %v1300_v57  ;;  %v1303_v0 = vpop.f32.mrb[18].mxu1 }
 0x11d   : > { %v1256_v62 = vpop.f32.mrb[19].mxu0  ;;  %v1304_v4 = vpop.f32.mrb[19].mxu1 }
 0x11e   : > { %895 = vst [vmem:[%s1588_s7 + $0x40] sm:$0xff] %v1254_v58  ;;  %v926_v1 = vadd.f32 %v1254_v58, %v925_v51  ;;  %v964_v2 = vmul.f32 %v1254_v58, %v1254_v58  ;;  %v1257_v3 = vadd.f32 %v1256_v62, %v1255_v60  ;;  %911 = vst [vmem:[%s1588_s7 + $0xc0] sm:$0xff] %v1630_v63 }
 0x11f   : > { %v1635_v5 = vadd.f32 %v1304_v4, %v1303_v0 }
 0x120   : > { %v995_v6 = vadd.f32 %v994_v53, %v964_v2  ;;  %896 = vst [vmem:[%s1588_s7 + $0x48] sm:$0xff] %v1257_v3  ;;  %v927_v8 = vadd.f32 %v1257_v3, %v926_v1  ;;  %v965_v9 = vmul.f32 %v1257_v3, %v1257_v3 }
 0x121   : > { %912 = vst [vmem:[%s1588_s7 + $0xc8] sm:$0xff] %v1635_v5 }
 0x122   : > { %v996_v10 = vadd.f32 %v995_v6, %v965_v9  ;;  %v1258_v11 = vpop.f32.mrb[20].mxu0  ;;  %v1306_v14 = vpop.f32.mrb[20].mxu1 }
 0x123   : > { %v1259_v12 = vpop.f32.mrb[21].mxu0  ;;  %v1307_v17 = vpop.f32.mrb[21].mxu1 }
 0x124   : > { %v1260_v15 = vadd.f32 %v1259_v12, %v1258_v11  ;;  %v1261_v16 = vpop.f32.mrb[22].mxu0  ;;  %v1640_v19 = vadd.f32 %v1307_v17, %v1306_v14  ;;  %v1309_v20 = vpop.f32.mrb[22].mxu1  ;;  %v973_v14 = vmul.f32 %v1595_v59, %v1595_v59  ;;  %v974_v17 = vmul.f32 %v1600_v7, %v1600_v7 }
 0x125   : > { %v1262_v18 = vpop.f32.mrb[23].mxu0  ;;  %v1310_v24 = vpop.f32.mrb[23].mxu1 }
 0x126   : > { %897 = vst [vmem:[%s1588_s7 + $0x50] sm:$0xff] %v1260_v15  ;;  %v928_v21 = vadd.f32 %v1260_v15, %v927_v8  ;;  %v966_v22 = vmul.f32 %v1260_v15, %v1260_v15  ;;  %v1263_v23 = vadd.f32 %v1262_v18, %v1261_v16  ;;  %913 = vst [vmem:[%s1588_s7 + $0xd0] sm:$0xff] %v1640_v19 }
 0x127   : > { %v1645_v26 = vadd.f32 %v1310_v24, %v1309_v20 }
 0x128   : > { %v997_v27 = vadd.f32 %v996_v10, %v966_v22  ;;  %898 = vst [vmem:[%s1588_s7 + $0x58] sm:$0xff] %v1263_v23  ;;  %v929_v28 = vadd.f32 %v1263_v23, %v928_v21  ;;  %v967_v29 = vmul.f32 %v1263_v23, %v1263_v23  ;;  %v972_v10 = vmul.f32 %v1590_v55, %v1590_v55 }
 0x129   : > { %914 = vst [vmem:[%s1588_s7 + $0xd8] sm:$0xff] %v1645_v26  ;;  %v975_v21 = vmul.f32 %v1605_v13, %v1605_v13 }
 0x12a   : > { %v998_v30 = vadd.f32 %v997_v27, %v967_v29  ;;  %v1264_v32 = vpop.f32.mrb[24].mxu0  ;;  %v1312_v34 = vpop.f32.mrb[24].mxu1 }
 0x12b   : > { %v1265_v33 = vpop.f32.mrb[25].mxu0  ;;  %v1313_v37 = vpop.f32.mrb[25].mxu1 }
 0x12c   : > { %v1266_v35 = vadd.f32 %v1265_v33, %v1264_v32  ;;  %v1267_v36 = vpop.f32.mrb[26].mxu0  ;;  %v1650_v39 = vadd.f32 %v1313_v37, %v1312_v34  ;;  %v1315_v40 = vpop.f32.mrb[26].mxu1 }
 0x12d   : > { %v1268_v38 = vpop.f32.mrb[27].mxu0  ;;  %v1316_v45 = vpop.f32.mrb[27].mxu1 }
 0x12e   : > { %899 = vst [vmem:[%s1588_s7 + $0x60] sm:$0xff] %v1266_v35  ;;  %v930_v41 = vadd.f32 %v1266_v35, %v929_v28  ;;  %v968_v42 = vmul.f32 %v1266_v35, %v1266_v35  ;;  %v1269_v44 = vadd.f32 %v1268_v38, %v1267_v36  ;;  %915 = vst [vmem:[%s1588_s7 + $0xe0] sm:$0xff] %v1650_v39 }
 0x12f   : > { %v1655_v46 = vadd.f32 %v1316_v45, %v1315_v40  ;;  %v980_v35 = vmul.f32 %v1630_v63, %v1630_v63  ;;  %v981_v38 = vmul.f32 %v1635_v5, %v1635_v5 }
 0x130   : > { %v999_v47 = vadd.f32 %v998_v30, %v968_v42  ;;  %900 = vst [vmem:[%s1588_s7 + $0x68] sm:$0xff] %v1269_v44  ;;  %v931_v48 = vadd.f32 %v1269_v44, %v930_v41  ;;  %v969_v50 = vmul.f32 %v1269_v44, %v1269_v44  ;;  %v982_v41 = vmul.f32 %v1640_v19, %v1640_v19 }
 0x131   : > { %916 = vst [vmem:[%s1588_s7 + $0xe8] sm:$0xff] %v1655_v46 }
 0x132   : > { %v1000_v51 = vadd.f32 %v999_v47, %v969_v50  ;;  %v1270_v52 = vpop.f32.mrb[28].mxu0  ;;  %v1318_v54 = vpop.f32.mrb[28].mxu1  ;;  %v984_v47 = vmul.f32 %v1650_v39, %v1650_v39 }
 0x133   : > { %v1271_v53 = vpop.f32.mrb[29].mxu0  ;;  %v1319_v58 = vpop.f32.mrb[29].mxu1 }
 0x134   : > { %v1272_v56 = vadd.f32 %v1271_v53, %v1270_v52  ;;  %v1273_v57 = vpop.f32.mrb[30].mxu0  ;;  %v1320_v61 = vadd.f32 %v1319_v58, %v1318_v54  ;;  %v1321_v62 = vpop.f32.mrb[30].mxu1 }
 0x135   : > { %v1274_v60 = vpop.f32.mrb[31].mxu0  ;;  %v1322_v3 = vpop.f32.mrb[31].mxu1 }
 0x136   : > { %901 = vst [vmem:[%s1588_s7 + $0x70] sm:$0xff] %v1272_v56  ;;  %v932_v0 = vadd.f32 %v1272_v56, %v931_v48  ;;  %v970_v1 = vmul.f32 %v1272_v56, %v1272_v56  ;;  %v1275_v2 = vadd.f32 %v1274_v60, %v1273_v57  ;;  %917 = vst [vmem:[%s1588_s7 + $0xf0] sm:$0xff] %v1320_v61 }
 0x137   : > { %v1323_v4 = vadd.f32 %v1322_v3, %v1321_v62  ;;  %v986_v50 = vmul.f32 %v1320_v61, %v1320_v61  ;;  %v1025_v62 = vlaneseq }
 0x138   : > { %v1001_v6 = vadd.f32 %v1000_v51, %v970_v1  ;;  %902 = vst [vmem:[%s1588_s7 + $0x78] sm:$0xff] %v1275_v2  ;;  %v933_v8 = vadd.f32 %v1275_v2, %v932_v0  ;;  %v971_v9 = vmul.f32 %v1275_v2, %v1275_v2 }
 0x139   : > { %918 = vst [vmem:[%s1588_s7 + $0xf8] sm:$0xff] %v1323_v4  ;;  %v987_v56 = vmul.f32 %v1323_v4, %v1323_v4  ;;  %v1026_v3 = vshrl.u32 %v1025_v62, 7 }
 0x13a   : > { %v934_v11 = vadd.f32 %v1590_v55, %v933_v8  ;;  %v1002_v12 = vadd.f32 %v1001_v6, %v971_v9  ;;  %v976_v55 = vmul.f32 %v1610_v25, %v1610_v25 }
 0x13b   : > { %vm1028_vm0 = vcmp.eq.s32.totalorder %v1026_v3, 1  ;;  %vm1027_vm1 = vcmp.eq.s32.totalorder %v1026_v3, 0 }
 0x13c   : > { %v935_v15 = vadd.f32 %v1595_v59, %v934_v11  ;;  %v1003_v16 = vadd.f32 %v1002_v12, %v972_v10  ;;  %v977_v59 = vmul.f32 %v1615_v31, %v1615_v31 }
 0x13e   : > { %v936_v18 = vadd.f32 %v1600_v7, %v935_v15  ;;  %v1004_v20 = vadd.f32 %v1003_v16, %v973_v14  ;;  %v978_v7 = vmul.f32 %v1620_v43, %v1620_v43 }
 0x140   : > { %v937_v22 = vadd.f32 %v1605_v13, %v936_v18  ;;  %v1005_v23 = vadd.f32 %v1004_v20, %v974_v17  ;;  %v979_v13 = vmul.f32 %v1625_v49, %v1625_v49 }
 0x142   : > { %v1006_v24 = vadd.f32 %v1005_v23, %v975_v21  ;;  %v938_v27 = vadd.f32 %v1610_v25, %v937_v22 }
 0x144   : > { %v939_v28 = vadd.f32 %v1615_v31, %v938_v27  ;;  %v1007_v29 = vadd.f32 %v1006_v24, %v976_v55 }
 0x146   : > { %v940_v30 = vadd.f32 %v1620_v43, %v939_v28  ;;  %v1008_v32 = vadd.f32 %v1007_v29, %v977_v59 }
 0x148   : > { %v941_v33 = vadd.f32 %v1625_v49, %v940_v30  ;;  %v1009_v34 = vadd.f32 %v1008_v32, %v978_v7 }
 0x14a   : > { %v942_v25 = vadd.f32 %v1630_v63, %v941_v33  ;;  %v1010_v36 = vadd.f32 %v1009_v34, %v979_v13  ;;  %v983_v63 = vmul.f32 %v1645_v26, %v1645_v26 }
 0x14c   : > { %v1011_v31 = vadd.f32 %v1010_v36, %v980_v35  ;;  %v943_v37 = vadd.f32 %v1635_v5, %v942_v25 }
 0x14e   : > { %v1012_v43 = vadd.f32 %v1011_v31, %v981_v38  ;;  %v944_v40 = vadd.f32 %v1640_v19, %v943_v37  ;;  %v985_v19 = vmul.f32 %v1655_v46, %v1655_v46 }
 0x150   : > { %v1013_v49 = vadd.f32 %v1012_v43, %v982_v41  ;;  %v945_v42 = vadd.f32 %v1645_v26, %v944_v40 }
 0x152   : > { %v1014_v44 = vadd.f32 %v1013_v49, %v983_v63  ;;  %v946_v45 = vadd.f32 %v1650_v39, %v945_v42 }
 0x154   : > { %v1015_v5 = vadd.f32 %v1014_v44, %v984_v47  ;;  %v947_v48 = vadd.f32 %v1655_v46, %v946_v45 }
 0x156   : > { %v1016_v51 = vadd.f32 %v1015_v5, %v985_v19  ;;  %v948_v52 = vadd.f32 %v1320_v61, %v947_v48 }
 0x158   : > { %v1017_v53 = vadd.f32 %v1016_v51, %v986_v50  ;;  %v949_v54 = vadd.f32 %v1323_v4, %v948_v52 }
 0x15a   : > { %v950_v26 = vrot.slane %v949_v54, 4  ;;  %v1018_v57 = vadd.f32 %v1017_v53, %v987_v56 }
 0x15c   : > { %v951_v58 = vadd.f32 %v950_v26, %v949_v54  ;;  %v1019_v60 = vrot.slane %v1018_v57, 4 }
 0x15e   : > { %v952_v39 = vrot.slane %v951_v58, 2  ;;  %v1020_v0 = vadd.f32 %v1019_v60, %v1018_v57 }
 0x160   : > { %v953_v1 = vadd.f32 %v952_v39, %v951_v58  ;;  %v1021_v2 = vrot.slane %v1020_v0, 2 }
 0x162   : > { %v1022_v6 = vadd.f32 %v1021_v2, %v1020_v0  ;;  %v954_v46 = vrot.slane %v953_v1, 1 }
 0x164   : > { %v1023_v8 = vrot.slane %v1022_v6, 1  ;;  %v955_v4 = vadd.f32 %v954_v46, %v953_v1 }
 0x166   : > { %v1024_v61 = vadd.f32 %v1023_v8, %v1022_v6 }
 0x168   : > { %v1029_v9 = vsel %vm1028_vm0, %v1024_v61, 0.0 }
 0x169   : > { %v1030_v10 = vsel %vm1027_vm1, %v955_v4, %v1029_v9 }
 0x16a   : > { %1031 = vst [vmem:[%s237_s9] sm:$0xff] %v1030_v10 }
 0x16b PF: > { %s14_s14 = sadd.s32 1, %s1450_s14   ;;  %s1724_s12 = smov %s1446_s13 }
 0x16c   : > { %p11_p6 = scmp.ge.s32.totalorder %s14_s14, 4   ;;  %s1725_s13 = smov %s1727_s15 }
 0x16e   :  { %13 = sbr.rel (!%p11_p6) target bundleno = 2 (0x2), region = 81 }

// kernel: global_generator_forward.39
= control target key start
LH: loop header
LB: loop body
LE: loop exit
PB: predicated region body
PF: predicated region fallthrough
CT: control target
= control target key end

     0   :  { %s630_s1 = inlined_call_operand.vmem [shape: bf16[128,128], index: 1, kind: input, shape index: {}]   ;;  %s631_s0 = inlined_call_operand.vmem [shape: bf16[128,128], index: 0, kind: input, shape index: {}]   ;;  %s632_s2 = inlined_call_operand.vmem [shape: f32[128,128], index: 2, kind: output, shape index: {0}]   ;;  %s633_s3 = inlined_call_operand.vmem [shape: f32[8,128], index: 3, kind: output, shape index: {1}]  }
   0x1   :  { %v495_v0 = vld [vmem:[%s630_s1] sm:$0xff]   ;;  %v496_v1 = vld [vmem:[%s630_s1 + $0x8] sm:$0xff]   ;;  %v497_v2 = vld [vmem:[%s630_s1 + $0x10] sm:$0xff]  }
   0x2   :  { %447 = vmatprep.subr.bf16.mxu0 %v495_v0  ;;  %479 = vmatprep.subr.bf16.mxu1 %v495_v0  ;;  %v498_v3 = vld [vmem:[%s630_s1 + $0x18] sm:$0xff]   ;;  %v503_v4 = vld [vmem:[%s631_s0] sm:$0xff]   ;;  %v500_v7 = vld [vmem:[%s630_s1 + $0x28] sm:$0xff]  }
   0x3   :  { %448 = vmatpush3.bf16.msra.mxu0 %v495_v0  ;;  %487 = vmatpush3.bf16.msra.mxu1 %v495_v0  ;;  %v499_v5 = vld [vmem:[%s630_s1 + $0x20] sm:$0xff]   ;;  %v501_v8 = vld [vmem:[%s630_s1 + $0x30] sm:$0xff]   ;;  %v502_v9 = vld [vmem:[%s630_s1 + $0x38] sm:$0xff]  }
   0x4   :  { %449 = vmatprep.subr.bf16.mxu0 %v496_v1  ;;  %480 = vmatprep.subr.bf16.mxu1 %v496_v1  ;;  %v507_v6 = vld [vmem:[%s631_s0 + $0x20] sm:$0xff]   ;;  %v504_v10 = vld [vmem:[%s631_s0 + $0x8] sm:$0xff]   ;;  %v505_v12 = vld [vmem:[%s631_s0 + $0x10] sm:$0xff]  }
   0x5   :  { %463 = vmatprep.mubr.bf16.mxu0 %v503_v4  ;;  %471 = vmatprep.mubr.bf16.mxu1 %v507_v6  ;;  %v508_v11 = vld [vmem:[%s631_s0 + $0x28] sm:$0xff]   ;;  %v509_v13 = vld [vmem:[%s631_s0 + $0x30] sm:$0xff]   ;;  %v506_v14 = vld [vmem:[%s631_s0 + $0x18] sm:$0xff]  }
   0x6   :  { %v510_v15 = vld [vmem:[%s631_s0 + $0x38] sm:$0xff]  }
   0x7   :  { %450 = vmatpush3.bf16.msra.mxu0 %v496_v1  ;;  %488 = vmatpush3.bf16.msra.mxu1 %v496_v1 }
   0x8   :  { %451 = vmatprep.subr.bf16.mxu0 %v497_v2  ;;  %481 = vmatprep.subr.bf16.mxu1 %v497_v2 }
   0xb   :  { %452 = vmatpush3.bf16.msra.mxu0 %v497_v2  ;;  %489 = vmatpush3.bf16.msra.mxu1 %v497_v2 }
   0xc   :  { %453 = vmatprep.subr.bf16.mxu0 %v498_v3  ;;  %482 = vmatprep.subr.bf16.mxu1 %v498_v3 }
   0xf   :  { %454 = vmatpush3.bf16.msra.mxu0 %v498_v3  ;;  %490 = vmatpush3.bf16.msra.mxu1 %v498_v3 }
  0x10   :  { %455 = vmatprep.subr.bf16.mxu0 %v499_v5  ;;  %483 = vmatprep.subr.bf16.mxu1 %v499_v5 }
  0x13   :  { %456 = vmatpush3.bf16.msra.mxu0 %v499_v5  ;;  %491 = vmatpush3.bf16.msra.mxu1 %v499_v5 }
  0x14   :  { %457 = vmatprep.subr.bf16.mxu0 %v500_v7  ;;  %484 = vmatprep.subr.bf16.mxu1 %v500_v7 }
  0x17   :  { %458 = vmatpush3.bf16.msra.mxu0 %v500_v7  ;;  %492 = vmatpush3.bf16.msra.mxu1 %v500_v7 }
  0x18   :  { %459 = vmatprep.subr.bf16.mxu0 %v501_v8  ;;  %485 = vmatprep.subr.bf16.mxu1 %v501_v8 }
  0x1b   :  { %460 = vmatpush3.bf16.msra.mxu0 %v501_v8  ;;  %493 = vmatpush3.bf16.msra.mxu1 %v501_v8 }
  0x1c   :  { %461 = vmatprep.subr.bf16.mxu0 %v502_v9  ;;  %486 = vmatprep.subr.bf16.mxu1 %v502_v9 }
  0x1f   :  { %462 = vmatpush3.bf16.msra.mxu0 %v502_v9  ;;  %494 = vmatpush3.bf16.msra.mxu1 %v502_v9 }
  0x22   :  { %464 = vmatmul.mubr.bf16.vlgmr.msra.gmra.mrb[0].mxu0 %v504_v10  ;;  %472 = vmatmul.mubr.bf16.vlgmr.msra.gmra.mrb[0].mxu1 %v508_v11 }
  0x23   :  { %467 = vmatprep.mubr.bf16.mxu0 %v505_v12  ;;  %475 = vmatprep.mubr.bf16.mxu1 %v509_v13 }
  0x2a   :  { %468 = vmatmul.mubr.bf16.gmra.mrb[4].mxu0 %v506_v14  ;;  %476 = vmatmul.mubr.bf16.gmra.mrb[4].mxu1 %v510_v15 }
  0xf5   :  { %v465_v16 = vpop.f32.mrb[0].mxu0  ;;  %v473_v17 = vpop.f32.mrb[0].mxu1 }
  0xf6   :  { %328 = vst [vmem:[%s632_s2 + $0x10] sm:$0xff] %v465_v16  ;;  %v212_v18 = vpop.f32.mrb[1].mxu0  ;;  %336 = vst [vmem:[%s632_s2 + $0x50] sm:$0xff] %v473_v17  ;;  %v244_v19 = vpop.f32.mrb[1].mxu1  ;;  %v365_v27 = vmul.f32 %v465_v16, %v465_v16  ;;  %v373_v59 = vmul.f32 %v473_v17, %v473_v17 }
  0xf7   :  { %326 = vst [vmem:[%s632_s2] sm:$0xff] %v212_v18  ;;  %v466_v20 = vpop.f32.mrb[2].mxu0  ;;  %334 = vst [vmem:[%s632_s2 + $0x40] sm:$0xff] %v244_v19  ;;  %v474_v21 = vpop.f32.mrb[2].mxu1  ;;  %v363_v24 = vmul.f32 %v212_v18, %v212_v18  ;;  %v371_v53 = vmul.f32 %v244_v19, %v244_v19 }
  0xf8   :  { %329 = vst [vmem:[%s632_s2 + $0x18] sm:$0xff] %v466_v20  ;;  %v215_v22 = vpop.f32.mrb[3].mxu0  ;;  %337 = vst [vmem:[%s632_s2 + $0x58] sm:$0xff] %v474_v21  ;;  %v247_v23 = vpop.f32.mrb[3].mxu1  ;;  %v366_v30 = vmul.f32 %v466_v20, %v466_v20  ;;  %v374_v62 = vmul.f32 %v474_v21, %v474_v21 }
  0xf9   :  { %327 = vst [vmem:[%s632_s2 + $0x8] sm:$0xff] %v215_v22  ;;  %v342_v25 = vadd.f32 %v215_v22, %v212_v18  ;;  %v364_v26 = vmul.f32 %v215_v22, %v215_v22  ;;  %335 = vst [vmem:[%s632_s2 + $0x48] sm:$0xff] %v247_v23  ;;  %v372_v58 = vmul.f32 %v247_v23, %v247_v23 }
  0xfb   :  { %v343_v28 = vadd.f32 %v465_v16, %v342_v25  ;;  %v379_v29 = vadd.f32 %v364_v26, %v363_v24 }
  0xfd   :  { %v380_v31 = vadd.f32 %v379_v29, %v365_v27  ;;  %v469_v32 = vpop.f32.mrb[4].mxu0  ;;  %v344_v33 = vadd.f32 %v466_v20, %v343_v28  ;;  %v477_v34 = vpop.f32.mrb[4].mxu1 }
  0xfe   :  { %332 = vst [vmem:[%s632_s2 + $0x30] sm:$0xff] %v469_v32  ;;  %v228_v35 = vpop.f32.mrb[5].mxu0  ;;  %340 = vst [vmem:[%s632_s2 + $0x70] sm:$0xff] %v477_v34  ;;  %v260_v36 = vpop.f32.mrb[5].mxu1  ;;  %v369_v47 = vmul.f32 %v469_v32, %v469_v32  ;;  %v377_v7 = vmul.f32 %v477_v34, %v477_v34 }
  0xff   :  { %330 = vst [vmem:[%s632_s2 + $0x20] sm:$0xff] %v228_v35  ;;  %v345_v37 = vadd.f32 %v344_v33, %v228_v35  ;;  %v367_v38 = vmul.f32 %v228_v35, %v228_v35  ;;  %v381_v39 = vadd.f32 %v380_v31, %v366_v30  ;;  %v470_v40 = vpop.f32.mrb[6].mxu0  ;;  %338 = vst [vmem:[%s632_s2 + $0x60] sm:$0xff] %v260_v36  ;;  %v478_v41 = vpop.f32.mrb[6].mxu1 }
 0x100   :  { %333 = vst [vmem:[%s632_s2 + $0x38] sm:$0xff] %v470_v40  ;;  %v231_v42 = vpop.f32.mrb[7].mxu0  ;;  %341 = vst [vmem:[%s632_s2 + $0x78] sm:$0xff] %v478_v41  ;;  %v263_v43 = vpop.f32.mrb[7].mxu1  ;;  %v370_v50 = vmul.f32 %v470_v40, %v470_v40  ;;  %v375_v1 = vmul.f32 %v260_v36, %v260_v36  ;;  %v378_v10 = vmul.f32 %v478_v41, %v478_v41 }
 0x101   :  { %v382_v44 = vadd.f32 %v381_v39, %v367_v38  ;;  %331 = vst [vmem:[%s632_s2 + $0x28] sm:$0xff] %v231_v42  ;;  %v346_v45 = vadd.f32 %v345_v37, %v231_v42  ;;  %v368_v46 = vmul.f32 %v231_v42, %v231_v42  ;;  %339 = vst [vmem:[%s632_s2 + $0x68] sm:$0xff] %v263_v43 }
 0x102   :  { %v376_v6 = vmul.f32 %v263_v43, %v263_v43 }
 0x103   :  { %v347_v48 = vadd.f32 %v469_v32, %v346_v45  ;;  %v383_v49 = vadd.f32 %v382_v44, %v368_v46 }
 0x105   :  { %v384_v51 = vadd.f32 %v383_v49, %v369_v47  ;;  %v348_v52 = vadd.f32 %v470_v40, %v347_v48 }
 0x107   :  { %v349_v54 = vadd.f32 %v348_v52, %v244_v19  ;;  %v385_v55 = vadd.f32 %v384_v51, %v370_v50 }
 0x109   :  { %v386_v56 = vadd.f32 %v385_v55, %v371_v53  ;;  %v350_v57 = vadd.f32 %v349_v54, %v247_v23 }
 0x10b   :  { %v351_v60 = vadd.f32 %v473_v17, %v350_v57  ;;  %v387_v61 = vadd.f32 %v386_v56, %v372_v58  ;;  %v400_v17 = vlaneseq }
 0x10d   :  { %v388_v63 = vadd.f32 %v387_v61, %v373_v59  ;;  %v352_v0 = vadd.f32 %v474_v21, %v351_v60  ;;  %v401_v22 = vshrl.u32 %v400_v17, 7 }
 0x10f   :  { %v353_v2 = vadd.f32 %v352_v0, %v260_v36  ;;  %v389_v3 = vadd.f32 %v388_v63, %v374_v62  ;;  %vm403_vm0 = vcmp.eq.s32.totalorder %v401_v22, 1  ;;  %vm402_vm1 = vcmp.eq.s32.totalorder %v401_v22, 0 }
 0x111   :  { %v390_v4 = vadd.f32 %v389_v3, %v375_v1  ;;  %v354_v5 = vadd.f32 %v353_v2, %v263_v43 }
 0x113   :  { %v355_v8 = vadd.f32 %v477_v34, %v354_v5  ;;  %v391_v9 = vadd.f32 %v390_v4, %v376_v6 }
 0x115   :  { %v356_v11 = vadd.f32 %v478_v41, %v355_v8  ;;  %v392_v12 = vadd.f32 %v391_v9, %v377_v7 }
 0x117   :  { %v357_v13 = vrot.slane %v356_v11, 4  ;;  %v393_v14 = vadd.f32 %v392_v12, %v378_v10 }
 0x119   :  { %v358_v15 = vadd.f32 %v357_v13, %v356_v11  ;;  %v394_v16 = vrot.slane %v393_v14, 4 }
 0x11b   :  { %v359_v18 = vrot.slane %v358_v15, 2  ;;  %v395_v19 = vadd.f32 %v394_v16, %v393_v14 }
 0x11d   :  { %v360_v20 = vadd.f32 %v359_v18, %v358_v15  ;;  %v396_v21 = vrot.slane %v395_v19, 2 }
 0x11f   :  { %v397_v23 = vadd.f32 %v396_v21, %v395_v19  ;;  %v361_v24 = vrot.slane %v360_v20, 1 }
 0x121   :  { %v398_v25 = vrot.slane %v397_v23, 1  ;;  %v362_v27 = vadd.f32 %v361_v24, %v360_v20 }
 0x123   :  { %v399_v26 = vadd.f32 %v398_v25, %v397_v23 }
 0x125   :  { %v404_v28 = vsel %vm403_vm0, %v399_v26, 0.0 }
 0x126   :  { %v405_v29 = vsel %vm402_vm1, %v362_v27, %v404_v28 }
 0x127   :  { %406 = vst [vmem:[%s633_s3] sm:$0xff] %v405_v29 }

// kernel: global_generator_forward.40
= control target key start
LH: loop header
LB: loop body
LE: loop exit
PB: predicated region body
PF: predicated region fallthrough
CT: control target
= control target key end

     0   :  { %s254_s0 = inlined_call_operand.vmem [shape: f32[128,128], index: 0, kind: input, shape index: {}]   ;;  %s255_s1 = inlined_call_operand.vmem [shape: f32[1,128], index: 1, kind: input, shape index: {}]   ;;  %s256_s2 = inlined_call_operand.vmem [shape: f32[1,128], index: 2, kind: input, shape index: {}]   ;;  %s257_s3 = inlined_call_operand.vmem [shape: f32[128,128], index: 3, kind: output, shape index: {}]  }
   0x1   :  { %v14_v0 = vld [vmem:[%s254_s0] sm:$0xff]  ;;  %v15_v4 = vld [vmem:[%s254_s0 + $0x8] sm:$0xff]  ;;  %v16_v5 = vld [vmem:[%s254_s0 + $0x10] sm:$0xff] }
   0x2   :  { %v112_v1 = vld [vmem:[%s255_s1] ss:$0 sm:$0xff]  ;;  %v17_v6 = vld [vmem:[%s254_s0 + $0x18] sm:$0xff]  ;;  %v19_v11 = vld [vmem:[%s254_s0 + $0x28] sm:$0xff] }
   0x3   :  { %v143_v2 = vld [vmem:[%s256_s2] ss:$0 sm:$0xff]  ;;  %v37_v3 = vmul.f32 %v112_v1, %v14_v0  ;;  %v38_v7 = vmul.f32 %v112_v1, %v15_v4  ;;  %v39_v8 = vmul.f32 %v112_v1, %v16_v5  ;;  %v40_v9 = vmul.f32 %v112_v1, %v17_v6  ;;  %v20_v12 = vld [vmem:[%s254_s0 + $0x30] sm:$0xff]  ;;  %v21_v17 = vld [vmem:[%s254_s0 + $0x38] sm:$0xff] }
   0x4   :  { %v18_v10 = vld [vmem:[%s254_s0 + $0x20] sm:$0xff]  ;;  %v42_v15 = vmul.f32 %v112_v1, %v19_v11  ;;  %v43_v16 = vmul.f32 %v112_v1, %v20_v12  ;;  %v44_v21 = vmul.f32 %v112_v1, %v21_v17  ;;  %v23_v27 = vld [vmem:[%s254_s0 + $0x48] sm:$0xff]  ;;  %v24_v28 = vld [vmem:[%s254_s0 + $0x50] sm:$0xff] }
   0x5   :  { %v60_v13 = vadd.f32 %v143_v2, %v37_v3  ;;  %v41_v14 = vmul.f32 %v112_v1, %v18_v10  ;;  %v61_v18 = vadd.f32 %v143_v2, %v38_v7  ;;  %v62_v19 = vadd.f32 %v143_v2, %v39_v8  ;;  %v22_v22 = vld [vmem:[%s254_s0 + $0x40] sm:$0xff]  ;;  %v25_v29 = vld [vmem:[%s254_s0 + $0x58] sm:$0xff]  ;;  %v27_v35 = vld [vmem:[%s254_s0 + $0x68] sm:$0xff] }
   0x6   :  { %v63_v20 = vadd.f32 %v143_v2, %v40_v9  ;;  %v65_v25 = vadd.f32 %v143_v2, %v42_v15  ;;  %v66_v26 = vadd.f32 %v143_v2, %v43_v16  ;;  %v67_v33 = vadd.f32 %v143_v2, %v44_v21  ;;  %v26_v34 = vld [vmem:[%s254_s0 + $0x60] sm:$0xff]  ;;  %v28_v36 = vld [vmem:[%s254_s0 + $0x70] sm:$0xff]  ;;  %v29_v41 = vld [vmem:[%s254_s0 + $0x78] sm:$0xff] }
   0x7   :  { %v76_v23 = vmax.f32 %v60_v13, 0.0  ;;  %v64_v24 = vadd.f32 %v143_v2, %v41_v14  ;;  %v77_v30 = vmax.f32 %v61_v18, 0.0  ;;  %v78_v31 = vmax.f32 %v62_v19, 0.0 }
   0x8   :  { %v79_v32 = vmax.f32 %v63_v20, 0.0  ;;  %v81_v38 = vmax.f32 %v65_v25, 0.0  ;;  %v82_v39 = vmax.f32 %v66_v26, 0.0  ;;  %v45_v40 = vmul.f32 %v112_v1, %v22_v22 }
   0x9   :  { %92 = vst [vmem:[%s257_s3] sm:$0xff] %v76_v23  ;;  %v80_v37 = vmax.f32 %v64_v24, 0.0  ;;  %93 = vst [vmem:[%s257_s3 + $0x8] sm:$0xff] %v77_v30  ;;  %v83_v42 = vmax.f32 %v67_v33, 0.0  ;;  %v46_v43 = vmul.f32 %v112_v1, %v23_v27  ;;  %v47_v44 = vmul.f32 %v112_v1, %v24_v28 }
   0xa   :  { %94 = vst [vmem:[%s257_s3 + $0x10] sm:$0xff] %v78_v31  ;;  %95 = vst [vmem:[%s257_s3 + $0x18] sm:$0xff] %v79_v32  ;;  %v48_v45 = vmul.f32 %v112_v1, %v25_v29  ;;  %v68_v46 = vadd.f32 %v143_v2, %v45_v40  ;;  %v49_v47 = vmul.f32 %v112_v1, %v26_v34 }
   0xb   :  { %96 = vst [vmem:[%s257_s3 + $0x20] sm:$0xff] %v80_v37  ;;  %97 = vst [vmem:[%s257_s3 + $0x28] sm:$0xff] %v81_v38  ;;  %v50_v48 = vmul.f32 %v112_v1, %v27_v35  ;;  %v51_v49 = vmul.f32 %v112_v1, %v28_v36  ;;  %v69_v50 = vadd.f32 %v143_v2, %v46_v43 }
   0xc   :  { %98 = vst [vmem:[%s257_s3 + $0x30] sm:$0xff] %v82_v39  ;;  %99 = vst [vmem:[%s257_s3 + $0x38] sm:$0xff] %v83_v42  ;;  %v70_v51 = vadd.f32 %v143_v2, %v47_v44  ;;  %v71_v52 = vadd.f32 %v143_v2, %v48_v45  ;;  %v52_v53 = vmul.f32 %v112_v1, %v29_v41  ;;  %v84_v54 = vmax.f32 %v68_v46, 0.0 }
   0xd   :  { %v72_v55 = vadd.f32 %v143_v2, %v49_v47  ;;  %v73_v56 = vadd.f32 %v143_v2, %v50_v48  ;;  %v74_v57 = vadd.f32 %v143_v2, %v51_v49  ;;  %v85_v58 = vmax.f32 %v69_v50, 0.0 }
   0xe   :  { %v86_v59 = vmax.f32 %v70_v51, 0.0  ;;  %v87_v60 = vmax.f32 %v71_v52, 0.0  ;;  %v75_v61 = vadd.f32 %v143_v2, %v52_v53  ;;  %100 = vst [vmem:[%s257_s3 + $0x40] sm:$0xff] %v84_v54 }
   0xf   :  { %v88_v62 = vmax.f32 %v72_v55, 0.0  ;;  %v89_v63 = vmax.f32 %v73_v56, 0.0  ;;  %v90_v0 = vmax.f32 %v74_v57, 0.0  ;;  %101 = vst [vmem:[%s257_s3 + $0x48] sm:$0xff] %v85_v58 }
  0x10   :  { %102 = vst [vmem:[%s257_s3 + $0x50] sm:$0xff] %v86_v59  ;;  %103 = vst [vmem:[%s257_s3 + $0x58] sm:$0xff] %v87_v60  ;;  %v91_v1 = vmax.f32 %v75_v61, 0.0 }
  0x11   :  { %104 = vst [vmem:[%s257_s3 + $0x60] sm:$0xff] %v88_v62  ;;  %105 = vst [vmem:[%s257_s3 + $0x68] sm:$0xff] %v89_v63 }
  0x12   :  { %106 = vst [vmem:[%s257_s3 + $0x70] sm:$0xff] %v90_v0  ;;  %107 = vst [vmem:[%s257_s3 + $0x78] sm:$0xff] %v91_v1 }

// kernel: global_generator_forward.42
= control target key start
LH: loop header
LB: loop body
LE: loop exit
PB: predicated region body
PF: predicated region fallthrough
CT: control target
= control target key end

     0   :  { %s104_s0 = inlined_call_operand.vmem [shape: f32[32,128], index: 0, kind: input, shape index: {}]   ;;  %s105_s1 = inlined_call_operand.vmem [shape: f32[1,128], index: 1, kind: input, shape index: {}]   ;;  %s106_s2 = inlined_call_operand.vmem [shape: f32[1,128], index: 2, kind: input, shape index: {}]   ;;  %s107_s3 = inlined_call_operand.vmem [shape: f32[32,128], index: 3, kind: output, shape index: {}]  }
   0x1   :  { %v14_v0 = vld [vmem:[%s104_s0] sm:$0xff]  ;;  %v15_v4 = vld [vmem:[%s104_s0 + $0x8] sm:$0xff]  ;;  %v16_v5 = vld [vmem:[%s104_s0 + $0x10] sm:$0xff] }
   0x2   :  { %v52_v1 = vld [vmem:[%s105_s1] ss:$0 sm:$0xff]  ;;  %v17_v6 = vld [vmem:[%s104_s0 + $0x18] sm:$0xff] }
   0x3   :  { %v53_v2 = vld [vmem:[%s106_s2] ss:$0 sm:$0xff]  ;;  %v25_v3 = vmul.f32 %v52_v1, %v14_v0  ;;  %v26_v7 = vmul.f32 %v52_v1, %v15_v4  ;;  %v27_v8 = vmul.f32 %v52_v1, %v16_v5  ;;  %v28_v9 = vmul.f32 %v52_v1, %v17_v6 }
   0x5   :  { %v36_v10 = vadd.f32 %v53_v2, %v25_v3  ;;  %v37_v11 = vadd.f32 %v53_v2, %v26_v7  ;;  %v38_v12 = vadd.f32 %v53_v2, %v27_v8  ;;  %v39_v13 = vadd.f32 %v53_v2, %v28_v9 }
   0x7   :  { %v40_v14 = vmax.f32 %v36_v10, 0.0  ;;  %v41_v15 = vmax.f32 %v37_v11, 0.0  ;;  %v42_v16 = vmax.f32 %v38_v12, 0.0  ;;  %v43_v17 = vmax.f32 %v39_v13, 0.0 }
   0x9   :  { %44 = vst [vmem:[%s107_s3] sm:$0xff] %v40_v14  ;;  %45 = vst [vmem:[%s107_s3 + $0x8] sm:$0xff] %v41_v15 }
   0xa   :  { %46 = vst [vmem:[%s107_s3 + $0x10] sm:$0xff] %v42_v16  ;;  %47 = vst [vmem:[%s107_s3 + $0x18] sm:$0xff] %v43_v17 }

// kernel: global_generator_forward.41
= control target key start
LH: loop header
LB: loop body
LE: loop exit
PB: predicated region body
PF: predicated region fallthrough
CT: control target
= control target key end

     0   :  { %v268_v45 = vlaneseq  ;;  %s464_s1 = inlined_call_operand.vmem [shape: bf16[256,128], index: 1, kind: input, shape index: {}]   ;;  %s465_s0 = inlined_call_operand.vmem [shape: bf16[32,256], index: 0, kind: input, shape index: {}]   ;;  %s466_s2 = inlined_call_operand.vmem [shape: f32[32,128], index: 2, kind: output, shape index: {0}]   ;;  %s467_s3 = inlined_call_operand.vmem [shape: f32[8,128], index: 3, kind: output, shape index: {1}]  }
   0x1   :  { %v347_v0 = vld [vmem:[%s464_s1 + $0x40] sm:$0xff]   ;;  %v349_v2 = vld [vmem:[%s464_s1 + $0x48] sm:$0xff]   ;;  %v351_v4 = vld [vmem:[%s464_s1 + $0x50] sm:$0xff]  }
   0x2   :  { %v348_v1 = vld [vmem:[%s464_s1] sm:$0xff]   ;;  %303 = vmatprep.subr.bf16.mxu0 %v347_v0  ;;  %331 = vmatprep.subr.bf16.mxu1 %v347_v0  ;;  %v350_v3 = vld [vmem:[%s464_s1 + $0x8] sm:$0xff]   ;;  %v352_v5 = vld [vmem:[%s464_s1 + $0x10] sm:$0xff]   ;;  %v269_v50 = vshrl.u32 %v268_v45, 7 }
   0x3   :  { %304 = vmatpush3.bf16.msra.mxu0 %v348_v1  ;;  %339 = vmatpush3.bf16.msra.mxu1 %v348_v1  ;;  %v353_v6 = vld [vmem:[%s464_s1 + $0x58] sm:$0xff]   ;;  %v355_v8 = vld [vmem:[%s464_s1 + $0x60] sm:$0xff]   ;;  %v357_v10 = vld [vmem:[%s464_s1 + $0x68] sm:$0xff]  }
   0x4   :  { %305 = vmatprep.subr.bf16.mxu0 %v349_v2  ;;  %332 = vmatprep.subr.bf16.mxu1 %v349_v2  ;;  %v354_v7 = vld [vmem:[%s464_s1 + $0x18] sm:$0xff]   ;;  %v356_v9 = vld [vmem:[%s464_s1 + $0x20] sm:$0xff]   ;;  %v358_v13 = vld [vmem:[%s464_s1 + $0x28] sm:$0xff]   ;;  %vm271_vm0 = vcmp.eq.s32.totalorder %v269_v50, 1  ;;  %vm270_vm1 = vcmp.eq.s32.totalorder %v269_v50, 0 }
   0x5   :  { %v365_v11 = vld [vmem:[%s465_s0 + $0x4] ss:$8 sps:$4 sm:$0xff]   ;;  %v368_v12 = vld [vmem:[%s465_s0 + $0x14] ss:$8 sps:$4 sm:$0xff]   ;;  %v363_v18 = vld [vmem:[%s465_s0] ss:$8 sps:$4 sm:$0xff]  }
   0x6   :  { %v359_v14 = vld [vmem:[%s464_s1 + $0x70] sm:$0xff]   ;;  %210 = vmatprep.mubr.bf16.mxu0 %v365_v11  ;;  %218 = vmatprep.mubr.bf16.mxu1 %v368_v12  ;;  %v361_v16 = vld [vmem:[%s464_s1 + $0x78] sm:$0xff]  }
   0x7   :  { %306 = vmatpush3.bf16.msra.mxu0 %v350_v3  ;;  %340 = vmatpush3.bf16.msra.mxu1 %v350_v3  ;;  %v360_v15 = vld [vmem:[%s464_s1 + $0x30] sm:$0xff]   ;;  %v362_v17 = vld [vmem:[%s464_s1 + $0x38] sm:$0xff]  }
   0x8   :  { %307 = vmatprep.subr.bf16.mxu0 %v351_v4  ;;  %333 = vmatprep.subr.bf16.mxu1 %v351_v4  ;;  %v366_v19 = vld [vmem:[%s465_s0 + $0x10] ss:$8 sps:$4 sm:$0xff]  }
   0xb   :  { %308 = vmatpush3.bf16.msra.mxu0 %v352_v5  ;;  %341 = vmatpush3.bf16.msra.mxu1 %v352_v5 }
   0xc   :  { %309 = vmatprep.subr.bf16.mxu0 %v353_v6  ;;  %334 = vmatprep.subr.bf16.mxu1 %v353_v6 }
   0xf   :  { %310 = vmatpush3.bf16.msra.mxu0 %v354_v7  ;;  %342 = vmatpush3.bf16.msra.mxu1 %v354_v7 }
  0x10   :  { %311 = vmatprep.subr.bf16.mxu0 %v355_v8  ;;  %335 = vmatprep.subr.bf16.mxu1 %v355_v8 }
  0x13   :  { %312 = vmatpush3.bf16.msra.mxu0 %v356_v9  ;;  %343 = vmatpush3.bf16.msra.mxu1 %v356_v9 }
  0x14   :  { %313 = vmatprep.subr.bf16.mxu0 %v357_v10  ;;  %336 = vmatprep.subr.bf16.mxu1 %v357_v10 }
  0x17   :  { %314 = vmatpush3.bf16.msra.mxu0 %v358_v13  ;;  %344 = vmatpush3.bf16.msra.mxu1 %v358_v13 }
  0x18   :  { %315 = vmatprep.subr.bf16.mxu0 %v359_v14  ;;  %337 = vmatprep.subr.bf16.mxu1 %v359_v14 }
  0x1b   :  { %316 = vmatpush3.bf16.msra.mxu0 %v360_v15  ;;  %345 = vmatpush3.bf16.msra.mxu1 %v360_v15 }
  0x1c   :  { %317 = vmatprep.subr.bf16.mxu0 %v361_v16  ;;  %338 = vmatprep.subr.bf16.mxu1 %v361_v16 }
  0x1f   :  { %318 = vmatpush3.bf16.msra.mxu0 %v362_v17  ;;  %346 = vmatpush3.bf16.msra.mxu1 %v362_v17 }
  0x22   :  { %211 = vmatmul.mubr.bf16.vlgmr.msra.gmra.mrb[0].mxu0 %v363_v18  ;;  %219 = vmatmul.mubr.bf16.vlgmr.msra.gmra.mrb[0].mxu1 %v366_v19 }
  0xf5   :  { %v319_v20 = vpop.f32.mrb[0].mxu0  ;;  %v325_v21 = vpop.f32.mrb[0].mxu1 }
  0xf6   :  { %v320_v22 = vpop.f32.mrb[1].mxu0  ;;  %v326_v23 = vpop.f32.mrb[1].mxu1 }
  0xf7   :  { %v321_v24 = vadd.f32 %v320_v22, %v319_v20  ;;  %v322_v25 = vpop.f32.mrb[2].mxu0  ;;  %v327_v26 = vadd.f32 %v326_v23, %v325_v21  ;;  %v328_v27 = vpop.f32.mrb[2].mxu1 }
  0xf8   :  { %v323_v28 = vpop.f32.mrb[3].mxu0  ;;  %v329_v29 = vpop.f32.mrb[3].mxu1 }
  0xf9   :  { %242 = vst [vmem:[%s466_s2] sm:$0xff] %v321_v24  ;;  %244 = vst [vmem:[%s466_s2 + $0x10] sm:$0xff] %v327_v26  ;;  %v324_v30 = vadd.f32 %v323_v28, %v322_v25  ;;  %v330_v31 = vadd.f32 %v329_v29, %v328_v27  ;;  %v255_v32 = vmul.f32 %v321_v24, %v321_v24 }
  0xfa   :  { %v257_v33 = vmul.f32 %v327_v26, %v327_v26 }
  0xfb   :  { %243 = vst [vmem:[%s466_s2 + $0x8] sm:$0xff] %v324_v30  ;;  %v246_v34 = vadd.f32 %v324_v30, %v321_v24  ;;  %v256_v35 = vmul.f32 %v324_v30, %v324_v30  ;;  %245 = vst [vmem:[%s466_s2 + $0x18] sm:$0xff] %v330_v31  ;;  %v258_v39 = vmul.f32 %v330_v31, %v330_v31 }
  0xfd   :  { %v259_v36 = vadd.f32 %v256_v35, %v255_v32  ;;  %v247_v37 = vadd.f32 %v327_v26, %v246_v34 }
  0xff   :  { %v248_v38 = vadd.f32 %v330_v31, %v247_v37  ;;  %v260_v40 = vadd.f32 %v259_v36, %v257_v33 }
 0x101   :  { %v249_v41 = vrot.slane %v248_v38, 4  ;;  %v261_v42 = vadd.f32 %v260_v40, %v258_v39 }
 0x103   :  { %v250_v43 = vadd.f32 %v249_v41, %v248_v38  ;;  %v262_v44 = vrot.slane %v261_v42, 4 }
 0x105   :  { %v251_v46 = vrot.slane %v250_v43, 2  ;;  %v263_v47 = vadd.f32 %v262_v44, %v261_v42 }
 0x107   :  { %v252_v48 = vadd.f32 %v251_v46, %v250_v43  ;;  %v264_v49 = vrot.slane %v263_v47, 2 }
 0x109   :  { %v265_v51 = vadd.f32 %v264_v49, %v263_v47  ;;  %v253_v52 = vrot.slane %v252_v48, 1 }
 0x10b   :  { %v266_v53 = vrot.slane %v265_v51, 1  ;;  %v254_v55 = vadd.f32 %v253_v52, %v252_v48 }
 0x10d   :  { %v267_v54 = vadd.f32 %v266_v53, %v265_v51 }
 0x10f   :  { %v272_v56 = vsel %vm271_vm0, %v267_v54, 0.0 }
 0x110   :  { %v273_v57 = vsel %vm270_vm1, %v254_v55, %v272_v56 }
 0x111   :  { %274 = vst [vmem:[%s467_s3] sm:$0xff] %v273_v57 }

// kernel: global_generator_forward.46
= control target key start
LH: loop header
LB: loop body
LE: loop exit
PB: predicated region body
PF: predicated region fallthrough
CT: control target
= control target key end

     0   :  { %s128_s0 = inlined_call_operand.vmem [shape: f32[32,128], index: 0, kind: input, shape index: {}]   ;;  %s129_s1 = inlined_call_operand.vmem [shape: f32[1,128], index: 1, kind: input, shape index: {}]   ;;  %s130_s2 = inlined_call_operand.vmem [shape: f32[1,128], index: 2, kind: input, shape index: {}]   ;;  %s131_s3 = inlined_call_operand.vmem [shape: f32[32,128], index: 3, kind: input, shape index: {}]   ;;  %s132_s4 = inlined_call_operand.vmem [shape: f32[32,128], index: 4, kind: output, shape index: {}]  }
   0x1   :  { %v17_v0 = vld [vmem:[%s128_s0] sm:$0xff]  ;;  %v18_v4 = vld [vmem:[%s128_s0 + $0x8] sm:$0xff]  ;;  %v19_v7 = vld [vmem:[%s128_s0 + $0x10] sm:$0xff] }
   0x2   :  { %v59_v1 = vld [vmem:[%s129_s1] ss:$0 sm:$0xff]  ;;  %v20_v8 = vld [vmem:[%s128_s0 + $0x18] sm:$0xff]  ;;  %v44_v10 = vld [vmem:[%s131_s3 + $0x8] sm:$0xff] }
   0x3   :  { %v60_v2 = vld [vmem:[%s130_s2] ss:$0 sm:$0xff]  ;;  %v28_v3 = vmul.f32 %v59_v1, %v17_v0  ;;  %v29_v6 = vmul.f32 %v59_v1, %v18_v4  ;;  %v30_v11 = vmul.f32 %v59_v1, %v19_v7  ;;  %v31_v12 = vmul.f32 %v59_v1, %v20_v8  ;;  %v45_v14 = vld [vmem:[%s131_s3 + $0x10] sm:$0xff]  ;;  %v46_v15 = vld [vmem:[%s131_s3 + $0x18] sm:$0xff] }
   0x4   :  { %v43_v5 = vld [vmem:[%s131_s3] sm:$0xff] }
   0x5   :  { %v39_v9 = vadd.f32 %v60_v2, %v28_v3  ;;  %v40_v13 = vadd.f32 %v60_v2, %v29_v6  ;;  %v41_v17 = vadd.f32 %v60_v2, %v30_v11  ;;  %v42_v18 = vadd.f32 %v60_v2, %v31_v12 }
   0x7   :  { %v47_v16 = vadd.f32 %v43_v5, %v39_v9  ;;  %v48_v19 = vadd.f32 %v44_v10, %v40_v13  ;;  %v49_v20 = vadd.f32 %v45_v14, %v41_v17  ;;  %v50_v21 = vadd.f32 %v46_v15, %v42_v18 }
   0x9   :  { %51 = vst [vmem:[%s132_s4] sm:$0xff] %v47_v16  ;;  %52 = vst [vmem:[%s132_s4 + $0x8] sm:$0xff] %v48_v19 }
   0xa   :  { %53 = vst [vmem:[%s132_s4 + $0x10] sm:$0xff] %v49_v20  ;;  %54 = vst [vmem:[%s132_s4 + $0x18] sm:$0xff] %v50_v21 }

// kernel: global_generator_forward.43
= control target key start
LH: loop header
LB: loop body
LE: loop exit
PB: predicated region body
PF: predicated region fallthrough
CT: control target
= control target key end

     0   :  { %v397_v63 = vlaneseq  ;;  %s657_s1 = inlined_call_operand.vmem [shape: bf16[384,128], index: 1, kind: input, shape index: {}]   ;;  %s658_s0 = inlined_call_operand.vmem [shape: bf16[32,384], index: 0, kind: input, shape index: {}]   ;;  %s659_s2 = inlined_call_operand.vmem [shape: f32[32,128], index: 2, kind: output, shape index: {0}]   ;;  %s660_s3 = inlined_call_operand.vmem [shape: f32[8,128], index: 3, kind: output, shape index: {1}]  }
   0x1   :  { %v500_v0 = vld [vmem:[%s657_s1 + $0x40] sm:$0xff]   ;;  %v503_v3 = vld [vmem:[%s657_s1 + $0x48] sm:$0xff]   ;;  %v506_v6 = vld [vmem:[%s657_s1 + $0x50] sm:$0xff]  }
   0x2   :  { %v501_v1 = vld [vmem:[%s657_s1] sm:$0xff]   ;;  %442 = vmatprep.subr.bf16.mxu0 %v500_v0  ;;  %v504_v4 = vld [vmem:[%s657_s1 + $0x8] sm:$0xff]   ;;  %v507_v7 = vld [vmem:[%s657_s1 + $0x10] sm:$0xff]  }
   0x3   :  { %v502_v2 = vld [vmem:[%s657_s1 + $0x80] sm:$0xff]   ;;  %443 = vmatpush3.bf16.msra.mxu0 %v501_v1  ;;  %v505_v5 = vld [vmem:[%s657_s1 + $0x88] sm:$0xff]   ;;  %v508_v8 = vld [vmem:[%s657_s1 + $0x90] sm:$0xff]  }
   0x4   :  { %480 = vmatprep.subr.bf16.mxu1 %v502_v2  ;;  %444 = vmatprep.subr.bf16.mxu0 %v503_v3  ;;  %v509_v9 = vld [vmem:[%s657_s1 + $0x58] sm:$0xff]   ;;  %v512_v12 = vld [vmem:[%s657_s1 + $0x60] sm:$0xff]   ;;  %v515_v15 = vld [vmem:[%s657_s1 + $0x68] sm:$0xff]  }
   0x5   :  { %481 = vmatpush3.bf16.msra.mxu1 %v502_v2  ;;  %v510_v10 = vld [vmem:[%s657_s1 + $0x18] sm:$0xff]   ;;  %v514_v13 = vld [vmem:[%s657_s1 + $0xa0] sm:$0xff]   ;;  %v517_v16 = vld [vmem:[%s657_s1 + $0xa8] sm:$0xff]  }
   0x6   :  { %482 = vmatprep.subr.bf16.mxu1 %v505_v5  ;;  %v511_v11 = vld [vmem:[%s657_s1 + $0x98] sm:$0xff]   ;;  %v513_v14 = vld [vmem:[%s657_s1 + $0x20] sm:$0xff]   ;;  %v516_v17 = vld [vmem:[%s657_s1 + $0x28] sm:$0xff]  }
   0x7   :  { %445 = vmatpush3.bf16.msra.mxu0 %v504_v4  ;;  %v518_v18 = vld [vmem:[%s657_s1 + $0x70] sm:$0xff]   ;;  %v521_v21 = vld [vmem:[%s657_s1 + $0x78] sm:$0xff]   ;;  %v524_v26 = vld [vmem:[%s658_s0] ss:$12 sps:$4 sm:$0xff]   ;;  %v398_v4 = vshrl.u32 %v397_v63, 7 }
   0x8   :  { %446 = vmatprep.subr.bf16.mxu0 %v506_v6  ;;  %v519_v19 = vld [vmem:[%s657_s1 + $0x30] sm:$0xff]   ;;  %v523_v22 = vld [vmem:[%s657_s1 + $0xb8] sm:$0xff]   ;;  %v528_v28 = vld [vmem:[%s658_s0 + $0x20] ss:$12 sps:$4 sm:$0xff]  }
   0x9   :  { %483 = vmatpush3.bf16.msra.mxu1 %v505_v5  ;;  %v520_v20 = vld [vmem:[%s657_s1 + $0xb0] sm:$0xff]   ;;  %v522_v25 = vld [vmem:[%s657_s1 + $0x38] sm:$0xff]   ;;  %vm400_vm0 = vcmp.eq.s32.totalorder %v398_v4, 1  ;;  %vm399_vm1 = vcmp.eq.s32.totalorder %v398_v4, 0 }
   0xa   :  { %484 = vmatprep.subr.bf16.mxu1 %v508_v8  ;;  %v526_v23 = vld [vmem:[%s658_s0 + $0x4] ss:$12 sps:$4 sm:$0xff]   ;;  %v527_v24 = vld [vmem:[%s658_s0 + $0x8] ss:$12 sps:$4 sm:$0xff]  }
   0xb   :  { %447 = vmatpush3.bf16.msra.mxu0 %v507_v7  ;;  %290 = vmatprep.mubr.bf16.mxu0 %v526_v23  ;;  %v529_v27 = vld [vmem:[%s658_s0 + $0x1c] ss:$12 sps:$4 sm:$0xff]   ;;  %v531_v29 = vld [vmem:[%s658_s0 + $0x18] ss:$12 sps:$4 sm:$0xff]  }
   0xc   :  { %448 = vmatprep.subr.bf16.mxu0 %v509_v9  ;;  %496 = vmatprep.mubr.bf16.mxu1 %v527_v24 }
   0xd   :  { %485 = vmatpush3.bf16.msra.mxu1 %v508_v8 }
   0xe   :  { %486 = vmatprep.subr.bf16.mxu1 %v511_v11 }
   0xf   :  { %449 = vmatpush3.bf16.msra.mxu0 %v510_v10 }
  0x10   :  { %450 = vmatprep.subr.bf16.mxu0 %v512_v12 }
  0x11   :  { %487 = vmatpush3.bf16.msra.mxu1 %v511_v11 }
  0x12   :  { %488 = vmatprep.subr.bf16.mxu1 %v514_v13 }
  0x13   :  { %451 = vmatpush3.bf16.msra.mxu0 %v513_v14 }
  0x14   :  { %452 = vmatprep.subr.bf16.mxu0 %v515_v15 }
  0x15   :  { %489 = vmatpush3.bf16.msra.mxu1 %v514_v13 }
  0x16   :  { %490 = vmatprep.subr.bf16.mxu1 %v517_v16 }
  0x17   :  { %453 = vmatpush3.bf16.msra.mxu0 %v516_v17 }
  0x18   :  { %454 = vmatprep.subr.bf16.mxu0 %v518_v18 }
  0x19   :  { %491 = vmatpush3.bf16.msra.mxu1 %v517_v16 }
  0x1a   :  { %492 = vmatprep.subr.bf16.mxu1 %v520_v20 }
  0x1b   :  { %455 = vmatpush3.bf16.msra.mxu0 %v519_v19 }
  0x1c   :  { %456 = vmatprep.subr.bf16.mxu0 %v521_v21 }
  0x1d   :  { %493 = vmatpush3.bf16.msra.mxu1 %v520_v20 }
  0x1e   :  { %494 = vmatprep.subr.bf16.mxu1 %v523_v22 }
  0x1f   :  { %457 = vmatpush3.bf16.msra.mxu0 %v522_v25 }
  0x21   :  { %495 = vmatpush3.bf16.msra.mxu1 %v523_v22 }
  0x22   :  { %291 = vmatmul.mubr.bf16.vlgmr.msra.gmra.mrb[0].mxu0 %v524_v26 }
  0x23   :  { %298 = vmatprep.mubr.bf16.mxu0 %v529_v27 }
  0x24   :  { %497 = vmatmul.mubr.bf16.vlgmr.msra.gmra.mrb[0].mxu1 %v528_v28 }
  0x2a   :  { %299 = vmatmul.mubr.bf16.gmra.mrb[4].mxu0 %v531_v29 }
  0xf5   :  { %v458_v30 = vpop.f32.mrb[0].mxu0 }
  0xf6   :  { %v459_v31 = vpop.f32.mrb[1].mxu0 }
  0xf7   :  { %v460_v32 = vadd.f32 %v459_v31, %v458_v30  ;;  %v461_v33 = vpop.f32.mrb[2].mxu0  ;;  %v498_v34 = vpop.f32.mrb[0].mxu1 }
  0xf8   :  { %v462_v35 = vpop.f32.mrb[3].mxu0  ;;  %v341_v36 = vpop.f32.mrb[1].mxu1 }
  0xf9   :  { %v463_v37 = vadd.f32 %v462_v35, %v461_v33  ;;  %v342_v38 = vadd.f32 %v460_v32, %v341_v36  ;;  %v499_v39 = vpop.f32.mrb[2].mxu1 }
  0xfa   :  { %v344_v40 = vpop.f32.mrb[3].mxu1 }
  0xfb   :  { %371 = vst [vmem:[%s659_s2] sm:$0xff] %v342_v38  ;;  %v345_v41 = vadd.f32 %v463_v37, %v344_v40  ;;  %v384_v42 = vmul.f32 %v342_v38, %v342_v38 }
  0xfd   :  { %372 = vst [vmem:[%s659_s2 + $0x8] sm:$0xff] %v345_v41  ;;  %v375_v43 = vadd.f32 %v345_v41, %v342_v38  ;;  %v385_v44 = vmul.f32 %v345_v41, %v345_v41  ;;  %v464_v45 = vpop.f32.mrb[4].mxu0 }
  0xfe   :  { %v465_v46 = vpop.f32.mrb[5].mxu0 }
  0xff   :  { %v388_v47 = vadd.f32 %v385_v44, %v384_v42  ;;  %v466_v48 = vadd.f32 %v465_v46, %v464_v45  ;;  %v467_v49 = vpop.f32.mrb[6].mxu0 }
 0x100   :  { %v468_v50 = vpop.f32.mrb[7].mxu0 }
 0x101   :  { %v350_v51 = vadd.f32 %v498_v34, %v466_v48  ;;  %v469_v52 = vadd.f32 %v468_v50, %v467_v49 }
 0x103   :  { %373 = vst [vmem:[%s659_s2 + $0x10] sm:$0xff] %v350_v51  ;;  %v376_v53 = vadd.f32 %v375_v43, %v350_v51  ;;  %v386_v54 = vmul.f32 %v350_v51, %v350_v51  ;;  %v353_v55 = vadd.f32 %v499_v39, %v469_v52 }
 0x105   :  { %v389_v56 = vadd.f32 %v388_v47, %v386_v54  ;;  %374 = vst [vmem:[%s659_s2 + $0x18] sm:$0xff] %v353_v55  ;;  %v377_v57 = vadd.f32 %v376_v53, %v353_v55  ;;  %v387_v58 = vmul.f32 %v353_v55, %v353_v55 }
 0x107   :  { %v378_v59 = vrot.slane %v377_v57, 4  ;;  %v390_v60 = vadd.f32 %v389_v56, %v387_v58 }
 0x109   :  { %v379_v61 = vadd.f32 %v378_v59, %v377_v57  ;;  %v391_v62 = vrot.slane %v390_v60, 4 }
 0x10b   :  { %v380_v0 = vrot.slane %v379_v61, 2  ;;  %v392_v1 = vadd.f32 %v391_v62, %v390_v60 }
 0x10d   :  { %v381_v2 = vadd.f32 %v380_v0, %v379_v61  ;;  %v393_v3 = vrot.slane %v392_v1, 2 }
 0x10f   :  { %v394_v5 = vadd.f32 %v393_v3, %v392_v1  ;;  %v382_v6 = vrot.slane %v381_v2, 1 }
 0x111   :  { %v395_v7 = vrot.slane %v394_v5, 1  ;;  %v383_v9 = vadd.f32 %v382_v6, %v381_v2 }
 0x113   :  { %v396_v8 = vadd.f32 %v395_v7, %v394_v5 }
 0x115   :  { %v401_v10 = vsel %vm400_vm0, %v396_v8, 0.0 }
 0x116   :  { %v402_v11 = vsel %vm399_vm1, %v383_v9, %v401_v10 }
 0x117   :  { %403 = vst [vmem:[%s660_s3] sm:$0xff] %v402_v11 }

// kernel: global_generator_forward.47
= control target key start
LH: loop header
LB: loop body
LE: loop exit
PB: predicated region body
PF: predicated region fallthrough
CT: control target
= control target key end

     0   :  { %s306_s1 = inlined_call_operand.vmem [shape: bf16[128,128], index: 1, kind: input, shape index: {}]   ;;  %s307_s0 = inlined_call_operand.vmem [shape: bf16[32,128], index: 0, kind: input, shape index: {}]   ;;  %s308_s2 = inlined_call_operand.vmem [shape: f32[1,128], index: 2, kind: input, shape index: {}]   ;;  %s309_s3 = inlined_call_operand.vmem [shape: f32[32,128], index: 3, kind: output, shape index: {}]  }
   0x1   :  { %v231_v0 = vld [vmem:[%s306_s1] sm:$0xff]   ;;  %v232_v1 = vld [vmem:[%s306_s1 + $0x8] sm:$0xff]   ;;  %v233_v2 = vld [vmem:[%s306_s1 + $0x10] sm:$0xff]  }
   0x2   :  { %211 = vmatprep.subr.bf16.mxu0 %v231_v0  ;;  %v234_v3 = vld [vmem:[%s306_s1 + $0x18] sm:$0xff]   ;;  %v239_v4 = vld [vmem:[%s307_s0] sm:$0xff]   ;;  %v236_v6 = vld [vmem:[%s306_s1 + $0x28] sm:$0xff]  }
   0x3   :  { %212 = vmatpush3.bf16.msra.mxu0 %v231_v0  ;;  %227 = vmatprep.mubr.bf16.mxu0 %v239_v4  ;;  %v235_v5 = vld [vmem:[%s306_s1 + $0x20] sm:$0xff]   ;;  %v237_v7 = vld [vmem:[%s306_s1 + $0x30] sm:$0xff]   ;;  %v238_v8 = vld [vmem:[%s306_s1 + $0x38] sm:$0xff]  }
   0x4   :  { %213 = vmatprep.subr.bf16.mxu0 %v232_v1  ;;  %v240_v9 = vld [vmem:[%s307_s0 + $0x8] sm:$0xff]   ;;  %v200_v10 = vld [vmem:[%s308_s2] ss:$0 sm:$0xff] }
   0x7   :  { %214 = vmatpush3.bf16.msra.mxu0 %v232_v1 }
   0x8   :  { %215 = vmatprep.subr.bf16.mxu0 %v233_v2 }
   0xb   :  { %216 = vmatpush3.bf16.msra.mxu0 %v233_v2 }
   0xc   :  { %217 = vmatprep.subr.bf16.mxu0 %v234_v3 }
   0xf   :  { %218 = vmatpush3.bf16.msra.mxu0 %v234_v3 }
  0x10   :  { %219 = vmatprep.subr.bf16.mxu0 %v235_v5 }
  0x13   :  { %220 = vmatpush3.bf16.msra.mxu0 %v235_v5 }
  0x14   :  { %221 = vmatprep.subr.bf16.mxu0 %v236_v6 }
  0x17   :  { %222 = vmatpush3.bf16.msra.mxu0 %v236_v6 }
  0x18   :  { %223 = vmatprep.subr.bf16.mxu0 %v237_v7 }
  0x1b   :  { %224 = vmatpush3.bf16.msra.mxu0 %v237_v7 }
  0x1c   :  { %225 = vmatprep.subr.bf16.mxu0 %v238_v8 }
  0x1f   :  { %226 = vmatpush3.bf16.msra.mxu0 %v238_v8 }
  0x22   :  { %228 = vmatmul.mubr.bf16.vlgmr.msra.gmra.mrb[0].mxu0 %v240_v9 }
  0xf5   :  { %v229_v11 = vpop.f32.mrb[0].mxu0 }
  0xf6   :  { %v180_v12 = vadd.f32 %v229_v11, %v200_v10  ;;  %v141_v13 = vpop.f32.mrb[1].mxu0 }
  0xf7   :  { %v178_v14 = vadd.f32 %v200_v10, %v141_v13  ;;  %v230_v15 = vpop.f32.mrb[2].mxu0 }
  0xf8   :  { %184 = vst [vmem:[%s309_s3 + $0x10] sm:$0xff] %v180_v12  ;;  %v181_v16 = vadd.f32 %v230_v15, %v200_v10  ;;  %v144_v17 = vpop.f32.mrb[3].mxu0 }
  0xf9   :  { %182 = vst [vmem:[%s309_s3] sm:$0xff] %v178_v14  ;;  %v179_v18 = vadd.f32 %v200_v10, %v144_v17 }
  0xfa   :  { %185 = vst [vmem:[%s309_s3 + $0x18] sm:$0xff] %v181_v16 }
  0xfb   :  { %183 = vst [vmem:[%s309_s3 + $0x8] sm:$0xff] %v179_v18 }

// kernel: global_generator_forward.58
= control target key start
LH: loop header
LB: loop body
LE: loop exit
PB: predicated region body
PF: predicated region fallthrough
CT: control target
= control target key end

     0   :  { %v196_v27 = vlaneseq  ;;  %s326_s1 = inlined_call_operand.vmem [shape: bf16[128,128], index: 1, kind: input, shape index: {}]   ;;  %s327_s0 = inlined_call_operand.vmem [shape: bf16[32,128], index: 0, kind: input, shape index: {}]   ;;  %s328_s2 = inlined_call_operand.vmem [shape: f32[32,128], index: 2, kind: output, shape index: {0}]   ;;  %s329_s3 = inlined_call_operand.vmem [shape: f32[8,128], index: 3, kind: output, shape index: {1}]  }
   0x1   :  { %v251_v0 = vld [vmem:[%s326_s1] sm:$0xff]   ;;  %v252_v1 = vld [vmem:[%s326_s1 + $0x8] sm:$0xff]   ;;  %v253_v2 = vld [vmem:[%s326_s1 + $0x10] sm:$0xff]  }
   0x2   :  { %231 = vmatprep.subr.bf16.mxu0 %v251_v0  ;;  %v254_v3 = vld [vmem:[%s326_s1 + $0x18] sm:$0xff]   ;;  %v259_v4 = vld [vmem:[%s327_s0] sm:$0xff]   ;;  %v256_v6 = vld [vmem:[%s326_s1 + $0x28] sm:$0xff]   ;;  %v197_v32 = vshrl.u32 %v196_v27, 7 }
   0x3   :  { %232 = vmatpush3.bf16.msra.mxu0 %v251_v0  ;;  %247 = vmatprep.mubr.bf16.mxu0 %v259_v4  ;;  %v255_v5 = vld [vmem:[%s326_s1 + $0x20] sm:$0xff]   ;;  %v257_v7 = vld [vmem:[%s326_s1 + $0x30] sm:$0xff]   ;;  %v258_v8 = vld [vmem:[%s326_s1 + $0x38] sm:$0xff]  }
   0x4   :  { %233 = vmatprep.subr.bf16.mxu0 %v252_v1  ;;  %v260_v9 = vld [vmem:[%s327_s0 + $0x8] sm:$0xff]   ;;  %vm199_vm0 = vcmp.eq.s32.totalorder %v197_v32, 1  ;;  %vm198_vm1 = vcmp.eq.s32.totalorder %v197_v32, 0 }
   0x7   :  { %234 = vmatpush3.bf16.msra.mxu0 %v252_v1 }
   0x8   :  { %235 = vmatprep.subr.bf16.mxu0 %v253_v2 }
   0xb   :  { %236 = vmatpush3.bf16.msra.mxu0 %v253_v2 }
   0xc   :  { %237 = vmatprep.subr.bf16.mxu0 %v254_v3 }
   0xf   :  { %238 = vmatpush3.bf16.msra.mxu0 %v254_v3 }
  0x10   :  { %239 = vmatprep.subr.bf16.mxu0 %v255_v5 }
  0x13   :  { %240 = vmatpush3.bf16.msra.mxu0 %v255_v5 }
  0x14   :  { %241 = vmatprep.subr.bf16.mxu0 %v256_v6 }
  0x17   :  { %242 = vmatpush3.bf16.msra.mxu0 %v256_v6 }
  0x18   :  { %243 = vmatprep.subr.bf16.mxu0 %v257_v7 }
  0x1b   :  { %244 = vmatpush3.bf16.msra.mxu0 %v257_v7 }
  0x1c   :  { %245 = vmatprep.subr.bf16.mxu0 %v258_v8 }
  0x1f   :  { %246 = vmatpush3.bf16.msra.mxu0 %v258_v8 }
  0x22   :  { %248 = vmatmul.mubr.bf16.vlgmr.msra.gmra.mrb[0].mxu0 %v260_v9 }
  0xf5   :  { %v249_v10 = vpop.f32.mrb[0].mxu0 }
  0xf6   :  { %172 = vst [vmem:[%s328_s2 + $0x10] sm:$0xff] %v249_v10  ;;  %v140_v11 = vpop.f32.mrb[1].mxu0  ;;  %v185_v17 = vmul.f32 %v249_v10, %v249_v10 }
  0xf7   :  { %170 = vst [vmem:[%s328_s2] sm:$0xff] %v140_v11  ;;  %v250_v12 = vpop.f32.mrb[2].mxu0  ;;  %v183_v14 = vmul.f32 %v140_v11, %v140_v11 }
  0xf8   :  { %173 = vst [vmem:[%s328_s2 + $0x18] sm:$0xff] %v250_v12  ;;  %v143_v13 = vpop.f32.mrb[3].mxu0  ;;  %v186_v20 = vmul.f32 %v250_v12, %v250_v12 }
  0xf9   :  { %171 = vst [vmem:[%s328_s2 + $0x8] sm:$0xff] %v143_v13  ;;  %v174_v15 = vadd.f32 %v143_v13, %v140_v11  ;;  %v184_v16 = vmul.f32 %v143_v13, %v143_v13 }
  0xfb   :  { %v175_v18 = vadd.f32 %v249_v10, %v174_v15  ;;  %v187_v19 = vadd.f32 %v184_v16, %v183_v14 }
  0xfd   :  { %v176_v21 = vadd.f32 %v250_v12, %v175_v18  ;;  %v188_v22 = vadd.f32 %v187_v19, %v185_v17 }
  0xff   :  { %v177_v23 = vrot.slane %v176_v21, 4  ;;  %v189_v24 = vadd.f32 %v188_v22, %v186_v20 }
 0x101   :  { %v178_v25 = vadd.f32 %v177_v23, %v176_v21  ;;  %v190_v26 = vrot.slane %v189_v24, 4 }
 0x103   :  { %v179_v28 = vrot.slane %v178_v25, 2  ;;  %v191_v29 = vadd.f32 %v190_v26, %v189_v24 }
 0x105   :  { %v180_v30 = vadd.f32 %v179_v28, %v178_v25  ;;  %v192_v31 = vrot.slane %v191_v29, 2 }
 0x107   :  { %v193_v33 = vadd.f32 %v192_v31, %v191_v29  ;;  %v181_v34 = vrot.slane %v180_v30, 1 }
 0x109   :  { %v194_v35 = vrot.slane %v193_v33, 1  ;;  %v182_v37 = vadd.f32 %v181_v34, %v180_v30 }
 0x10b   :  { %v195_v36 = vadd.f32 %v194_v35, %v193_v33 }
 0x10d   :  { %v200_v38 = vsel %vm199_vm0, %v195_v36, 0.0 }
 0x10e   :  { %v201_v39 = vsel %vm198_vm1, %v182_v37, %v200_v38 }
 0x10f   :  { %202 = vst [vmem:[%s329_s3] sm:$0xff] %v201_v39 }

// kernel: global_generator_forward.73
= control target key start
LH: loop header
LB: loop body
LE: loop exit
PB: predicated region body
PF: predicated region fallthrough
CT: control target
= control target key end

     0   :  { %s2141_s12 = smov 0   ;;  %s2143_s13 = smov 0   ;;  %s2414_s0 = inlined_call_operand.vmem [shape: bf16[512,512], index: 0, kind: input, shape index: {}]   ;;  %s2415_s1 = inlined_call_operand.vmem [shape: bf16[512,128], index: 1, kind: input, shape index: {}]   ;;  %s2416_s2 = inlined_call_operand.vmem [shape: f32[1,128], index: 2, kind: input, shape index: {}]   ;;  %s2417_s3 = inlined_call_operand.vmem [shape: f32[512,128], index: 3, kind: output, shape index: {}]  }
   0x1   :  { %s2145_s14 = smov 0  }
   0x2 LB: > { %s25_s15 = sadd.s32 1, %s2115_s13  ;;  %p1551_p0 = scmp.ge.s32.totalorder %s2119_s14, 1  ;;  %s2119_s14 = sphi %s2145_s14, %s13_s14   ;;  %s2115_s13 = sphi %s2143_s13, %s2419_s13   ;;  %s2111_s12 = sphi %s2141_s12, %s2418_s12  }
   0x3   : > { %p27_p1 = scmp.ge.s32.totalorder %s25_s15, 2  ;;  %p169_p2 = scmp.lt.s32.totalorder %s2119_s14, 3 }
   0x5   : > { %s2421_s15 = smov (%p27_p1, %s25_s15), 0  ;;  %p170_p3 = pnand %p1551_p0, %p169_p2 }
   0x6   : > { %v1905_v0 = vld [vmem:[%s2415_s1 + $0x40] sm:$0xff] (!%p170_p3)   ;;  %v1909_v4 = vld [vmem:[%s2415_s1 + $0x48] sm:$0xff] (!%p170_p3)   ;;  %v1913_v8 = vld [vmem:[%s2415_s1 + $0x50] sm:$0xff] (!%p170_p3)   ;;  %s1552_s25 = sshll.u32 (!%p170_p3), %s2111_s12, 5 }
   0x7   : > { %173 = sbr.rel (%p170_p3) target bundleno = 394 (0x18a), region = 32  ;;  %v1906_v1 = vld [vmem:[%s2415_s1 + $0xc0] sm:$0xff] (!%p170_p3)   ;;  %1657 = vmatprep.subr.bf16.mxu0 (!%p170_p3), %v1905_v0  ;;  %v1910_v5 = vld [vmem:[%s2415_s1 + $0xc8] sm:$0xff] (!%p170_p3)   ;;  %v1914_v9 = vld [vmem:[%s2415_s1 + $0xd0] sm:$0xff] (!%p170_p3)   ;;  %p205_p4 = scmp.lt.s32.totalorder (!%p170_p3), %s1552_s25, 63 }
   0x8   : > { %v1907_v2 = vld [vmem:[%s2415_s1] sm:$0xff] (!%p170_p3)   ;;  %1769 = vmatprep.subr.bf16.mxu1 (!%p170_p3), %v1906_v1  ;;  %v1911_v6 = vld [vmem:[%s2415_s1 + $0x8] sm:$0xff] (!%p170_p3)   ;;  %v1915_v10 = vld [vmem:[%s2415_s1 + $0x10] sm:$0xff] (!%p170_p3)  }
   0x9   : > { %v1908_v3 = vld [vmem:[%s2415_s1 + $0x80] sm:$0xff] (!%p170_p3)   ;;  %1658 = vmatpush3.bf16.msra.mxu0 (!%p170_p3), %v1907_v2  ;;  %v1912_v7 = vld [vmem:[%s2415_s1 + $0x88] sm:$0xff] (!%p170_p3)   ;;  %v1916_v11 = vld [vmem:[%s2415_s1 + $0x90] sm:$0xff] (!%p170_p3)  }
   0xa   : > { %1770 = vmatpush3.bf16.msra.mxu1 (!%p170_p3), %v1908_v3  ;;  %1659 = vmatprep.subr.bf16.mxu0 (!%p170_p3), %v1909_v4  ;;  %v1917_v12 = vld [vmem:[%s2415_s1 + $0x58] sm:$0xff] (!%p170_p3)   ;;  %v1921_v16 = vld [vmem:[%s2415_s1 + $0x60] sm:$0xff] (!%p170_p3)   ;;  %v1925_v20 = vld [vmem:[%s2415_s1 + $0x68] sm:$0xff] (!%p170_p3)  }
   0xb   : > { %1771 = vmatprep.subr.bf16.mxu1 (!%p170_p3), %v1910_v5  ;;  %v1918_v13 = vld [vmem:[%s2415_s1 + $0xd8] sm:$0xff] (!%p170_p3)   ;;  %v1922_v17 = vld [vmem:[%s2415_s1 + $0xe0] sm:$0xff] (!%p170_p3)   ;;  %v1926_v21 = vld [vmem:[%s2415_s1 + $0xe8] sm:$0xff] (!%p170_p3)  }
   0xc   : > { %v1919_v14 = vld [vmem:[%s2415_s1 + $0x18] sm:$0xff] (!%p170_p3)   ;;  %v1923_v18 = vld [vmem:[%s2415_s1 + $0x20] sm:$0xff] (!%p170_p3)   ;;  %v1927_v22 = vld [vmem:[%s2415_s1 + $0x28] sm:$0xff] (!%p170_p3)  }
   0xd   : > { %1660 = vmatpush3.bf16.msra.mxu0 (!%p170_p3), %v1911_v6  ;;  %v1920_v15 = vld [vmem:[%s2415_s1 + $0x98] sm:$0xff] (!%p170_p3)   ;;  %v1924_v19 = vld [vmem:[%s2415_s1 + $0xa0] sm:$0xff] (!%p170_p3)   ;;  %v1928_v23 = vld [vmem:[%s2415_s1 + $0xa8] sm:$0xff] (!%p170_p3)  }
   0xe   : > { %1772 = vmatpush3.bf16.msra.mxu1 %v1912_v7  ;;  %1661 = vmatprep.subr.bf16.mxu0 %v1913_v8  ;;  %s2423_s25 = smov (!%p205_p4, %s1552_s25), 63  ;;  %v1929_v24 = vld [vmem:[%s2415_s1 + $0x70] sm:$0xff]   ;;  %v1933_v28 = vld [vmem:[%s2415_s1 + $0x78] sm:$0xff]  }
   0xf   : > { %1773 = vmatprep.subr.bf16.mxu1 %v1914_v9  ;;  %v1930_v25 = vld [vmem:[%s2415_s1 + $0xf0] sm:$0xff]   ;;  %s1656_s24 = sshll.u32 %s2423_s25, 4  ;;  %v1934_v29 = vld [vmem:[%s2415_s1 + $0xf8] sm:$0xff]   ;;  %s1556_s17 = sshll.u32 %s2423_s25, 3 }
  0x10   : > { %v1931_v26 = vld [vmem:[%s2415_s1 + $0x30] sm:$0xff]   ;;  %s2258_s12 = scalar_lea.vmem %s2414_s0, %s1656_s24  ;;  %v1935_v30 = vld [vmem:[%s2415_s1 + $0x38] sm:$0xff]   ;;  %s2342_s20 = scalar_lea.vmem %s2417_s3, %s1556_s17 }
  0x11   : > { %1662 = vmatpush3.bf16.msra.mxu0 %v1915_v10  ;;  %v1932_v27 = vld [vmem:[%s2415_s1 + $0xb0] sm:$0xff]   ;;  %v1936_v31 = vld [vmem:[%s2415_s1 + $0xb8] sm:$0xff]  }
  0x12   : > { %1774 = vmatpush3.bf16.msra.mxu1 %v1916_v11  ;;  %1663 = vmatprep.subr.bf16.mxu0 %v1917_v12  ;;  %v1937_v32 = vld [vmem:[%s2258_s12] ss:$16 sps:$4 sm:$0xff]   ;;  %v1939_v33 = vld [vmem:[%s2258_s12 + $0x4] ss:$16 sps:$4 sm:$0xff]   ;;  %v1940_v34 = vld [vmem:[%s2258_s12 + $0x8] ss:$16 sps:$4 sm:$0xff]  }
  0x13   : > { %1775 = vmatprep.subr.bf16.mxu1 %v1918_v13  ;;  %v1942_v35 = vld [vmem:[%s2258_s12 + $0xc] ss:$16 sps:$4 sm:$0xff]   ;;  %968 = vmatprep.mubr.bf16.mxu0 %v1939_v33  ;;  %v1943_v36 = vld [vmem:[%s2258_s12 + $0x24] ss:$16 sps:$4 sm:$0xff]   ;;  %v1947_v38 = vld [vmem:[%s2258_s12 + $0x20] ss:$16 sps:$4 sm:$0xff]  }
  0x14   : > { %1129 = vmatprep.mubr.bf16.mxu1 %v1942_v35  ;;  %v1945_v37 = vld [vmem:[%s2258_s12 + $0x2c] ss:$16 sps:$4 sm:$0xff]   ;;  %v1948_v39 = vld [vmem:[%s2258_s12 + $0x28] ss:$16 sps:$4 sm:$0xff]   ;;  %v1949_v40 = vld [vmem:[%s2258_s12 + $0x44] ss:$16 sps:$4 sm:$0xff]  }
  0x15   : > { %1664 = vmatpush3.bf16.msra.mxu0 %v1919_v14  ;;  %v1951_v41 = vld [vmem:[%s2258_s12 + $0x4c] ss:$16 sps:$4 sm:$0xff]   ;;  %v1953_v42 = vld [vmem:[%s2258_s12 + $0x40] ss:$16 sps:$4 sm:$0xff]   ;;  %v1954_v43 = vld [vmem:[%s2258_s12 + $0x48] ss:$16 sps:$4 sm:$0xff]  }
  0x16   : > { %1776 = vmatpush3.bf16.msra.mxu1 %v1920_v15  ;;  %1665 = vmatprep.subr.bf16.mxu0 %v1921_v16  ;;  %v1955_v44 = vld [vmem:[%s2258_s12 + $0x64] ss:$16 sps:$4 sm:$0xff]   ;;  %v1957_v45 = vld [vmem:[%s2258_s12 + $0x6c] ss:$16 sps:$4 sm:$0xff]   ;;  %v1959_v46 = vld [vmem:[%s2258_s12 + $0x60] ss:$16 sps:$4 sm:$0xff]  }
  0x17   : > { %1777 = vmatprep.subr.bf16.mxu1 %v1922_v17  ;;  %v1960_v47 = vld [vmem:[%s2258_s12 + $0x68] ss:$16 sps:$4 sm:$0xff]   ;;  %v1961_v48 = vld [vmem:[%s2258_s12 + $0x84] ss:$16 sps:$4 sm:$0xff]   ;;  %v1963_v49 = vld [vmem:[%s2258_s12 + $0x8c] ss:$16 sps:$4 sm:$0xff]  }
  0x18   : > { %v1965_v50 = vld [vmem:[%s2258_s12 + $0x80] ss:$16 sps:$4 sm:$0xff]   ;;  %v1966_v51 = vld [vmem:[%s2258_s12 + $0x88] ss:$16 sps:$4 sm:$0xff]   ;;  %v1967_v52 = vld [vmem:[%s2258_s12 + $0xa4] ss:$16 sps:$4 sm:$0xff]  }
  0x19   : > { %1666 = vmatpush3.bf16.msra.mxu0 %v1923_v18  ;;  %v1969_v53 = vld [vmem:[%s2258_s12 + $0xac] ss:$16 sps:$4 sm:$0xff]   ;;  %v1971_v54 = vld [vmem:[%s2258_s12 + $0xa0] ss:$16 sps:$4 sm:$0xff]   ;;  %v1972_v55 = vld [vmem:[%s2258_s12 + $0xa8] ss:$16 sps:$4 sm:$0xff]  }
  0x1a   : > { %1778 = vmatpush3.bf16.msra.mxu1 %v1924_v19  ;;  %1667 = vmatprep.subr.bf16.mxu0 %v1925_v20  ;;  %v1973_v56 = vld [vmem:[%s2258_s12 + $0xc4] ss:$16 sps:$4 sm:$0xff]   ;;  %v1975_v57 = vld [vmem:[%s2258_s12 + $0xcc] ss:$16 sps:$4 sm:$0xff]   ;;  %v1977_v58 = vld [vmem:[%s2258_s12 + $0xc0] ss:$16 sps:$4 sm:$0xff]  }
  0x1b   : > { %1779 = vmatprep.subr.bf16.mxu1 %v1926_v21  ;;  %v1978_v59 = vld [vmem:[%s2258_s12 + $0xc8] ss:$16 sps:$4 sm:$0xff]   ;;  %v1979_v60 = vld [vmem:[%s2258_s12 + $0xe4] ss:$16 sps:$4 sm:$0xff]   ;;  %v1981_v61 = vld [vmem:[%s2258_s12 + $0xec] ss:$16 sps:$4 sm:$0xff]  }
  0x1c   : > { %v1983_v62 = vld [vmem:[%s2258_s12 + $0xe0] ss:$16 sps:$4 sm:$0xff]   ;;  %v1984_v63 = vld [vmem:[%s2258_s12 + $0xe8] ss:$16 sps:$4 sm:$0xff]   ;;  %v1985_v0 = vld [vmem:[%s2258_s12 + $0x104] ss:$16 sps:$4 sm:$0xff]  }
  0x1d   : > { %1668 = vmatpush3.bf16.msra.mxu0 %v1927_v22  ;;  %v1987_v1 = vld [vmem:[%s2258_s12 + $0x10c] ss:$16 sps:$4 sm:$0xff]   ;;  %v1989_v2 = vld [vmem:[%s2258_s12 + $0x100] ss:$16 sps:$4 sm:$0xff]   ;;  %v1990_v3 = vld [vmem:[%s2258_s12 + $0x108] ss:$16 sps:$4 sm:$0xff]  }
  0x1e   : > { %1780 = vmatpush3.bf16.msra.mxu1 %v1928_v23  ;;  %1669 = vmatprep.subr.bf16.mxu0 %v1929_v24  ;;  %v1991_v4 = vld [vmem:[%s2258_s12 + $0x124] ss:$16 sps:$4 sm:$0xff]   ;;  %v1993_v5 = vld [vmem:[%s2258_s12 + $0x12c] ss:$16 sps:$4 sm:$0xff]   ;;  %v1995_v6 = vld [vmem:[%s2258_s12 + $0x120] ss:$16 sps:$4 sm:$0xff]  }
  0x1f   : > { %1781 = vmatprep.subr.bf16.mxu1 %v1930_v25  ;;  %v1996_v7 = vld [vmem:[%s2258_s12 + $0x128] ss:$16 sps:$4 sm:$0xff]   ;;  %v1997_v8 = vld [vmem:[%s2258_s12 + $0x144] ss:$16 sps:$4 sm:$0xff]   ;;  %v1999_v9 = vld [vmem:[%s2258_s12 + $0x14c] ss:$16 sps:$4 sm:$0xff]  }
  0x20   : > { %v2001_v10 = vld [vmem:[%s2258_s12 + $0x140] ss:$16 sps:$4 sm:$0xff]   ;;  %v2002_v11 = vld [vmem:[%s2258_s12 + $0x148] ss:$16 sps:$4 sm:$0xff]   ;;  %v2003_v12 = vld [vmem:[%s2258_s12 + $0x164] ss:$16 sps:$4 sm:$0xff]  }
  0x21   : > { %1670 = vmatpush3.bf16.msra.mxu0 %v1931_v26  ;;  %v2005_v13 = vld [vmem:[%s2258_s12 + $0x16c] ss:$16 sps:$4 sm:$0xff]   ;;  %v2007_v14 = vld [vmem:[%s2258_s12 + $0x160] ss:$16 sps:$4 sm:$0xff]   ;;  %v2008_v15 = vld [vmem:[%s2258_s12 + $0x168] ss:$16 sps:$4 sm:$0xff]  }
  0x22   : > { %1782 = vmatpush3.bf16.msra.mxu1 %v1932_v27  ;;  %1671 = vmatprep.subr.bf16.mxu0 %v1933_v28  ;;  %v2009_v16 = vld [vmem:[%s2258_s12 + $0x184] ss:$16 sps:$4 sm:$0xff]   ;;  %v2011_v17 = vld [vmem:[%s2258_s12 + $0x18c] ss:$16 sps:$4 sm:$0xff]   ;;  %v2013_v18 = vld [vmem:[%s2258_s12 + $0x180] ss:$16 sps:$4 sm:$0xff]  }
  0x23   : > { %1783 = vmatprep.subr.bf16.mxu1 %v1934_v29  ;;  %v2014_v19 = vld [vmem:[%s2258_s12 + $0x188] ss:$16 sps:$4 sm:$0xff]   ;;  %v2015_v20 = vld [vmem:[%s2258_s12 + $0x1a4] ss:$16 sps:$4 sm:$0xff]   ;;  %v2017_v21 = vld [vmem:[%s2258_s12 + $0x1ac] ss:$16 sps:$4 sm:$0xff]  }
  0x24   : > { %v2019_v22 = vld [vmem:[%s2258_s12 + $0x1a0] ss:$16 sps:$4 sm:$0xff]   ;;  %v2020_v23 = vld [vmem:[%s2258_s12 + $0x1a8] ss:$16 sps:$4 sm:$0xff]   ;;  %v2021_v24 = vld [vmem:[%s2258_s12 + $0x1c4] ss:$16 sps:$4 sm:$0xff]  }
  0x25   : > { %1672 = vmatpush3.bf16.msra.mxu0 %v1935_v30  ;;  %v2023_v25 = vld [vmem:[%s2258_s12 + $0x1cc] ss:$16 sps:$4 sm:$0xff]   ;;  %v2025_v26 = vld [vmem:[%s2258_s12 + $0x1c0] ss:$16 sps:$4 sm:$0xff]   ;;  %v2026_v27 = vld [vmem:[%s2258_s12 + $0x1c8] ss:$16 sps:$4 sm:$0xff]  }
  0x26   : > { %1784 = vmatpush3.bf16.msra.mxu1 %v1936_v31  ;;  %v2027_v28 = vld [vmem:[%s2258_s12 + $0x1e4] ss:$16 sps:$4 sm:$0xff]   ;;  %v2029_v29 = vld [vmem:[%s2258_s12 + $0x1ec] ss:$16 sps:$4 sm:$0xff]   ;;  %v2031_v30 = vld [vmem:[%s2258_s12 + $0x1e0] ss:$16 sps:$4 sm:$0xff]  }
  0x27   : > { %v2032_v31 = vld [vmem:[%s2258_s12 + $0x1e8] ss:$16 sps:$4 sm:$0xff]  }
  0x28   : > { %969 = vmatmul.mubr.bf16.vlgmr.msra.gmra.mrb[0].mxu0 %v1937_v32 }
  0x29   : > { %1130 = vmatmul.mubr.bf16.vlgmr.msra.gmra.mrb[0].mxu1 %v1940_v34  ;;  %976 = vmatprep.mubr.bf16.mxu0 %v1943_v36 }
  0x2a   : > { %1137 = vmatprep.mubr.bf16.mxu1 %v1945_v37 }
  0x30   : > { %977 = vmatmul.mubr.bf16.gmra.mrb[4].mxu0 %v1947_v38 }
  0x31   : > { %1138 = vmatmul.mubr.bf16.gmra.mrb[4].mxu1 %v1948_v39  ;;  %984 = vmatprep.mubr.bf16.mxu0 %v1949_v40 }
  0x32   : > { %1145 = vmatprep.mubr.bf16.mxu1 %v1951_v41  ;;  %v2333_v41 = vld [vmem:[%s2416_s2] ss:$0 sm:$0xff] }
  0x38   : > { %985 = vmatmul.mubr.bf16.gmra.mrb[8].mxu0 %v1953_v42 }
  0x39   : > { %1146 = vmatmul.mubr.bf16.gmra.mrb[8].mxu1 %v1954_v43  ;;  %992 = vmatprep.mubr.bf16.mxu0 %v1955_v44 }
  0x3a   : > { %1153 = vmatprep.mubr.bf16.mxu1 %v1957_v45 }
  0x40   : > { %993 = vmatmul.mubr.bf16.gmra.mrb[12].mxu0 %v1959_v46 }
  0x41   : > { %1154 = vmatmul.mubr.bf16.gmra.mrb[12].mxu1 %v1960_v47  ;;  %1000 = vmatprep.mubr.bf16.mxu0 %v1961_v48 }
  0x42   : > { %1161 = vmatprep.mubr.bf16.mxu1 %v1963_v49 }
  0x48   : > { %1001 = vmatmul.mubr.bf16.gmra.mrb[16].mxu0 %v1965_v50 }
  0x49   : > { %1162 = vmatmul.mubr.bf16.gmra.mrb[16].mxu1 %v1966_v51  ;;  %1008 = vmatprep.mubr.bf16.mxu0 %v1967_v52 }
  0x4a   : > { %1169 = vmatprep.mubr.bf16.mxu1 %v1969_v53 }
  0x50   : > { %1009 = vmatmul.mubr.bf16.gmra.mrb[20].mxu0 %v1971_v54 }
  0x51   : > { %1170 = vmatmul.mubr.bf16.gmra.mrb[20].mxu1 %v1972_v55  ;;  %1016 = vmatprep.mubr.bf16.mxu0 %v1973_v56 }
  0x52   : > { %1177 = vmatprep.mubr.bf16.mxu1 %v1975_v57 }
  0x58   : > { %1017 = vmatmul.mubr.bf16.gmra.mrb[24].mxu0 %v1977_v58 }
  0x59   : > { %1178 = vmatmul.mubr.bf16.gmra.mrb[24].mxu1 %v1978_v59  ;;  %1024 = vmatprep.mubr.bf16.mxu0 %v1979_v60 }
  0x5a   : > { %1185 = vmatprep.mubr.bf16.mxu1 %v1981_v61 }
  0x60   : > { %1025 = vmatmul.mubr.bf16.gmra.mrb[28].mxu0 %v1983_v62 }
  0x61   : > { %1186 = vmatmul.mubr.bf16.gmra.mrb[28].mxu1 %v1984_v63  ;;  %1032 = vmatprep.mubr.bf16.mxu0 %v1985_v0 }
  0x62   : > { %1193 = vmatprep.mubr.bf16.mxu1 %v1987_v1 }
  0x68   : > { %1033 = vmatmul.mubr.bf16.gmra.mrb[32].mxu0 %v1989_v2 }
  0x69   : > { %1194 = vmatmul.mubr.bf16.gmra.mrb[32].mxu1 %v1990_v3  ;;  %1040 = vmatprep.mubr.bf16.mxu0 %v1991_v4 }
  0x6a   : > { %1201 = vmatprep.mubr.bf16.mxu1 %v1993_v5 }
  0x70   : > { %1041 = vmatmul.mubr.bf16.gmra.mrb[36].mxu0 %v1995_v6 }
  0x71   : > { %1202 = vmatmul.mubr.bf16.gmra.mrb[36].mxu1 %v1996_v7  ;;  %1048 = vmatprep.mubr.bf16.mxu0 %v1997_v8 }
  0x72   : > { %1209 = vmatprep.mubr.bf16.mxu1 %v1999_v9 }
  0x78   : > { %1049 = vmatmul.mubr.bf16.gmra.mrb[40].mxu0 %v2001_v10 }
  0x79   : > { %1210 = vmatmul.mubr.bf16.gmra.mrb[40].mxu1 %v2002_v11  ;;  %1056 = vmatprep.mubr.bf16.mxu0 %v2003_v12 }
  0x7a   : > { %1217 = vmatprep.mubr.bf16.mxu1 %v2005_v13 }
  0x80   : > { %1057 = vmatmul.mubr.bf16.gmra.mrb[44].mxu0 %v2007_v14 }
  0x81   : > { %1218 = vmatmul.mubr.bf16.gmra.mrb[44].mxu1 %v2008_v15  ;;  %1064 = vmatprep.mubr.bf16.mxu0 %v2009_v16 }
  0x82   : > { %1225 = vmatprep.mubr.bf16.mxu1 %v2011_v17 }
  0x88   : > { %1065 = vmatmul.mubr.bf16.gmra.mrb[48].mxu0 %v2013_v18 }
  0x89   : > { %1226 = vmatmul.mubr.bf16.gmra.mrb[48].mxu1 %v2014_v19  ;;  %1072 = vmatprep.mubr.bf16.mxu0 %v2015_v20 }
  0x8a   : > { %1233 = vmatprep.mubr.bf16.mxu1 %v2017_v21 }
  0x90   : > { %1073 = vmatmul.mubr.bf16.gmra.mrb[52].mxu0 %v2019_v22 }
  0x91   : > { %1234 = vmatmul.mubr.bf16.gmra.mrb[52].mxu1 %v2020_v23  ;;  %1080 = vmatprep.mubr.bf16.mxu0 %v2021_v24 }
  0x92   : > { %1241 = vmatprep.mubr.bf16.mxu1 %v2023_v25 }
  0x98   : > { %1081 = vmatmul.mubr.bf16.gmra.mrb[56].mxu0 %v2025_v26 }
  0x99   : > { %1242 = vmatmul.mubr.bf16.gmra.mrb[56].mxu1 %v2026_v27  ;;  %1088 = vmatprep.mubr.bf16.mxu0 %v2027_v28 }
  0x9a   : > { %1249 = vmatprep.mubr.bf16.mxu1 %v2029_v29 }
  0xa0   : > { %1089 = vmatmul.mubr.bf16.gmra.mrb[60].mxu0 %v2031_v30 }
  0xa1   : > { %1250 = vmatmul.mubr.bf16.gmra.mrb[60].mxu1 %v2032_v31 }
  0xfb   : > { %v1673_v32 = vpop.f32.mrb[0].mxu0 }
  0xfc   : > { %v1785_v33 = vpop.f32.mrb[0].mxu1  ;;  %v1674_v34 = vpop.f32.mrb[1].mxu0 }
  0xfd   : > { %v1675_v35 = vadd.f32 %v1674_v34, %v1673_v32  ;;  %v1786_v36 = vpop.f32.mrb[1].mxu1  ;;  %v1676_v37 = vpop.f32.mrb[2].mxu0 }
  0xfe   : > { %v1787_v38 = vadd.f32 %v1786_v36, %v1785_v33  ;;  %v1788_v39 = vpop.f32.mrb[2].mxu1  ;;  %v1677_v40 = vpop.f32.mrb[3].mxu0 }
  0xff   : > { %v1678_v42 = vadd.f32 %v1677_v40, %v1676_v37  ;;  %v1789_v43 = vpop.f32.mrb[3].mxu1 }
 0x100   : > { %v1132_v44 = vadd.f32 %v1787_v38, %v1675_v35  ;;  %v1790_v45 = vadd.f32 %v1789_v43, %v1788_v39 }
 0x102   : > { %v1364_v46 = vadd.f32 %v2333_v41, %v1132_v44  ;;  %v1135_v47 = vadd.f32 %v1790_v45, %v1678_v42 }
 0x103   : > { %v1679_v48 = vpop.f32.mrb[4].mxu0 }
 0x104   : > { %2033 = vtanh.f32 %v1364_v46  ;;  %v1365_v49 = vadd.f32 %v2333_v41, %v1135_v47  ;;  %v1791_v50 = vpop.f32.mrb[4].mxu1  ;;  %v1680_v51 = vpop.f32.mrb[5].mxu0 }
 0x105   : > { %v1681_v52 = vadd.f32 %v1680_v51, %v1679_v48  ;;  %v1792_v53 = vpop.f32.mrb[5].mxu1  ;;  %v1682_v54 = vpop.f32.mrb[6].mxu0 }
 0x106   : > { %2035 = vtanh.f32 %v1365_v49  ;;  %v1793_v55 = vadd.f32 %v1792_v53, %v1791_v50  ;;  %v1794_v56 = vpop.f32.mrb[6].mxu1  ;;  %v1683_v57 = vpop.f32.mrb[7].mxu0 }
 0x107   : > { %v1684_v58 = vadd.f32 %v1683_v57, %v1682_v54  ;;  %v1795_v59 = vpop.f32.mrb[7].mxu1 }
 0x108   : > { %v1140_v60 = vadd.f32 %v1793_v55, %v1681_v52  ;;  %v1796_v61 = vadd.f32 %v1795_v59, %v1794_v56 }
 0x10a   : > { %v1366_v62 = vadd.f32 %v2333_v41, %v1140_v60  ;;  %v1143_v63 = vadd.f32 %v1796_v61, %v1684_v58 }
 0x10b   : > { %v1685_v0 = vpop.f32.mrb[8].mxu0 }
 0x10c   : > { %2037 = vtanh.f32 %v1366_v62  ;;  %v1367_v1 = vadd.f32 %v2333_v41, %v1143_v63  ;;  %v1797_v2 = vpop.f32.mrb[8].mxu1  ;;  %v1686_v3 = vpop.f32.mrb[9].mxu0 }
 0x10d   : > { %v1687_v4 = vadd.f32 %v1686_v3, %v1685_v0  ;;  %v1798_v5 = vpop.f32.mrb[9].mxu1  ;;  %v1688_v6 = vpop.f32.mrb[10].mxu0 }
 0x10e   : > { %v2034_v7 = vpop.eup %2033  ;;  %2039 = vtanh.f32 %v1367_v1  ;;  %v1799_v8 = vadd.f32 %v1798_v5, %v1797_v2  ;;  %v1800_v9 = vpop.f32.mrb[10].mxu1 }
 0x10f   : > { %v1689_v10 = vpop.f32.mrb[11].mxu0  ;;  %1428 = vst [vmem:[%s2342_s20] sm:$0xff] %v2034_v7  ;;  %v1801_v12 = vpop.f32.mrb[11].mxu1 }
 0x110   : > { %v1690_v11 = vadd.f32 %v1689_v10, %v1688_v6  ;;  %v2036_v13 = vpop.eup %2035  ;;  %v1148_v14 = vadd.f32 %v1799_v8, %v1687_v4  ;;  %v1802_v15 = vadd.f32 %v1801_v12, %v1800_v9 }
 0x111   : > { %1429 = vst [vmem:[%s2342_s20 + $0x8] sm:$0xff] %v2036_v13 }
 0x112   : > { %v1368_v16 = vadd.f32 %v2333_v41, %v1148_v14  ;;  %v1151_v17 = vadd.f32 %v1802_v15, %v1690_v11 }
 0x113   : > { %v1691_v18 = vpop.f32.mrb[12].mxu0 }
 0x114   : > { %2041 = vtanh.f32 %v1368_v16  ;;  %v1369_v19 = vadd.f32 %v2333_v41, %v1151_v17  ;;  %v1803_v20 = vpop.f32.mrb[12].mxu1  ;;  %v1692_v21 = vpop.f32.mrb[13].mxu0 }
 0x115   : > { %v1693_v22 = vadd.f32 %v1692_v21, %v1691_v18  ;;  %v1804_v23 = vpop.f32.mrb[13].mxu1  ;;  %v1694_v24 = vpop.f32.mrb[14].mxu0 }
 0x116   : > { %v2038_v25 = vpop.eup %2037  ;;  %2043 = vtanh.f32 %v1369_v19  ;;  %v1805_v26 = vadd.f32 %v1804_v23, %v1803_v20  ;;  %v1806_v27 = vpop.f32.mrb[14].mxu1 }
 0x117   : > { %v1695_v28 = vpop.f32.mrb[15].mxu0  ;;  %1430 = vst [vmem:[%s2342_s20 + $0x10] sm:$0xff] %v2038_v25  ;;  %v1807_v30 = vpop.f32.mrb[15].mxu1 }
 0x118   : > { %v1696_v29 = vadd.f32 %v1695_v28, %v1694_v24  ;;  %v2040_v31 = vpop.eup %2039  ;;  %v1156_v32 = vadd.f32 %v1805_v26, %v1693_v22  ;;  %v1808_v33 = vadd.f32 %v1807_v30, %v1806_v27 }
 0x119   : > { %1431 = vst [vmem:[%s2342_s20 + $0x18] sm:$0xff] %v2040_v31 }
 0x11a   : > { %v1370_v34 = vadd.f32 %v2333_v41, %v1156_v32  ;;  %v1159_v35 = vadd.f32 %v1808_v33, %v1696_v29 }
 0x11b   : > { %v1697_v36 = vpop.f32.mrb[16].mxu0 }
 0x11c   : > { %2045 = vtanh.f32 %v1370_v34  ;;  %v1371_v37 = vadd.f32 %v2333_v41, %v1159_v35  ;;  %v1809_v38 = vpop.f32.mrb[16].mxu1  ;;  %v1698_v39 = vpop.f32.mrb[17].mxu0 }
 0x11d   : > { %v1699_v40 = vadd.f32 %v1698_v39, %v1697_v36  ;;  %v1810_v42 = vpop.f32.mrb[17].mxu1  ;;  %v1700_v43 = vpop.f32.mrb[18].mxu0 }
 0x11e   : > { %v2042_v44 = vpop.eup %2041  ;;  %2047 = vtanh.f32 %v1371_v37  ;;  %v1811_v45 = vadd.f32 %v1810_v42, %v1809_v38  ;;  %v1812_v46 = vpop.f32.mrb[18].mxu1 }
 0x11f   : > { %v1701_v47 = vpop.f32.mrb[19].mxu0  ;;  %1432 = vst [vmem:[%s2342_s20 + $0x20] sm:$0xff] %v2042_v44  ;;  %v1813_v49 = vpop.f32.mrb[19].mxu1 }
 0x120   : > { %v1702_v48 = vadd.f32 %v1701_v47, %v1700_v43  ;;  %v2044_v50 = vpop.eup %2043  ;;  %v1164_v51 = vadd.f32 %v1811_v45, %v1699_v40  ;;  %v1814_v52 = vadd.f32 %v1813_v49, %v1812_v46 }
 0x121   : > { %1433 = vst [vmem:[%s2342_s20 + $0x28] sm:$0xff] %v2044_v50 }
 0x122   : > { %v1372_v53 = vadd.f32 %v2333_v41, %v1164_v51  ;;  %v1167_v54 = vadd.f32 %v1814_v52, %v1702_v48 }
 0x123   : > { %v1703_v55 = vpop.f32.mrb[20].mxu0 }
 0x124   : > { %2049 = vtanh.f32 %v1372_v53  ;;  %v1373_v56 = vadd.f32 %v2333_v41, %v1167_v54  ;;  %v1815_v57 = vpop.f32.mrb[20].mxu1  ;;  %v1704_v58 = vpop.f32.mrb[21].mxu0 }
 0x125   : > { %v1705_v59 = vadd.f32 %v1704_v58, %v1703_v55  ;;  %v1816_v60 = vpop.f32.mrb[21].mxu1  ;;  %v1706_v61 = vpop.f32.mrb[22].mxu0 }
 0x126   : > { %v2046_v62 = vpop.eup %2045  ;;  %2051 = vtanh.f32 %v1373_v56  ;;  %v1817_v63 = vadd.f32 %v1816_v60, %v1815_v57  ;;  %v1818_v0 = vpop.f32.mrb[22].mxu1 }
 0x127   : > { %v1707_v1 = vpop.f32.mrb[23].mxu0  ;;  %1434 = vst [vmem:[%s2342_s20 + $0x30] sm:$0xff] %v2046_v62  ;;  %v1819_v3 = vpop.f32.mrb[23].mxu1 }
 0x128   : > { %v1708_v2 = vadd.f32 %v1707_v1, %v1706_v61  ;;  %v2048_v4 = vpop.eup %2047  ;;  %v1172_v5 = vadd.f32 %v1817_v63, %v1705_v59  ;;  %v1820_v6 = vadd.f32 %v1819_v3, %v1818_v0 }
 0x129   : > { %1435 = vst [vmem:[%s2342_s20 + $0x38] sm:$0xff] %v2048_v4 }
 0x12a   : > { %v1374_v7 = vadd.f32 %v2333_v41, %v1172_v5  ;;  %v1175_v8 = vadd.f32 %v1820_v6, %v1708_v2 }
 0x12b   : > { %v1709_v9 = vpop.f32.mrb[24].mxu0 }
 0x12c   : > { %2053 = vtanh.f32 %v1374_v7  ;;  %v1375_v10 = vadd.f32 %v2333_v41, %v1175_v8  ;;  %v1821_v11 = vpop.f32.mrb[24].mxu1  ;;  %v1710_v12 = vpop.f32.mrb[25].mxu0 }
 0x12d   : > { %v1711_v13 = vadd.f32 %v1710_v12, %v1709_v9  ;;  %v1822_v14 = vpop.f32.mrb[25].mxu1  ;;  %v1712_v15 = vpop.f32.mrb[26].mxu0 }
 0x12e   : > { %v2050_v16 = vpop.eup %2049  ;;  %2055 = vtanh.f32 %v1375_v10  ;;  %v1823_v17 = vadd.f32 %v1822_v14, %v1821_v11  ;;  %v1824_v18 = vpop.f32.mrb[26].mxu1 }
 0x12f   : > { %v1713_v19 = vpop.f32.mrb[27].mxu0  ;;  %1436 = vst [vmem:[%s2342_s20 + $0x40] sm:$0xff] %v2050_v16  ;;  %v1825_v21 = vpop.f32.mrb[27].mxu1 }
 0x130   : > { %v1714_v20 = vadd.f32 %v1713_v19, %v1712_v15  ;;  %v2052_v22 = vpop.eup %2051  ;;  %v1180_v23 = vadd.f32 %v1823_v17, %v1711_v13  ;;  %v1826_v24 = vadd.f32 %v1825_v21, %v1824_v18 }
 0x131   : > { %1437 = vst [vmem:[%s2342_s20 + $0x48] sm:$0xff] %v2052_v22 }
 0x132   : > { %v1376_v25 = vadd.f32 %v2333_v41, %v1180_v23  ;;  %v1183_v26 = vadd.f32 %v1826_v24, %v1714_v20 }
 0x133   : > { %v1715_v27 = vpop.f32.mrb[28].mxu0 }
 0x134   : > { %2057 = vtanh.f32 %v1376_v25  ;;  %v1377_v28 = vadd.f32 %v2333_v41, %v1183_v26  ;;  %v1827_v29 = vpop.f32.mrb[28].mxu1  ;;  %v1716_v30 = vpop.f32.mrb[29].mxu0 }
 0x135   : > { %v1717_v31 = vadd.f32 %v1716_v30, %v1715_v27  ;;  %v1828_v32 = vpop.f32.mrb[29].mxu1  ;;  %v1718_v33 = vpop.f32.mrb[30].mxu0 }
 0x136   : > { %v2054_v34 = vpop.eup %2053  ;;  %2059 = vtanh.f32 %v1377_v28  ;;  %v1829_v35 = vadd.f32 %v1828_v32, %v1827_v29  ;;  %v1830_v36 = vpop.f32.mrb[30].mxu1 }
 0x137   : > { %v1719_v37 = vpop.f32.mrb[31].mxu0  ;;  %1438 = vst [vmem:[%s2342_s20 + $0x50] sm:$0xff] %v2054_v34  ;;  %v1831_v39 = vpop.f32.mrb[31].mxu1 }
 0x138   : > { %v1720_v38 = vadd.f32 %v1719_v37, %v1718_v33  ;;  %v2056_v40 = vpop.eup %2055  ;;  %v1188_v42 = vadd.f32 %v1829_v35, %v1717_v31  ;;  %v1832_v43 = vadd.f32 %v1831_v39, %v1830_v36 }
 0x139   : > { %1439 = vst [vmem:[%s2342_s20 + $0x58] sm:$0xff] %v2056_v40 }
 0x13a   : > { %v1378_v44 = vadd.f32 %v2333_v41, %v1188_v42  ;;  %v1191_v45 = vadd.f32 %v1832_v43, %v1720_v38 }
 0x13b   : > { %v1721_v46 = vpop.f32.mrb[32].mxu0 }
 0x13c   : > { %2061 = vtanh.f32 %v1378_v44  ;;  %v1379_v47 = vadd.f32 %v2333_v41, %v1191_v45  ;;  %v1833_v48 = vpop.f32.mrb[32].mxu1  ;;  %v1722_v49 = vpop.f32.mrb[33].mxu0 }
 0x13d   : > { %v1723_v50 = vadd.f32 %v1722_v49, %v1721_v46  ;;  %v1834_v51 = vpop.f32.mrb[33].mxu1  ;;  %v1724_v52 = vpop.f32.mrb[34].mxu0 }
 0x13e   : > { %v2058_v53 = vpop.eup %2057  ;;  %2063 = vtanh.f32 %v1379_v47  ;;  %v1835_v54 = vadd.f32 %v1834_v51, %v1833_v48  ;;  %v1836_v55 = vpop.f32.mrb[34].mxu1 }
 0x13f   : > { %v1725_v56 = vpop.f32.mrb[35].mxu0  ;;  %1440 = vst [vmem:[%s2342_s20 + $0x60] sm:$0xff] %v2058_v53  ;;  %v1837_v58 = vpop.f32.mrb[35].mxu1 }
 0x140   : > { %v1726_v57 = vadd.f32 %v1725_v56, %v1724_v52  ;;  %v2060_v59 = vpop.eup %2059  ;;  %v1196_v60 = vadd.f32 %v1835_v54, %v1723_v50  ;;  %v1838_v61 = vadd.f32 %v1837_v58, %v1836_v55 }
 0x141   : > { %1441 = vst [vmem:[%s2342_s20 + $0x68] sm:$0xff] %v2060_v59 }
 0x142   : > { %v1380_v62 = vadd.f32 %v2333_v41, %v1196_v60  ;;  %v1199_v63 = vadd.f32 %v1838_v61, %v1726_v57 }
 0x143   : > { %v1727_v0 = vpop.f32.mrb[36].mxu0 }
 0x144   : > { %2065 = vtanh.f32 %v1380_v62  ;;  %v1381_v1 = vadd.f32 %v2333_v41, %v1199_v63  ;;  %v1839_v2 = vpop.f32.mrb[36].mxu1  ;;  %v1728_v3 = vpop.f32.mrb[37].mxu0 }
 0x145   : > { %v1729_v4 = vadd.f32 %v1728_v3, %v1727_v0  ;;  %v1840_v5 = vpop.f32.mrb[37].mxu1  ;;  %v1730_v6 = vpop.f32.mrb[38].mxu0 }
 0x146   : > { %v2062_v7 = vpop.eup %2061  ;;  %2067 = vtanh.f32 %v1381_v1  ;;  %v1841_v8 = vadd.f32 %v1840_v5, %v1839_v2  ;;  %v1842_v9 = vpop.f32.mrb[38].mxu1 }
 0x147   : > { %v1731_v10 = vpop.f32.mrb[39].mxu0  ;;  %1442 = vst [vmem:[%s2342_s20 + $0x70] sm:$0xff] %v2062_v7  ;;  %v1843_v12 = vpop.f32.mrb[39].mxu1 }
 0x148   : > { %v1732_v11 = vadd.f32 %v1731_v10, %v1730_v6  ;;  %v2064_v13 = vpop.eup %2063  ;;  %v1204_v14 = vadd.f32 %v1841_v8, %v1729_v4  ;;  %v1844_v15 = vadd.f32 %v1843_v12, %v1842_v9 }
 0x149   : > { %1443 = vst [vmem:[%s2342_s20 + $0x78] sm:$0xff] %v2064_v13 }
 0x14a   : > { %v1382_v16 = vadd.f32 %v2333_v41, %v1204_v14  ;;  %v1207_v17 = vadd.f32 %v1844_v15, %v1732_v11 }
 0x14b   : > { %v1733_v18 = vpop.f32.mrb[40].mxu0 }
 0x14c   : > { %2069 = vtanh.f32 %v1382_v16  ;;  %v1383_v19 = vadd.f32 %v2333_v41, %v1207_v17  ;;  %v1845_v20 = vpop.f32.mrb[40].mxu1  ;;  %v1734_v21 = vpop.f32.mrb[41].mxu0 }
 0x14d   : > { %v1735_v22 = vadd.f32 %v1734_v21, %v1733_v18  ;;  %v1846_v23 = vpop.f32.mrb[41].mxu1  ;;  %v1736_v24 = vpop.f32.mrb[42].mxu0 }
 0x14e   : > { %v2066_v25 = vpop.eup %2065  ;;  %2071 = vtanh.f32 %v1383_v19  ;;  %v1847_v26 = vadd.f32 %v1846_v23, %v1845_v20  ;;  %v1848_v27 = vpop.f32.mrb[42].mxu1 }
 0x14f   : > { %v1737_v28 = vpop.f32.mrb[43].mxu0  ;;  %1444 = vst [vmem:[%s2342_s20 + $0x80] sm:$0xff] %v2066_v25  ;;  %v1849_v30 = vpop.f32.mrb[43].mxu1 }
 0x150   : > { %v1738_v29 = vadd.f32 %v1737_v28, %v1736_v24  ;;  %v2068_v31 = vpop.eup %2067  ;;  %v1212_v32 = vadd.f32 %v1847_v26, %v1735_v22  ;;  %v1850_v33 = vadd.f32 %v1849_v30, %v1848_v27 }
 0x151   : > { %1445 = vst [vmem:[%s2342_s20 + $0x88] sm:$0xff] %v2068_v31 }
 0x152   : > { %v1384_v34 = vadd.f32 %v2333_v41, %v1212_v32  ;;  %v1215_v35 = vadd.f32 %v1850_v33, %v1738_v29 }
 0x153   : > { %v1739_v36 = vpop.f32.mrb[44].mxu0 }
 0x154   : > { %2073 = vtanh.f32 %v1384_v34  ;;  %v1385_v37 = vadd.f32 %v2333_v41, %v1215_v35  ;;  %v1851_v38 = vpop.f32.mrb[44].mxu1  ;;  %v1740_v39 = vpop.f32.mrb[45].mxu0 }
 0x155   : > { %v1741_v40 = vadd.f32 %v1740_v39, %v1739_v36  ;;  %v1852_v42 = vpop.f32.mrb[45].mxu1  ;;  %v1742_v43 = vpop.f32.mrb[46].mxu0 }
 0x156   : > { %v2070_v44 = vpop.eup %2069  ;;  %2075 = vtanh.f32 %v1385_v37  ;;  %v1853_v45 = vadd.f32 %v1852_v42, %v1851_v38  ;;  %v1854_v46 = vpop.f32.mrb[46].mxu1 }
 0x157   : > { %v1743_v47 = vpop.f32.mrb[47].mxu0  ;;  %1446 = vst [vmem:[%s2342_s20 + $0x90] sm:$0xff] %v2070_v44  ;;  %v1855_v49 = vpop.f32.mrb[47].mxu1 }
 0x158   : > { %v1744_v48 = vadd.f32 %v1743_v47, %v1742_v43  ;;  %v2072_v50 = vpop.eup %2071  ;;  %v1220_v51 = vadd.f32 %v1853_v45, %v1741_v40  ;;  %v1856_v52 = vadd.f32 %v1855_v49, %v1854_v46 }
 0x159   : > { %1447 = vst [vmem:[%s2342_s20 + $0x98] sm:$0xff] %v2072_v50 }
 0x15a   : > { %v1386_v53 = vadd.f32 %v2333_v41, %v1220_v51  ;;  %v1223_v54 = vadd.f32 %v1856_v52, %v1744_v48 }
 0x15b   : > { %v1745_v55 = vpop.f32.mrb[48].mxu0 }
 0x15c   : > { %2077 = vtanh.f32 %v1386_v53  ;;  %v1387_v56 = vadd.f32 %v2333_v41, %v1223_v54  ;;  %v1857_v57 = vpop.f32.mrb[48].mxu1  ;;  %v1746_v58 = vpop.f32.mrb[49].mxu0 }
 0x15d   : > { %v1747_v59 = vadd.f32 %v1746_v58, %v1745_v55  ;;  %v1858_v60 = vpop.f32.mrb[49].mxu1  ;;  %v1748_v61 = vpop.f32.mrb[50].mxu0 }
 0x15e   : > { %v2074_v62 = vpop.eup %2073  ;;  %2079 = vtanh.f32 %v1387_v56  ;;  %v1859_v63 = vadd.f32 %v1858_v60, %v1857_v57  ;;  %v1860_v0 = vpop.f32.mrb[50].mxu1 }
 0x15f   : > { %v1749_v1 = vpop.f32.mrb[51].mxu0  ;;  %1448 = vst [vmem:[%s2342_s20 + $0xa0] sm:$0xff] %v2074_v62  ;;  %v1861_v3 = vpop.f32.mrb[51].mxu1 }
 0x160   : > { %v1750_v2 = vadd.f32 %v1749_v1, %v1748_v61  ;;  %v2076_v4 = vpop.eup %2075  ;;  %v1228_v5 = vadd.f32 %v1859_v63, %v1747_v59  ;;  %v1862_v6 = vadd.f32 %v1861_v3, %v1860_v0 }
 0x161   : > { %1449 = vst [vmem:[%s2342_s20 + $0xa8] sm:$0xff] %v2076_v4 }
 0x162   : > { %v1388_v7 = vadd.f32 %v2333_v41, %v1228_v5  ;;  %v1231_v8 = vadd.f32 %v1862_v6, %v1750_v2 }
 0x163   : > { %v1751_v9 = vpop.f32.mrb[52].mxu0 }
 0x164   : > { %2081 = vtanh.f32 %v1388_v7  ;;  %v1389_v10 = vadd.f32 %v2333_v41, %v1231_v8  ;;  %v1863_v11 = vpop.f32.mrb[52].mxu1  ;;  %v1752_v12 = vpop.f32.mrb[53].mxu0 }
 0x165   : > { %v1753_v13 = vadd.f32 %v1752_v12, %v1751_v9  ;;  %v1864_v14 = vpop.f32.mrb[53].mxu1  ;;  %v1754_v15 = vpop.f32.mrb[54].mxu0 }
 0x166   : > { %v2078_v16 = vpop.eup %2077  ;;  %2083 = vtanh.f32 %v1389_v10  ;;  %v1865_v17 = vadd.f32 %v1864_v14, %v1863_v11  ;;  %v1866_v18 = vpop.f32.mrb[54].mxu1 }
 0x167   : > { %v1755_v19 = vpop.f32.mrb[55].mxu0  ;;  %1450 = vst [vmem:[%s2342_s20 + $0xb0] sm:$0xff] %v2078_v16  ;;  %v1867_v21 = vpop.f32.mrb[55].mxu1 }
 0x168   : > { %v1756_v20 = vadd.f32 %v1755_v19, %v1754_v15  ;;  %v2080_v22 = vpop.eup %2079  ;;  %v1236_v23 = vadd.f32 %v1865_v17, %v1753_v13  ;;  %v1868_v24 = vadd.f32 %v1867_v21, %v1866_v18 }
 0x169   : > { %1451 = vst [vmem:[%s2342_s20 + $0xb8] sm:$0xff] %v2080_v22 }
 0x16a   : > { %v1390_v25 = vadd.f32 %v2333_v41, %v1236_v23  ;;  %v1239_v26 = vadd.f32 %v1868_v24, %v1756_v20 }
 0x16b   : > { %v1757_v27 = vpop.f32.mrb[56].mxu0 }
 0x16c   : > { %2085 = vtanh.f32 %v1390_v25  ;;  %v1391_v28 = vadd.f32 %v2333_v41, %v1239_v26  ;;  %v1869_v29 = vpop.f32.mrb[56].mxu1  ;;  %v1758_v30 = vpop.f32.mrb[57].mxu0 }
 0x16d   : > { %v1759_v31 = vadd.f32 %v1758_v30, %v1757_v27  ;;  %v1870_v32 = vpop.f32.mrb[57].mxu1  ;;  %v1760_v33 = vpop.f32.mrb[58].mxu0 }
 0x16e   : > { %v2082_v34 = vpop.eup %2081  ;;  %2087 = vtanh.f32 %v1391_v28  ;;  %v1871_v35 = vadd.f32 %v1870_v32, %v1869_v29  ;;  %v1872_v36 = vpop.f32.mrb[58].mxu1 }
 0x16f   : > { %v1761_v37 = vpop.f32.mrb[59].mxu0  ;;  %1452 = vst [vmem:[%s2342_s20 + $0xc0] sm:$0xff] %v2082_v34  ;;  %v1873_v39 = vpop.f32.mrb[59].mxu1 }
 0x170   : > { %v1762_v38 = vadd.f32 %v1761_v37, %v1760_v33  ;;  %v2084_v40 = vpop.eup %2083  ;;  %v1244_v42 = vadd.f32 %v1871_v35, %v1759_v31  ;;  %v1874_v43 = vadd.f32 %v1873_v39, %v1872_v36 }
 0x171   : > { %1453 = vst [vmem:[%s2342_s20 + $0xc8] sm:$0xff] %v2084_v40 }
 0x172   : > { %v1392_v44 = vadd.f32 %v2333_v41, %v1244_v42  ;;  %v1247_v45 = vadd.f32 %v1874_v43, %v1762_v38 }
 0x173   : > { %v1763_v46 = vpop.f32.mrb[60].mxu0 }
 0x174   : > { %2089 = vtanh.f32 %v1392_v44  ;;  %v1393_v47 = vadd.f32 %v2333_v41, %v1247_v45  ;;  %v1875_v48 = vpop.f32.mrb[60].mxu1  ;;  %v1764_v49 = vpop.f32.mrb[61].mxu0 }
 0x175   : > { %v1765_v50 = vadd.f32 %v1764_v49, %v1763_v46  ;;  %v1876_v51 = vpop.f32.mrb[61].mxu1  ;;  %v1766_v52 = vpop.f32.mrb[62].mxu0 }
 0x176   : > { %v2086_v53 = vpop.eup %2085  ;;  %2091 = vtanh.f32 %v1393_v47  ;;  %v1877_v54 = vadd.f32 %v1876_v51, %v1875_v48  ;;  %v1878_v55 = vpop.f32.mrb[62].mxu1 }
 0x177   : > { %v1767_v56 = vpop.f32.mrb[63].mxu0  ;;  %1454 = vst [vmem:[%s2342_s20 + $0xd0] sm:$0xff] %v2086_v53  ;;  %v1879_v58 = vpop.f32.mrb[63].mxu1 }
 0x178   : > { %v1768_v57 = vadd.f32 %v1767_v56, %v1766_v52  ;;  %v2088_v59 = vpop.eup %2087  ;;  %v1252_v60 = vadd.f32 %v1877_v54, %v1765_v50  ;;  %v1880_v61 = vadd.f32 %v1879_v58, %v1878_v55 }
 0x179   : > { %1455 = vst [vmem:[%s2342_s20 + $0xd8] sm:$0xff] %v2088_v59 }
 0x17a   : > { %v1394_v62 = vadd.f32 %v2333_v41, %v1252_v60  ;;  %v1255_v63 = vadd.f32 %v1880_v61, %v1768_v57 }
 0x17c   : > { %2093 = vtanh.f32 %v1394_v62  ;;  %v1395_v0 = vadd.f32 %v2333_v41, %v1255_v63 }
 0x17e   : > { %v2090_v1 = vpop.eup %2089  ;;  %2095 = vtanh.f32 %v1395_v0 }
 0x17f   : > { %1456 = vst [vmem:[%s2342_s20 + $0xe0] sm:$0xff] %v2090_v1 }
 0x180   : > { %v2092_v2 = vpop.eup %2091 }
 0x181   : > { %1457 = vst [vmem:[%s2342_s20 + $0xe8] sm:$0xff] %v2092_v2 }
 0x186   : > { %v2094_v3 = vpop.eup %2093 }
 0x187   : > { %1458 = vst [vmem:[%s2342_s20 + $0xf0] sm:$0xff] %v2094_v3 }
 0x188   : > { %v2096_v4 = vpop.eup %2095 }
 0x189   : > { %1459 = vst [vmem:[%s2342_s20 + $0xf8] sm:$0xff] %v2096_v4 }
 0x18a PF: > { %s13_s14 = sadd.s32 1, %s2119_s14   ;;  %s2418_s12 = smov %s2115_s13 }
 0x18b   : > { %p10_p5 = scmp.ge.s32.totalorder %s13_s14, 4   ;;  %s2419_s13 = smov %s2421_s15 }
 0x18d   :  { %12 = sbr.rel (!%p10_p5) target bundleno = 2 (0x2), region = 73 }

</bundles_post_ra>
